<compile_context>
chip_gen: v6e
topology: v6e:2x2x1
jax: 0.10.0
libtpu: 0.0.40
codegen_flags: <defaults>
</compile_context>

<pallas_src>
import jax
import jax.numpy as jnp
from jax import lax
from jax.experimental import pallas as pl
from jax.experimental.pallas import tpu as pltpu


def self_attention_kernel(x_ref, wkq_ref, wvo_ref, y_ref, att_ref):
    """One grid step = `bblk` independent SelfAttention instances.

    x_ref  : (bblk*n, m)   rows of bblk batch elements, flattened
    wkq_ref: (2, m, out)   [Wk^T, 0.06*Wq^T]      (VMEM-resident across steps)
    wvo_ref: (m, m)        Wv^T @ Wo^T            (output projection folded in)
    y_ref  : (bblk*n, m)
    att_ref: (bblk*n, n)
    """
    rows, m = x_ref.shape
    n = att_ref.shape[1]
    bblk = rows // n

    x2 = x_ref[...]  # (bblk*n, m) f32

    # Wide projection matmuls over all bblk*n rows at once (256 rows/step at the
    # default block size) — fills MXU rows and amortizes fill/drain.
    k2 = jnp.dot(x2, wkq_ref[0], preferred_element_type=jnp.float32)
    q2 = jnp.dot(x2, wkq_ref[1], preferred_element_type=jnp.float32)   # 0.06 folded in
    v2 = jnp.dot(x2, wvo_ref[...], preferred_element_type=jnp.float32)  # Wo folded in

    # Per-instance attention.  Unrolled at trace time with static row offsets
    # (multiples of n=8 -> sublane-aligned value slices).  A batched 3-D
    # dot_general would lower to the same `bblk` small MXU ops; the explicit
    # loop keeps every op on the plain 2-D lowering path (no in-kernel
    # transposes, no batched transposed-contraction forms).
    for b in range(bblk):
        r0 = b * n
        kb = k2[r0:r0 + n, :]
        qb = q2[r0:r0 + n, :]
        vb = v2[r0:r0 + n, :]

        # logits = Q @ K^T : contract last dims (MXU-native, no transpose temp).
        logits = lax.dot_general(
            qb, kb, (((1,), (1,)), ((), ())), preferred_element_type=jnp.float32)

        # Softmax over last dim — all f32 VPU math (v5e-safe, keeps 1e-5 att tol).
        mx = jnp.max(logits, axis=-1, keepdims=True)
        e = jnp.exp(logits - mx)
        denom = jnp.sum(e, axis=-1, keepdims=True)
        att = e * pl.reciprocal(denom, approx=False)
        att_ref[r0:r0 + n, :] = att.astype(att_ref.dtype)

        # Module quirk: y = (V^T @ att)^T = att^T @ V'  (contract dim 0 of both).
        yb = lax.dot_general(
            att, vb, (((0,), (0,)), ((), ())), preferred_element_type=jnp.float32)
        y_ref[r0:r0 + n, :] = yb.astype(y_ref.dtype)


def self_attention(x, wk, wq, wv, wo, *, block_b=32):
    """x: (n, m) or (B, n, m).  Weights in PyTorch Linear layout:
    wk/wq/wv: (output_size, input_size), wo: (input_size, output_size)."""
    squeeze = x.ndim == 2
    if squeeze:
        x = x[None]
    B, n, m = x.shape
    out_size = wk.shape[0]
    assert wk.shape == (out_size, m)
    assert wq.shape == (out_size, m)
    assert wv.shape == (out_size, m)
    assert wo.shape == (m, out_size)

    hp = lax.Precision.HIGHEST
    # One-time host-side transforms: pre-transpose, fold the 0.06 scale into Wq,
    # fold the output projection into the value projection (HIGHEST precision so
    # the re-association stays well inside the 1e-4 y tolerance).
    wkq = jnp.stack([wk.T, (0.06 * wq).T], axis=0)        # (2, m, out)
    wvo = jnp.dot(wv.T, wo.T, precision=hp)               # (m, m)

    # Batch blocking: bblk instances per grid step -> bblk*n MXU rows per step.
    bblk = max(1, min(block_b, B))
    if (bblk * n) % 8 != 0:        # keep the streamed row-block sublane-aligned
        bblk = B                   # fall back to a single full-extent block
    b_pad = pl.cdiv(B, bblk) * bblk
    if b_pad != B:                 # pad ragged batch; sliced off after the call
        x = jnp.concatenate([x, jnp.zeros((b_pad - B, n, m), x.dtype)], axis=0)

    # Present x / y / att as 2-D row slabs (wrapper reshapes are free layout
    # plumbing); the kernel then only touches 2-D tiles.
    x2 = x.reshape(b_pad * n, m).astype(jnp.float32)
    rows_blk = bblk * n
    num_steps = b_pad // bblk

    y2, att2 = pl.pallas_call(
        self_attention_kernel,
        out_shape=(
            jax.ShapeDtypeStruct((b_pad * n, m), jnp.float32),
            jax.ShapeDtypeStruct((b_pad * n, n), jnp.float32),
        ),
        grid=(num_steps,),
        in_specs=[
            pl.BlockSpec((rows_blk, m), lambda i: (i, 0)),        # x rows stream
            pl.BlockSpec((2, m, out_size), lambda i: (0, 0, 0)),  # resident weights
            pl.BlockSpec((m, m), lambda i: (0, 0)),               # resident weights
        ],
        out_specs=(
            pl.BlockSpec((rows_blk, m), lambda i: (i, 0)),
            pl.BlockSpec((rows_blk, n), lambda i: (i, 0)),
        ),
        compiler_params=pltpu.CompilerParams(
            dimension_semantics=("parallel",),   # v7x megacore; no-op on v5e/v6e
        ),
    )(x2, wkq, wvo)

    y = y2.reshape(b_pad, n, m)[:B]
    att = att2.reshape(b_pad, n, n)[:B]
    if squeeze:
        return y[0], att[0]
    return y, att


def reference(x, wk, wq, wv, wo):
    """Pure-JAX mirror of the PyTorch forward (single 2-D x), pinned to HIGHEST
    matmul precision so the f32-MXU kernel comparison does not flake at 1e-5."""
    hp = lax.Precision.HIGHEST
    K = jnp.dot(x, wk.T, precision=hp)
    Q = 0.06 * jnp.dot(x, wq.T, precision=hp)
    V = jnp.dot(x, wv.T, precision=hp)
    logits = jnp.dot(Q, K.T, precision=hp)
    att = jax.nn.softmax(logits, axis=-1)
    y = jnp.dot(V.T, att, precision=hp).T        # module quirk: y = (V^T att)^T
    y = jnp.dot(y, wo.T, precision=hp)
    return y, att


if __name__ == "__main__":
    # Small shapes consistent with the module: seq n=8, input_size=output_size=32.
    # B=64 independent SelfAttention instances, blocked 32 per grid step
    # (256 MXU rows/step; 2 parallel grid steps so v7x can use both TensorCores).
    B, n, input_size, output_size = 64, 8, 32, 32

    key = jax.random.PRNGKey(0)
    kx, kk, kq, kv, ko = jax.random.split(key, 5)

    x = jax.random.normal(kx, (B, n, input_size), dtype=jnp.float32)
    # PyTorch Linear weight shapes: (out_features, in_features)
    wk = 0.05 * jax.random.normal(kk, (output_size, input_size), dtype=jnp.float32)
    wq = 0.05 * jax.random.normal(kq, (output_size, input_size), dtype=jnp.float32)
    wv = 0.05 * jax.random.normal(kv, (output_size, input_size), dtype=jnp.float32)
    wo = 0.05 * jax.random.normal(ko, (input_size, output_size), dtype=jnp.float32)

    ref_batched = jax.vmap(lambda xi: reference(xi, wk, wq, wv, wo))

    # 1) Batched run: B=64 -> 2 grid steps of 32 instances each.
    y, att = self_attention(x, wk, wq, wv, wo, block_b=32)
    jax.block_until_ready((y, att))
    y_r, att_r = ref_batched(x)
    assert jnp.allclose(y, y_r, atol=1e-4, rtol=1e-4), "batched y mismatch"
    assert jnp.allclose(att, att_r, atol=1e-5, rtol=1e-5), "batched att mismatch"

    # 2) Ragged batch (B=50, not a multiple of 32) exercises the padding path.
    y50, att50 = self_attention(x[:50], wk, wq, wv, wo, block_b=32)
    jax.block_until_ready((y50, att50))
    y50_r, att50_r = ref_batched(x[:50])
    assert jnp.allclose(y50, y50_r, atol=1e-4, rtol=1e-4), "padded y mismatch"
    assert jnp.allclose(att50, att50_r, atol=1e-5, rtol=1e-5), "padded att mismatch"

    # 3) Single-instance (2-D x) path, matching the PyTorch module's signature.
    y1, att1 = self_attention(x[0], wk, wq, wv, wo)
    jax.block_until_ready((y1, att1))
    y1_r, att1_r = reference(x[0], wk, wq, wv, wo)
    assert jnp.allclose(y1, y1_r, atol=1e-4, rtol=1e-4), "single y mismatch"
    assert jnp.allclose(att1, att1_r, atol=1e-5, rtol=1e-5), "single att mismatch"

    print("KERNEL_OK")
</pallas_src>

<mosaic_0001>
module attributes {stable_mosaic.version = 11 : i64} {
  func.func @self_attention_kernel(%arg0: i32, %arg1: memref<256x32xf32, #tpu.memory_space<vmem>>, %arg2: memref<2x32x32xf32, #tpu.memory_space<vmem>>, %arg3: memref<32x32xf32, #tpu.memory_space<vmem>>, %arg4: memref<256x32xf32, #tpu.memory_space<vmem>>, %arg5: memref<256x8xf32, #tpu.memory_space<vmem>>) attributes {dimension_semantics = [#tpu.dimension_semantics<parallel>], iteration_bounds = array<i64: 2>, scalar_prefetch = 0 : i64, scratch_operands = 0 : i64, tpu.core_type = #tpu.core_type<tc>, window_params = [{transform_indices = @transform_0, window_bounds = array<i64: 256, 32>}, {pipeline_mode = #tpu.pipeline_mode<synchronous>, transform_indices = @transform_1, window_bounds = array<i64: 2, 32, 32>}, {pipeline_mode = #tpu.pipeline_mode<synchronous>, transform_indices = @transform_2, window_bounds = array<i64: 32, 32>}, {transform_indices = @transform_3, window_bounds = array<i64: 256, 32>}, {transform_indices = @transform_4, window_bounds = array<i64: 256, 8>}]} {
    %c0 = arith.constant 0 : index
    %c0_0 = arith.constant 0 : index
    %0 = vector.load %arg1[%c0, %c0_0] : memref<256x32xf32, #tpu.memory_space<vmem>>, vector<256x32xf32>
    %c0_1 = arith.constant 0 : index
    %c0_2 = arith.constant 0 : index
    %c0_3 = arith.constant 0 : index
    %1 = vector.load %arg2[%c0_1, %c0_2, %c0_3] : memref<2x32x32xf32, #tpu.memory_space<vmem>>, vector<1x32x32xf32>
    %2 = vector.shape_cast %1 : vector<1x32x32xf32> to vector<32x32xf32>
    %cst = arith.constant dense<0.000000e+00> : vector<256x32xf32>
    %3 = tpu.matmul %0, %2, %cst {dimension_numbers = #tpu.dot_dimension_numbers<[1], [0], [0], [1], [0, 0, 1, 1], [], []>} : vector<256x32xf32>, vector<32x32xf32>, vector<256x32xf32> -> vector<256x32xf32>
    %c1 = arith.constant 1 : index
    %c0_4 = arith.constant 0 : index
    %c0_5 = arith.constant 0 : index
    %4 = vector.load %arg2[%c1, %c0_4, %c0_5] : memref<2x32x32xf32, #tpu.memory_space<vmem>>, vector<1x32x32xf32>
    %5 = vector.shape_cast %4 : vector<1x32x32xf32> to vector<32x32xf32>
    %cst_6 = arith.constant dense<0.000000e+00> : vector<256x32xf32>
    %6 = tpu.matmul %0, %5, %cst_6 {dimension_numbers = #tpu.dot_dimension_numbers<[1], [0], [0], [1], [0, 0, 1, 1], [], []>} : vector<256x32xf32>, vector<32x32xf32>, vector<256x32xf32> -> vector<256x32xf32>
    %c0_7 = arith.constant 0 : index
    %c0_8 = arith.constant 0 : index
    %7 = vector.load %arg3[%c0_7, %c0_8] : memref<32x32xf32, #tpu.memory_space<vmem>>, vector<32x32xf32>
    %cst_9 = arith.constant dense<0.000000e+00> : vector<256x32xf32>
    %8 = tpu.matmul %0, %7, %cst_9 {dimension_numbers = #tpu.dot_dimension_numbers<[1], [0], [0], [1], [0, 0, 1, 1], [], []>} : vector<256x32xf32>, vector<32x32xf32>, vector<256x32xf32> -> vector<256x32xf32>
    %9 = vector.extract_strided_slice %3 {offsets = [0, 0], sizes = [8, 32], strides = [1, 1]} : vector<256x32xf32> to vector<8x32xf32>
    %10 = vector.extract_strided_slice %6 {offsets = [0, 0], sizes = [8, 32], strides = [1, 1]} : vector<256x32xf32> to vector<8x32xf32>
    %11 = vector.extract_strided_slice %8 {offsets = [0, 0], sizes = [8, 32], strides = [1, 1]} : vector<256x32xf32> to vector<8x32xf32>
    %cst_10 = arith.constant dense<0.000000e+00> : vector<8x8xf32>
    %12 = tpu.matmul %10, %9, %cst_10 {dimension_numbers = #tpu.dot_dimension_numbers<[1], [1], [0], [0], [0, 0, 1, 0], [], []>} : vector<8x32xf32>, vector<8x32xf32>, vector<8x8xf32> -> vector<8x8xf32>
    %cst_11 = arith.constant dense<0xFF800000> : vector<8xf32>
    %13 = vector.multi_reduction <maximumf>, %12, %cst_11 [1] : vector<8x8xf32> to vector<8xf32>
    %14 = vector.shape_cast %13 : vector<8xf32> to vector<8x1xf32>
    %15 = vector.broadcast %14 : vector<8x1xf32> to vector<8x8xf32>
    %16 = arith.subf %12, %15 : vector<8x8xf32>
    %17 = math.exp %16 : vector<8x8xf32>
    %cst_12 = arith.constant dense<0.000000e+00> : vector<8xf32>
    %18 = vector.multi_reduction <add>, %17, %cst_12 [1] : vector<8x8xf32> to vector<8xf32>
    %19 = vector.shape_cast %18 : vector<8xf32> to vector<8x1xf32>
    %20 = tpu.reciprocal %19 : vector<8x1xf32> -> vector<8x1xf32>
    %21 = vector.broadcast %20 : vector<8x1xf32> to vector<8x8xf32>
    %22 = arith.mulf %17, %21 : vector<8x8xf32>
    %c0_13 = arith.constant 0 : index
    %c0_14 = arith.constant 0 : index
    %23 = vector.load %arg5[%c0_13, %c0_14] : memref<256x8xf32, #tpu.memory_space<vmem>>, vector<8x8xf32>
    tpu.vector_store %arg5[%c0_13, %c0_14], %22 {strides = array<i32>} : memref<256x8xf32, #tpu.memory_space<vmem>>, vector<8x8xf32>,
    %cst_15 = arith.constant dense<0.000000e+00> : vector<8x32xf32>
    %24 = tpu.matmul %22, %11, %cst_15 {dimension_numbers = #tpu.dot_dimension_numbers<[0], [0], [1], [1], [0, 1, 1, 1], [], []>} : vector<8x8xf32>, vector<8x32xf32>, vector<8x32xf32> -> vector<8x32xf32>
    %c0_16 = arith.constant 0 : index
    %c0_17 = arith.constant 0 : index
    %25 = vector.load %arg4[%c0_16, %c0_17] : memref<256x32xf32, #tpu.memory_space<vmem>>, vector<8x32xf32>
    tpu.vector_store %arg4[%c0_16, %c0_17], %24 {strides = array<i32>} : memref<256x32xf32, #tpu.memory_space<vmem>>, vector<8x32xf32>,
    %26 = vector.extract_strided_slice %3 {offsets = [8, 0], sizes = [8, 32], strides = [1, 1]} : vector<256x32xf32> to vector<8x32xf32>
    %27 = vector.extract_strided_slice %6 {offsets = [8, 0], sizes = [8, 32], strides = [1, 1]} : vector<256x32xf32> to vector<8x32xf32>
    %28 = vector.extract_strided_slice %8 {offsets = [8, 0], sizes = [8, 32], strides = [1, 1]} : vector<256x32xf32> to vector<8x32xf32>
    %cst_18 = arith.constant dense<0.000000e+00> : vector<8x8xf32>
    %29 = tpu.matmul %27, %26, %cst_18 {dimension_numbers = #tpu.dot_dimension_numbers<[1], [1], [0], [0], [0, 0, 1, 0], [], []>} : vector<8x32xf32>, vector<8x32xf32>, vector<8x8xf32> -> vector<8x8xf32>
    %cst_19 = arith.constant dense<0xFF800000> : vector<8xf32>
    %30 = vector.multi_reduction <maximumf>, %29, %cst_19 [1] : vector<8x8xf32> to vector<8xf32>
    %31 = vector.shape_cast %30 : vector<8xf32> to vector<8x1xf32>
    %32 = vector.broadcast %31 : vector<8x1xf32> to vector<8x8xf32>
    %33 = arith.subf %29, %32 : vector<8x8xf32>
    %34 = math.exp %33 : vector<8x8xf32>
    %cst_20 = arith.constant dense<0.000000e+00> : vector<8xf32>
    %35 = vector.multi_reduction <add>, %34, %cst_20 [1] : vector<8x8xf32> to vector<8xf32>
    %36 = vector.shape_cast %35 : vector<8xf32> to vector<8x1xf32>
    %37 = tpu.reciprocal %36 : vector<8x1xf32> -> vector<8x1xf32>
    %38 = vector.broadcast %37 : vector<8x1xf32> to vector<8x8xf32>
    %39 = arith.mulf %34, %38 : vector<8x8xf32>
    %c8 = arith.constant 8 : index
    %c0_21 = arith.constant 0 : index
    %40 = vector.load %arg5[%c8, %c0_21] : memref<256x8xf32, #tpu.memory_space<vmem>>, vector<8x8xf32>
    tpu.vector_store %arg5[%c8, %c0_21], %39 {strides = array<i32>} : memref<256x8xf32, #tpu.memory_space<vmem>>, vector<8x8xf32>,
    %cst_22 = arith.constant dense<0.000000e+00> : vector<8x32xf32>
    %41 = tpu.matmul %39, %28, %cst_22 {dimension_numbers = #tpu.dot_dimension_numbers<[0], [0], [1], [1], [0, 1, 1, 1], [], []>} : vector<8x8xf32>, vector<8x32xf32>, vector<8x32xf32> -> vector<8x32xf32>
    %c8_23 = arith.constant 8 : index
    %c0_24 = arith.constant 0 : index
    %42 = vector.load %arg4[%c8_23, %c0_24] : memref<256x32xf32, #tpu.memory_space<vmem>>, vector<8x32xf32>
    tpu.vector_store %arg4[%c8_23, %c0_24], %41 {strides = array<i32>} : memref<256x32xf32, #tpu.memory_space<vmem>>, vector<8x32xf32>,
    %43 = vector.extract_strided_slice %3 {offsets = [16, 0], sizes = [8, 32], strides = [1, 1]} : vector<256x32xf32> to vector<8x32xf32>
    %44 = vector.extract_strided_slice %6 {offsets = [16, 0], sizes = [8, 32], strides = [1, 1]} : vector<256x32xf32> to vector<8x32xf32>
    %45 = vector.extract_strided_slice %8 {offsets = [16, 0], sizes = [8, 32], strides = [1, 1]} : vector<256x32xf32> to vector<8x32xf32>
    %cst_25 = arith.constant dense<0.000000e+00> : vector<8x8xf32>
    %46 = tpu.matmul %44, %43, %cst_25 {dimension_numbers = #tpu.dot_dimension_numbers<[1], [1], [0], [0], [0, 0, 1, 0], [], []>} : vector<8x32xf32>, vector<8x32xf32>, vector<8x8xf32> -> vector<8x8xf32>
    %cst_26 = arith.constant dense<0xFF800000> : vector<8xf32>
    %47 = vector.multi_reduction <maximumf>, %46, %cst_26 [1] : vector<8x8xf32> to vector<8xf32>
    %48 = vector.shape_cast %47 : vector<8xf32> to vector<8x1xf32>
    %49 = vector.broadcast %48 : vector<8x1xf32> to vector<8x8xf32>
    %50 = arith.subf %46, %49 : vector<8x8xf32>
    %51 = math.exp %50 : vector<8x8xf32>
    %cst_27 = arith.constant dense<0.000000e+00> : vector<8xf32>
    %52 = vector.multi_reduction <add>, %51, %cst_27 [1] : vector<8x8xf32> to vector<8xf32>
    %53 = vector.shape_cast %52 : vector<8xf32> to vector<8x1xf32>
    %54 = tpu.reciprocal %53 : vector<8x1xf32> -> vector<8x1xf32>
    %55 = vector.broadcast %54 : vector<8x1xf32> to vector<8x8xf32>
    %56 = arith.mulf %51, %55 : vector<8x8xf32>
    %c16 = arith.constant 16 : index
    %c0_28 = arith.constant 0 : index
    %57 = vector.load %arg5[%c16, %c0_28] : memref<256x8xf32, #tpu.memory_space<vmem>>, vector<8x8xf32>
    tpu.vector_store %arg5[%c16, %c0_28], %56 {strides = array<i32>} : memref<256x8xf32, #tpu.memory_space<vmem>>, vector<8x8xf32>,
    %cst_29 = arith.constant dense<0.000000e+00> : vector<8x32xf32>
    %58 = tpu.matmul %56, %45, %cst_29 {dimension_numbers = #tpu.dot_dimension_numbers<[0], [0], [1], [1], [0, 1, 1, 1], [], []>} : vector<8x8xf32>, vector<8x32xf32>, vector<8x32xf32> -> vector<8x32xf32>
    %c16_30 = arith.constant 16 : index
    %c0_31 = arith.constant 0 : index
    %59 = vector.load %arg4[%c16_30, %c0_31] : memref<256x32xf32, #tpu.memory_space<vmem>>, vector<8x32xf32>
    tpu.vector_store %arg4[%c16_30, %c0_31], %58 {strides = array<i32>} : memref<256x32xf32, #tpu.memory_space<vmem>>, vector<8x32xf32>,
    %60 = vector.extract_strided_slice %3 {offsets = [24, 0], sizes = [8, 32], strides = [1, 1]} : vector<256x32xf32> to vector<8x32xf32>
    %61 = vector.extract_strided_slice %6 {offsets = [24, 0], sizes = [8, 32], strides = [1, 1]} : vector<256x32xf32> to vector<8x32xf32>
    %62 = vector.extract_strided_slice %8 {offsets = [24, 0], sizes = [8, 32], strides = [1, 1]} : vector<256x32xf32> to vector<8x32xf32>
    %cst_32 = arith.constant dense<0.000000e+00> : vector<8x8xf32>
    %63 = tpu.matmul %61, %60, %cst_32 {dimension_numbers = #tpu.dot_dimension_numbers<[1], [1], [0], [0], [0, 0, 1, 0], [], []>} : vector<8x32xf32>, vector<8x32xf32>, vector<8x8xf32> -> vector<8x8xf32>
    %cst_33 = arith.constant dense<0xFF800000> : vector<8xf32>
    %64 = vector.multi_reduction <maximumf>, %63, %cst_33 [1] : vector<8x8xf32> to vector<8xf32>
    %65 = vector.shape_cast %64 : vector<8xf32> to vector<8x1xf32>
    %66 = vector.broadcast %65 : vector<8x1xf32> to vector<8x8xf32>
    %67 = arith.subf %63, %66 : vector<8x8xf32>
    %68 = math.exp %67 : vector<8x8xf32>
    %cst_34 = arith.constant dense<0.000000e+00> : vector<8xf32>
    %69 = vector.multi_reduction <add>, %68, %cst_34 [1] : vector<8x8xf32> to vector<8xf32>
    %70 = vector.shape_cast %69 : vector<8xf32> to vector<8x1xf32>
    %71 = tpu.reciprocal %70 : vector<8x1xf32> -> vector<8x1xf32>
    %72 = vector.broadcast %71 : vector<8x1xf32> to vector<8x8xf32>
    %73 = arith.mulf %68, %72 : vector<8x8xf32>
    %c24 = arith.constant 24 : index
    %c0_35 = arith.constant 0 : index
    %74 = vector.load %arg5[%c24, %c0_35] : memref<256x8xf32, #tpu.memory_space<vmem>>, vector<8x8xf32>
    tpu.vector_store %arg5[%c24, %c0_35], %73 {strides = array<i32>} : memref<256x8xf32, #tpu.memory_space<vmem>>, vector<8x8xf32>,
    %cst_36 = arith.constant dense<0.000000e+00> : vector<8x32xf32>
    %75 = tpu.matmul %73, %62, %cst_36 {dimension_numbers = #tpu.dot_dimension_numbers<[0], [0], [1], [1], [0, 1, 1, 1], [], []>} : vector<8x8xf32>, vector<8x32xf32>, vector<8x32xf32> -> vector<8x32xf32>
    %c24_37 = arith.constant 24 : index
    %c0_38 = arith.constant 0 : index
    %76 = vector.load %arg4[%c24_37, %c0_38] : memref<256x32xf32, #tpu.memory_space<vmem>>, vector<8x32xf32>
    tpu.vector_store %arg4[%c24_37, %c0_38], %75 {strides = array<i32>} : memref<256x32xf32, #tpu.memory_space<vmem>>, vector<8x32xf32>,
    %77 = vector.extract_strided_slice %3 {offsets = [32, 0], sizes = [8, 32], strides = [1, 1]} : vector<256x32xf32> to vector<8x32xf32>
    %78 = vector.extract_strided_slice %6 {offsets = [32, 0], sizes = [8, 32], strides = [1, 1]} : vector<256x32xf32> to vector<8x32xf32>
    %79 = vector.extract_strided_slice %8 {offsets = [32, 0], sizes = [8, 32], strides = [1, 1]} : vector<256x32xf32> to vector<8x32xf32>
    %cst_39 = arith.constant dense<0.000000e+00> : vector<8x8xf32>
    %80 = tpu.matmul %78, %77, %cst_39 {dimension_numbers = #tpu.dot_dimension_numbers<[1], [1], [0], [0], [0, 0, 1, 0], [], []>} : vector<8x32xf32>, vector<8x32xf32>, vector<8x8xf32> -> vector<8x8xf32>
    %cst_40 = arith.constant dense<0xFF800000> : vector<8xf32>
    %81 = vector.multi_reduction <maximumf>, %80, %cst_40 [1] : vector<8x8xf32> to vector<8xf32>
    %82 = vector.shape_cast %81 : vector<8xf32> to vector<8x1xf32>
    %83 = vector.broadcast %82 : vector<8x1xf32> to vector<8x8xf32>
    %84 = arith.subf %80, %83 : vector<8x8xf32>
    %85 = math.exp %84 : vector<8x8xf32>
    %cst_41 = arith.constant dense<0.000000e+00> : vector<8xf32>
    %86 = vector.multi_reduction <add>, %85, %cst_41 [1] : vector<8x8xf32> to vector<8xf32>
    %87 = vector.shape_cast %86 : vector<8xf32> to vector<8x1xf32>
    %88 = tpu.reciprocal %87 : vector<8x1xf32> -> vector<8x1xf32>
    %89 = vector.broadcast %88 : vector<8x1xf32> to vector<8x8xf32>
    %90 = arith.mulf %85, %89 : vector<8x8xf32>
    %c32 = arith.constant 32 : index
    %c0_42 = arith.constant 0 : index
    %91 = vector.load %arg5[%c32, %c0_42] : memref<256x8xf32, #tpu.memory_space<vmem>>, vector<8x8xf32>
    tpu.vector_store %arg5[%c32, %c0_42], %90 {strides = array<i32>} : memref<256x8xf32, #tpu.memory_space<vmem>>, vector<8x8xf32>,
    %cst_43 = arith.constant dense<0.000000e+00> : vector<8x32xf32>
    %92 = tpu.matmul %90, %79, %cst_43 {dimension_numbers = #tpu.dot_dimension_numbers<[0], [0], [1], [1], [0, 1, 1, 1], [], []>} : vector<8x8xf32>, vector<8x32xf32>, vector<8x32xf32> -> vector<8x32xf32>
    %c32_44 = arith.constant 32 : index
    %c0_45 = arith.constant 0 : index
    %93 = vector.load %arg4[%c32_44, %c0_45] : memref<256x32xf32, #tpu.memory_space<vmem>>, vector<8x32xf32>
    tpu.vector_store %arg4[%c32_44, %c0_45], %92 {strides = array<i32>} : memref<256x32xf32, #tpu.memory_space<vmem>>, vector<8x32xf32>,
    %94 = vector.extract_strided_slice %3 {offsets = [40, 0], sizes = [8, 32], strides = [1, 1]} : vector<256x32xf32> to vector<8x32xf32>
    %95 = vector.extract_strided_slice %6 {offsets = [40, 0], sizes = [8, 32], strides = [1, 1]} : vector<256x32xf32> to vector<8x32xf32>
    %96 = vector.extract_strided_slice %8 {offsets = [40, 0], sizes = [8, 32], strides = [1, 1]} : vector<256x32xf32> to vector<8x32xf32>
    %cst_46 = arith.constant dense<0.000000e+00> : vector<8x8xf32>
    %97 = tpu.matmul %95, %94, %cst_46 {dimension_numbers = #tpu.dot_dimension_numbers<[1], [1], [0], [0], [0, 0, 1, 0], [], []>} : vector<8x32xf32>, vector<8x32xf32>, vector<8x8xf32> -> vector<8x8xf32>
    %cst_47 = arith.constant dense<0xFF800000> : vector<8xf32>
    %98 = vector.multi_reduction <maximumf>, %97, %cst_47 [1] : vector<8x8xf32> to vector<8xf32>
    %99 = vector.shape_cast %98 : vector<8xf32> to vector<8x1xf32>
    %100 = vector.broadcast %99 : vector<8x1xf32> to vector<8x8xf32>
    %101 = arith.subf %97, %100 : vector<8x8xf32>
    %102 = math.exp %101 : vector<8x8xf32>
    %cst_48 = arith.constant dense<0.000000e+00> : vector<8xf32>
    %103 = vector.multi_reduction <add>, %102, %cst_48 [1] : vector<8x8xf32> to vector<8xf32>
    %104 = vector.shape_cast %103 : vector<8xf32> to vector<8x1xf32>
    %105 = tpu.reciprocal %104 : vector<8x1xf32> -> vector<8x1xf32>
    %106 = vector.broadcast %105 : vector<8x1xf32> to vector<8x8xf32>
    %107 = arith.mulf %102, %106 : vector<8x8xf32>
    %c40 = arith.constant 40 : index
    %c0_49 = arith.constant 0 : index
    %108 = vector.load %arg5[%c40, %c0_49] : memref<256x8xf32, #tpu.memory_space<vmem>>, vector<8x8xf32>
    tpu.vector_store %arg5[%c40, %c0_49], %107 {strides = array<i32>} : memref<256x8xf32, #tpu.memory_space<vmem>>, vector<8x8xf32>,
    %cst_50 = arith.constant dense<0.000000e+00> : vector<8x32xf32>
    %109 = tpu.matmul %107, %96, %cst_50 {dimension_numbers = #tpu.dot_dimension_numbers<[0], [0], [1], [1], [0, 1, 1, 1], [], []>} : vector<8x8xf32>, vector<8x32xf32>, vector<8x32xf32> -> vector<8x32xf32>
    %c40_51 = arith.constant 40 : index
    %c0_52 = arith.constant 0 : index
    %110 = vector.load %arg4[%c40_51, %c0_52] : memref<256x32xf32, #tpu.memory_space<vmem>>, vector<8x32xf32>
    tpu.vector_store %arg4[%c40_51, %c0_52], %109 {strides = array<i32>} : memref<256x32xf32, #tpu.memory_space<vmem>>, vector<8x32xf32>,
    %111 = vector.extract_strided_slice %3 {offsets = [48, 0], sizes = [8, 32], strides = [1, 1]} : vector<256x32xf32> to vector<8x32xf32>
    %112 = vector.extract_strided_slice %6 {offsets = [48, 0], sizes = [8, 32], strides = [1, 1]} : vector<256x32xf32> to vector<8x32xf32>
    %113 = vector.extract_strided_slice %8 {offsets = [48, 0], sizes = [8, 32], strides = [1, 1]} : vector<256x32xf32> to vector<8x32xf32>
    %cst_53 = arith.constant dense<0.000000e+00> : vector<8x8xf32>
    %114 = tpu.matmul %112, %111, %cst_53 {dimension_numbers = #tpu.dot_dimension_numbers<[1], [1], [0], [0], [0, 0, 1, 0], [], []>} : vector<8x32xf32>, vector<8x32xf32>, vector<8x8xf32> -> vector<8x8xf32>
    %cst_54 = arith.constant dense<0xFF800000> : vector<8xf32>
    %115 = vector.multi_reduction <maximumf>, %114, %cst_54 [1] : vector<8x8xf32> to vector<8xf32>
    %116 = vector.shape_cast %115 : vector<8xf32> to vector<8x1xf32>
    %117 = vector.broadcast %116 : vector<8x1xf32> to vector<8x8xf32>
    %118 = arith.subf %114, %117 : vector<8x8xf32>
    %119 = math.exp %118 : vector<8x8xf32>
    %cst_55 = arith.constant dense<0.000000e+00> : vector<8xf32>
    %120 = vector.multi_reduction <add>, %119, %cst_55 [1] : vector<8x8xf32> to vector<8xf32>
    %121 = vector.shape_cast %120 : vector<8xf32> to vector<8x1xf32>
    %122 = tpu.reciprocal %121 : vector<8x1xf32> -> vector<8x1xf32>
    %123 = vector.broadcast %122 : vector<8x1xf32> to vector<8x8xf32>
    %124 = arith.mulf %119, %123 : vector<8x8xf32>
    %c48 = arith.constant 48 : index
    %c0_56 = arith.constant 0 : index
    %125 = vector.load %arg5[%c48, %c0_56] : memref<256x8xf32, #tpu.memory_space<vmem>>, vector<8x8xf32>
    tpu.vector_store %arg5[%c48, %c0_56], %124 {strides = array<i32>} : memref<256x8xf32, #tpu.memory_space<vmem>>, vector<8x8xf32>,
    %cst_57 = arith.constant dense<0.000000e+00> : vector<8x32xf32>
    %126 = tpu.matmul %124, %113, %cst_57 {dimension_numbers = #tpu.dot_dimension_numbers<[0], [0], [1], [1], [0, 1, 1, 1], [], []>} : vector<8x8xf32>, vector<8x32xf32>, vector<8x32xf32> -> vector<8x32xf32>
    %c48_58 = arith.constant 48 : index
    %c0_59 = arith.constant 0 : index
    %127 = vector.load %arg4[%c48_58, %c0_59] : memref<256x32xf32, #tpu.memory_space<vmem>>, vector<8x32xf32>
    tpu.vector_store %arg4[%c48_58, %c0_59], %126 {strides = array<i32>} : memref<256x32xf32, #tpu.memory_space<vmem>>, vector<8x32xf32>,
    %128 = vector.extract_strided_slice %3 {offsets = [56, 0], sizes = [8, 32], strides = [1, 1]} : vector<256x32xf32> to vector<8x32xf32>
    %129 = vector.extract_strided_slice %6 {offsets = [56, 0], sizes = [8, 32], strides = [1, 1]} : vector<256x32xf32> to vector<8x32xf32>
    %130 = vector.extract_strided_slice %8 {offsets = [56, 0], sizes = [8, 32], strides = [1, 1]} : vector<256x32xf32> to vector<8x32xf32>
    %cst_60 = arith.constant dense<0.000000e+00> : vector<8x8xf32>
    %131 = tpu.matmul %129, %128, %cst_60 {dimension_numbers = #tpu.dot_dimension_numbers<[1], [1], [0], [0], [0, 0, 1, 0], [], []>} : vector<8x32xf32>, vector<8x32xf32>, vector<8x8xf32> -> vector<8x8xf32>
    %cst_61 = arith.constant dense<0xFF800000> : vector<8xf32>
    %132 = vector.multi_reduction <maximumf>, %131, %cst_61 [1] : vector<8x8xf32> to vector<8xf32>
    %133 = vector.shape_cast %132 : vector<8xf32> to vector<8x1xf32>
    %134 = vector.broadcast %133 : vector<8x1xf32> to vector<8x8xf32>
    %135 = arith.subf %131, %134 : vector<8x8xf32>
    %136 = math.exp %135 : vector<8x8xf32>
    %cst_62 = arith.constant dense<0.000000e+00> : vector<8xf32>
    %137 = vector.multi_reduction <add>, %136, %cst_62 [1] : vector<8x8xf32> to vector<8xf32>
    %138 = vector.shape_cast %137 : vector<8xf32> to vector<8x1xf32>
    %139 = tpu.reciprocal %138 : vector<8x1xf32> -> vector<8x1xf32>
    %140 = vector.broadcast %139 : vector<8x1xf32> to vector<8x8xf32>
    %141 = arith.mulf %136, %140 : vector<8x8xf32>
    %c56 = arith.constant 56 : index
    %c0_63 = arith.constant 0 : index
    %142 = vector.load %arg5[%c56, %c0_63] : memref<256x8xf32, #tpu.memory_space<vmem>>, vector<8x8xf32>
    tpu.vector_store %arg5[%c56, %c0_63], %141 {strides = array<i32>} : memref<256x8xf32, #tpu.memory_space<vmem>>, vector<8x8xf32>,
    %cst_64 = arith.constant dense<0.000000e+00> : vector<8x32xf32>
    %143 = tpu.matmul %141, %130, %cst_64 {dimension_numbers = #tpu.dot_dimension_numbers<[0], [0], [1], [1], [0, 1, 1, 1], [], []>} : vector<8x8xf32>, vector<8x32xf32>, vector<8x32xf32> -> vector<8x32xf32>
    %c56_65 = arith.constant 56 : index
    %c0_66 = arith.constant 0 : index
    %144 = vector.load %arg4[%c56_65, %c0_66] : memref<256x32xf32, #tpu.memory_space<vmem>>, vector<8x32xf32>
    tpu.vector_store %arg4[%c56_65, %c0_66], %143 {strides = array<i32>} : memref<256x32xf32, #tpu.memory_space<vmem>>, vector<8x32xf32>,
    %145 = vector.extract_strided_slice %3 {offsets = [64, 0], sizes = [8, 32], strides = [1, 1]} : vector<256x32xf32> to vector<8x32xf32>
    %146 = vector.extract_strided_slice %6 {offsets = [64, 0], sizes = [8, 32], strides = [1, 1]} : vector<256x32xf32> to vector<8x32xf32>
    %147 = vector.extract_strided_slice %8 {offsets = [64, 0], sizes = [8, 32], strides = [1, 1]} : vector<256x32xf32> to vector<8x32xf32>
    %cst_67 = arith.constant dense<0.000000e+00> : vector<8x8xf32>
    %148 = tpu.matmul %146, %145, %cst_67 {dimension_numbers = #tpu.dot_dimension_numbers<[1], [1], [0], [0], [0, 0, 1, 0], [], []>} : vector<8x32xf32>, vector<8x32xf32>, vector<8x8xf32> -> vector<8x8xf32>
    %cst_68 = arith.constant dense<0xFF800000> : vector<8xf32>
    %149 = vector.multi_reduction <maximumf>, %148, %cst_68 [1] : vector<8x8xf32> to vector<8xf32>
    %150 = vector.shape_cast %149 : vector<8xf32> to vector<8x1xf32>
    %151 = vector.broadcast %150 : vector<8x1xf32> to vector<8x8xf32>
    %152 = arith.subf %148, %151 : vector<8x8xf32>
    %153 = math.exp %152 : vector<8x8xf32>
    %cst_69 = arith.constant dense<0.000000e+00> : vector<8xf32>
    %154 = vector.multi_reduction <add>, %153, %cst_69 [1] : vector<8x8xf32> to vector<8xf32>
    %155 = vector.shape_cast %154 : vector<8xf32> to vector<8x1xf32>
    %156 = tpu.reciprocal %155 : vector<8x1xf32> -> vector<8x1xf32>
    %157 = vector.broadcast %156 : vector<8x1xf32> to vector<8x8xf32>
    %158 = arith.mulf %153, %157 : vector<8x8xf32>
    %c64 = arith.constant 64 : index
    %c0_70 = arith.constant 0 : index
    %159 = vector.load %arg5[%c64, %c0_70] : memref<256x8xf32, #tpu.memory_space<vmem>>, vector<8x8xf32>
    tpu.vector_store %arg5[%c64, %c0_70], %158 {strides = array<i32>} : memref<256x8xf32, #tpu.memory_space<vmem>>, vector<8x8xf32>,
    %cst_71 = arith.constant dense<0.000000e+00> : vector<8x32xf32>
    %160 = tpu.matmul %158, %147, %cst_71 {dimension_numbers = #tpu.dot_dimension_numbers<[0], [0], [1], [1], [0, 1, 1, 1], [], []>} : vector<8x8xf32>, vector<8x32xf32>, vector<8x32xf32> -> vector<8x32xf32>
    %c64_72 = arith.constant 64 : index
    %c0_73 = arith.constant 0 : index
    %161 = vector.load %arg4[%c64_72, %c0_73] : memref<256x32xf32, #tpu.memory_space<vmem>>, vector<8x32xf32>
    tpu.vector_store %arg4[%c64_72, %c0_73], %160 {strides = array<i32>} : memref<256x32xf32, #tpu.memory_space<vmem>>, vector<8x32xf32>,
    %162 = vector.extract_strided_slice %3 {offsets = [72, 0], sizes = [8, 32], strides = [1, 1]} : vector<256x32xf32> to vector<8x32xf32>
    %163 = vector.extract_strided_slice %6 {offsets = [72, 0], sizes = [8, 32], strides = [1, 1]} : vector<256x32xf32> to vector<8x32xf32>
    %164 = vector.extract_strided_slice %8 {offsets = [72, 0], sizes = [8, 32], strides = [1, 1]} : vector<256x32xf32> to vector<8x32xf32>
    %cst_74 = arith.constant dense<0.000000e+00> : vector<8x8xf32>
    %165 = tpu.matmul %163, %162, %cst_74 {dimension_numbers = #tpu.dot_dimension_numbers<[1], [1], [0], [0], [0, 0, 1, 0], [], []>} : vector<8x32xf32>, vector<8x32xf32>, vector<8x8xf32> -> vector<8x8xf32>
    %cst_75 = arith.constant dense<0xFF800000> : vector<8xf32>
    %166 = vector.multi_reduction <maximumf>, %165, %cst_75 [1] : vector<8x8xf32> to vector<8xf32>
    %167 = vector.shape_cast %166 : vector<8xf32> to vector<8x1xf32>
    %168 = vector.broadcast %167 : vector<8x1xf32> to vector<8x8xf32>
    %169 = arith.subf %165, %168 : vector<8x8xf32>
    %170 = math.exp %169 : vector<8x8xf32>
    %cst_76 = arith.constant dense<0.000000e+00> : vector<8xf32>
    %171 = vector.multi_reduction <add>, %170, %cst_76 [1] : vector<8x8xf32> to vector<8xf32>
    %172 = vector.shape_cast %171 : vector<8xf32> to vector<8x1xf32>
    %173 = tpu.reciprocal %172 : vector<8x1xf32> -> vector<8x1xf32>
    %174 = vector.broadcast %173 : vector<8x1xf32> to vector<8x8xf32>
    %175 = arith.mulf %170, %174 : vector<8x8xf32>
    %c72 = arith.constant 72 : index
    %c0_77 = arith.constant 0 : index
    %176 = vector.load %arg5[%c72, %c0_77] : memref<256x8xf32, #tpu.memory_space<vmem>>, vector<8x8xf32>
    tpu.vector_store %arg5[%c72, %c0_77], %175 {strides = array<i32>} : memref<256x8xf32, #tpu.memory_space<vmem>>, vector<8x8xf32>,
    %cst_78 = arith.constant dense<0.000000e+00> : vector<8x32xf32>
    %177 = tpu.matmul %175, %164, %cst_78 {dimension_numbers = #tpu.dot_dimension_numbers<[0], [0], [1], [1], [0, 1, 1, 1], [], []>} : vector<8x8xf32>, vector<8x32xf32>, vector<8x32xf32> -> vector<8x32xf32>
    %c72_79 = arith.constant 72 : index
    %c0_80 = arith.constant 0 : index
    %178 = vector.load %arg4[%c72_79, %c0_80] : memref<256x32xf32, #tpu.memory_space<vmem>>, vector<8x32xf32>
    tpu.vector_store %arg4[%c72_79, %c0_80], %177 {strides = array<i32>} : memref<256x32xf32, #tpu.memory_space<vmem>>, vector<8x32xf32>,
    %179 = vector.extract_strided_slice %3 {offsets = [80, 0], sizes = [8, 32], strides = [1, 1]} : vector<256x32xf32> to vector<8x32xf32>
    %180 = vector.extract_strided_slice %6 {offsets = [80, 0], sizes = [8, 32], strides = [1, 1]} : vector<256x32xf32> to vector<8x32xf32>
    %181 = vector.extract_strided_slice %8 {offsets = [80, 0], sizes = [8, 32], strides = [1, 1]} : vector<256x32xf32> to vector<8x32xf32>
    %cst_81 = arith.constant dense<0.000000e+00> : vector<8x8xf32>
    %182 = tpu.matmul %180, %179, %cst_81 {dimension_numbers = #tpu.dot_dimension_numbers<[1], [1], [0], [0], [0, 0, 1, 0], [], []>} : vector<8x32xf32>, vector<8x32xf32>, vector<8x8xf32> -> vector<8x8xf32>
    %cst_82 = arith.constant dense<0xFF800000> : vector<8xf32>
    %183 = vector.multi_reduction <maximumf>, %182, %cst_82 [1] : vector<8x8xf32> to vector<8xf32>
    %184 = vector.shape_cast %183 : vector<8xf32> to vector<8x1xf32>
    %185 = vector.broadcast %184 : vector<8x1xf32> to vector<8x8xf32>
    %186 = arith.subf %182, %185 : vector<8x8xf32>
    %187 = math.exp %186 : vector<8x8xf32>
    %cst_83 = arith.constant dense<0.000000e+00> : vector<8xf32>
    %188 = vector.multi_reduction <add>, %187, %cst_83 [1] : vector<8x8xf32> to vector<8xf32>
    %189 = vector.shape_cast %188 : vector<8xf32> to vector<8x1xf32>
    %190 = tpu.reciprocal %189 : vector<8x1xf32> -> vector<8x1xf32>
    %191 = vector.broadcast %190 : vector<8x1xf32> to vector<8x8xf32>
    %192 = arith.mulf %187, %191 : vector<8x8xf32>
    %c80 = arith.constant 80 : index
    %c0_84 = arith.constant 0 : index
    %193 = vector.load %arg5[%c80, %c0_84] : memref<256x8xf32, #tpu.memory_space<vmem>>, vector<8x8xf32>
    tpu.vector_store %arg5[%c80, %c0_84], %192 {strides = array<i32>} : memref<256x8xf32, #tpu.memory_space<vmem>>, vector<8x8xf32>,
    %cst_85 = arith.constant dense<0.000000e+00> : vector<8x32xf32>
    %194 = tpu.matmul %192, %181, %cst_85 {dimension_numbers = #tpu.dot_dimension_numbers<[0], [0], [1], [1], [0, 1, 1, 1], [], []>} : vector<8x8xf32>, vector<8x32xf32>, vector<8x32xf32> -> vector<8x32xf32>
    %c80_86 = arith.constant 80 : index
    %c0_87 = arith.constant 0 : index
    %195 = vector.load %arg4[%c80_86, %c0_87] : memref<256x32xf32, #tpu.memory_space<vmem>>, vector<8x32xf32>
    tpu.vector_store %arg4[%c80_86, %c0_87], %194 {strides = array<i32>} : memref<256x32xf32, #tpu.memory_space<vmem>>, vector<8x32xf32>,
    %196 = vector.extract_strided_slice %3 {offsets = [88, 0], sizes = [8, 32], strides = [1, 1]} : vector<256x32xf32> to vector<8x32xf32>
    %197 = vector.extract_strided_slice %6 {offsets = [88, 0], sizes = [8, 32], strides = [1, 1]} : vector<256x32xf32> to vector<8x32xf32>
    %198 = vector.extract_strided_slice %8 {offsets = [88, 0], sizes = [8, 32], strides = [1, 1]} : vector<256x32xf32> to vector<8x32xf32>
    %cst_88 = arith.constant dense<0.000000e+00> : vector<8x8xf32>
    %199 = tpu.matmul %197, %196, %cst_88 {dimension_numbers = #tpu.dot_dimension_numbers<[1], [1], [0], [0], [0, 0, 1, 0], [], []>} : vector<8x32xf32>, vector<8x32xf32>, vector<8x8xf32> -> vector<8x8xf32>
    %cst_89 = arith.constant dense<0xFF800000> : vector<8xf32>
    %200 = vector.multi_reduction <maximumf>, %199, %cst_89 [1] : vector<8x8xf32> to vector<8xf32>
    %201 = vector.shape_cast %200 : vector<8xf32> to vector<8x1xf32>
    %202 = vector.broadcast %201 : vector<8x1xf32> to vector<8x8xf32>
    %203 = arith.subf %199, %202 : vector<8x8xf32>
    %204 = math.exp %203 : vector<8x8xf32>
    %cst_90 = arith.constant dense<0.000000e+00> : vector<8xf32>
    %205 = vector.multi_reduction <add>, %204, %cst_90 [1] : vector<8x8xf32> to vector<8xf32>
    %206 = vector.shape_cast %205 : vector<8xf32> to vector<8x1xf32>
    %207 = tpu.reciprocal %206 : vector<8x1xf32> -> vector<8x1xf32>
    %208 = vector.broadcast %207 : vector<8x1xf32> to vector<8x8xf32>
    %209 = arith.mulf %204, %208 : vector<8x8xf32>
    %c88 = arith.constant 88 : index
    %c0_91 = arith.constant 0 : index
    %210 = vector.load %arg5[%c88, %c0_91] : memref<256x8xf32, #tpu.memory_space<vmem>>, vector<8x8xf32>
    tpu.vector_store %arg5[%c88, %c0_91], %209 {strides = array<i32>} : memref<256x8xf32, #tpu.memory_space<vmem>>, vector<8x8xf32>,
    %cst_92 = arith.constant dense<0.000000e+00> : vector<8x32xf32>
    %211 = tpu.matmul %209, %198, %cst_92 {dimension_numbers = #tpu.dot_dimension_numbers<[0], [0], [1], [1], [0, 1, 1, 1], [], []>} : vector<8x8xf32>, vector<8x32xf32>, vector<8x32xf32> -> vector<8x32xf32>
    %c88_93 = arith.constant 88 : index
    %c0_94 = arith.constant 0 : index
    %212 = vector.load %arg4[%c88_93, %c0_94] : memref<256x32xf32, #tpu.memory_space<vmem>>, vector<8x32xf32>
    tpu.vector_store %arg4[%c88_93, %c0_94], %211 {strides = array<i32>} : memref<256x32xf32, #tpu.memory_space<vmem>>, vector<8x32xf32>,
    %213 = vector.extract_strided_slice %3 {offsets = [96, 0], sizes = [8, 32], strides = [1, 1]} : vector<256x32xf32> to vector<8x32xf32>
    %214 = vector.extract_strided_slice %6 {offsets = [96, 0], sizes = [8, 32], strides = [1, 1]} : vector<256x32xf32> to vector<8x32xf32>
    %215 = vector.extract_strided_slice %8 {offsets = [96, 0], sizes = [8, 32], strides = [1, 1]} : vector<256x32xf32> to vector<8x32xf32>
    %cst_95 = arith.constant dense<0.000000e+00> : vector<8x8xf32>
    %216 = tpu.matmul %214, %213, %cst_95 {dimension_numbers = #tpu.dot_dimension_numbers<[1], [1], [0], [0], [0, 0, 1, 0], [], []>} : vector<8x32xf32>, vector<8x32xf32>, vector<8x8xf32> -> vector<8x8xf32>
    %cst_96 = arith.constant dense<0xFF800000> : vector<8xf32>
    %217 = vector.multi_reduction <maximumf>, %216, %cst_96 [1] : vector<8x8xf32> to vector<8xf32>
    %218 = vector.shape_cast %217 : vector<8xf32> to vector<8x1xf32>
    %219 = vector.broadcast %218 : vector<8x1xf32> to vector<8x8xf32>
    %220 = arith.subf %216, %219 : vector<8x8xf32>
    %221 = math.exp %220 : vector<8x8xf32>
    %cst_97 = arith.constant dense<0.000000e+00> : vector<8xf32>
    %222 = vector.multi_reduction <add>, %221, %cst_97 [1] : vector<8x8xf32> to vector<8xf32>
    %223 = vector.shape_cast %222 : vector<8xf32> to vector<8x1xf32>
    %224 = tpu.reciprocal %223 : vector<8x1xf32> -> vector<8x1xf32>
    %225 = vector.broadcast %224 : vector<8x1xf32> to vector<8x8xf32>
    %226 = arith.mulf %221, %225 : vector<8x8xf32>
    %c96 = arith.constant 96 : index
    %c0_98 = arith.constant 0 : index
    %227 = vector.load %arg5[%c96, %c0_98] : memref<256x8xf32, #tpu.memory_space<vmem>>, vector<8x8xf32>
    tpu.vector_store %arg5[%c96, %c0_98], %226 {strides = array<i32>} : memref<256x8xf32, #tpu.memory_space<vmem>>, vector<8x8xf32>,
    %cst_99 = arith.constant dense<0.000000e+00> : vector<8x32xf32>
    %228 = tpu.matmul %226, %215, %cst_99 {dimension_numbers = #tpu.dot_dimension_numbers<[0], [0], [1], [1], [0, 1, 1, 1], [], []>} : vector<8x8xf32>, vector<8x32xf32>, vector<8x32xf32> -> vector<8x32xf32>
    %c96_100 = arith.constant 96 : index
    %c0_101 = arith.constant 0 : index
    %229 = vector.load %arg4[%c96_100, %c0_101] : memref<256x32xf32, #tpu.memory_space<vmem>>, vector<8x32xf32>
    tpu.vector_store %arg4[%c96_100, %c0_101], %228 {strides = array<i32>} : memref<256x32xf32, #tpu.memory_space<vmem>>, vector<8x32xf32>,
    %230 = vector.extract_strided_slice %3 {offsets = [104, 0], sizes = [8, 32], strides = [1, 1]} : vector<256x32xf32> to vector<8x32xf32>
    %231 = vector.extract_strided_slice %6 {offsets = [104, 0], sizes = [8, 32], strides = [1, 1]} : vector<256x32xf32> to vector<8x32xf32>
    %232 = vector.extract_strided_slice %8 {offsets = [104, 0], sizes = [8, 32], strides = [1, 1]} : vector<256x32xf32> to vector<8x32xf32>
    %cst_102 = arith.constant dense<0.000000e+00> : vector<8x8xf32>
    %233 = tpu.matmul %231, %230, %cst_102 {dimension_numbers = #tpu.dot_dimension_numbers<[1], [1], [0], [0], [0, 0, 1, 0], [], []>} : vector<8x32xf32>, vector<8x32xf32>, vector<8x8xf32> -> vector<8x8xf32>
    %cst_103 = arith.constant dense<0xFF800000> : vector<8xf32>
    %234 = vector.multi_reduction <maximumf>, %233, %cst_103 [1] : vector<8x8xf32> to vector<8xf32>
    %235 = vector.shape_cast %234 : vector<8xf32> to vector<8x1xf32>
    %236 = vector.broadcast %235 : vector<8x1xf32> to vector<8x8xf32>
    %237 = arith.subf %233, %236 : vector<8x8xf32>
    %238 = math.exp %237 : vector<8x8xf32>
    %cst_104 = arith.constant dense<0.000000e+00> : vector<8xf32>
    %239 = vector.multi_reduction <add>, %238, %cst_104 [1] : vector<8x8xf32> to vector<8xf32>
    %240 = vector.shape_cast %239 : vector<8xf32> to vector<8x1xf32>
    %241 = tpu.reciprocal %240 : vector<8x1xf32> -> vector<8x1xf32>
    %242 = vector.broadcast %241 : vector<8x1xf32> to vector<8x8xf32>
    %243 = arith.mulf %238, %242 : vector<8x8xf32>
    %c104 = arith.constant 104 : index
    %c0_105 = arith.constant 0 : index
    %244 = vector.load %arg5[%c104, %c0_105] : memref<256x8xf32, #tpu.memory_space<vmem>>, vector<8x8xf32>
    tpu.vector_store %arg5[%c104, %c0_105], %243 {strides = array<i32>} : memref<256x8xf32, #tpu.memory_space<vmem>>, vector<8x8xf32>,
    %cst_106 = arith.constant dense<0.000000e+00> : vector<8x32xf32>
    %245 = tpu.matmul %243, %232, %cst_106 {dimension_numbers = #tpu.dot_dimension_numbers<[0], [0], [1], [1], [0, 1, 1, 1], [], []>} : vector<8x8xf32>, vector<8x32xf32>, vector<8x32xf32> -> vector<8x32xf32>
    %c104_107 = arith.constant 104 : index
    %c0_108 = arith.constant 0 : index
    %246 = vector.load %arg4[%c104_107, %c0_108] : memref<256x32xf32, #tpu.memory_space<vmem>>, vector<8x32xf32>
    tpu.vector_store %arg4[%c104_107, %c0_108], %245 {strides = array<i32>} : memref<256x32xf32, #tpu.memory_space<vmem>>, vector<8x32xf32>,
    %247 = vector.extract_strided_slice %3 {offsets = [112, 0], sizes = [8, 32], strides = [1, 1]} : vector<256x32xf32> to vector<8x32xf32>
    %248 = vector.extract_strided_slice %6 {offsets = [112, 0], sizes = [8, 32], strides = [1, 1]} : vector<256x32xf32> to vector<8x32xf32>
    %249 = vector.extract_strided_slice %8 {offsets = [112, 0], sizes = [8, 32], strides = [1, 1]} : vector<256x32xf32> to vector<8x32xf32>
    %cst_109 = arith.constant dense<0.000000e+00> : vector<8x8xf32>
    %250 = tpu.matmul %248, %247, %cst_109 {dimension_numbers = #tpu.dot_dimension_numbers<[1], [1], [0], [0], [0, 0, 1, 0], [], []>} : vector<8x32xf32>, vector<8x32xf32>, vector<8x8xf32> -> vector<8x8xf32>
    %cst_110 = arith.constant dense<0xFF800000> : vector<8xf32>
    %251 = vector.multi_reduction <maximumf>, %250, %cst_110 [1] : vector<8x8xf32> to vector<8xf32>
    %252 = vector.shape_cast %251 : vector<8xf32> to vector<8x1xf32>
    %253 = vector.broadcast %252 : vector<8x1xf32> to vector<8x8xf32>
    %254 = arith.subf %250, %253 : vector<8x8xf32>
    %255 = math.exp %254 : vector<8x8xf32>
    %cst_111 = arith.constant dense<0.000000e+00> : vector<8xf32>
    %256 = vector.multi_reduction <add>, %255, %cst_111 [1] : vector<8x8xf32> to vector<8xf32>
    %257 = vector.shape_cast %256 : vector<8xf32> to vector<8x1xf32>
    %258 = tpu.reciprocal %257 : vector<8x1xf32> -> vector<8x1xf32>
    %259 = vector.broadcast %258 : vector<8x1xf32> to vector<8x8xf32>
    %260 = arith.mulf %255, %259 : vector<8x8xf32>
    %c112 = arith.constant 112 : index
    %c0_112 = arith.constant 0 : index
    %261 = vector.load %arg5[%c112, %c0_112] : memref<256x8xf32, #tpu.memory_space<vmem>>, vector<8x8xf32>
    tpu.vector_store %arg5[%c112, %c0_112], %260 {strides = array<i32>} : memref<256x8xf32, #tpu.memory_space<vmem>>, vector<8x8xf32>,
    %cst_113 = arith.constant dense<0.000000e+00> : vector<8x32xf32>
    %262 = tpu.matmul %260, %249, %cst_113 {dimension_numbers = #tpu.dot_dimension_numbers<[0], [0], [1], [1], [0, 1, 1, 1], [], []>} : vector<8x8xf32>, vector<8x32xf32>, vector<8x32xf32> -> vector<8x32xf32>
    %c112_114 = arith.constant 112 : index
    %c0_115 = arith.constant 0 : index
    %263 = vector.load %arg4[%c112_114, %c0_115] : memref<256x32xf32, #tpu.memory_space<vmem>>, vector<8x32xf32>
    tpu.vector_store %arg4[%c112_114, %c0_115], %262 {strides = array<i32>} : memref<256x32xf32, #tpu.memory_space<vmem>>, vector<8x32xf32>,
    %264 = vector.extract_strided_slice %3 {offsets = [120, 0], sizes = [8, 32], strides = [1, 1]} : vector<256x32xf32> to vector<8x32xf32>
    %265 = vector.extract_strided_slice %6 {offsets = [120, 0], sizes = [8, 32], strides = [1, 1]} : vector<256x32xf32> to vector<8x32xf32>
    %266 = vector.extract_strided_slice %8 {offsets = [120, 0], sizes = [8, 32], strides = [1, 1]} : vector<256x32xf32> to vector<8x32xf32>
    %cst_116 = arith.constant dense<0.000000e+00> : vector<8x8xf32>
    %267 = tpu.matmul %265, %264, %cst_116 {dimension_numbers = #tpu.dot_dimension_numbers<[1], [1], [0], [0], [0, 0, 1, 0], [], []>} : vector<8x32xf32>, vector<8x32xf32>, vector<8x8xf32> -> vector<8x8xf32>
    %cst_117 = arith.constant dense<0xFF800000> : vector<8xf32>
    %268 = vector.multi_reduction <maximumf>, %267, %cst_117 [1] : vector<8x8xf32> to vector<8xf32>
    %269 = vector.shape_cast %268 : vector<8xf32> to vector<8x1xf32>
    %270 = vector.broadcast %269 : vector<8x1xf32> to vector<8x8xf32>
    %271 = arith.subf %267, %270 : vector<8x8xf32>
    %272 = math.exp %271 : vector<8x8xf32>
    %cst_118 = arith.constant dense<0.000000e+00> : vector<8xf32>
    %273 = vector.multi_reduction <add>, %272, %cst_118 [1] : vector<8x8xf32> to vector<8xf32>
    %274 = vector.shape_cast %273 : vector<8xf32> to vector<8x1xf32>
    %275 = tpu.reciprocal %274 : vector<8x1xf32> -> vector<8x1xf32>
    %276 = vector.broadcast %275 : vector<8x1xf32> to vector<8x8xf32>
    %277 = arith.mulf %272, %276 : vector<8x8xf32>
    %c120 = arith.constant 120 : index
    %c0_119 = arith.constant 0 : index
    %278 = vector.load %arg5[%c120, %c0_119] : memref<256x8xf32, #tpu.memory_space<vmem>>, vector<8x8xf32>
    tpu.vector_store %arg5[%c120, %c0_119], %277 {strides = array<i32>} : memref<256x8xf32, #tpu.memory_space<vmem>>, vector<8x8xf32>,
    %cst_120 = arith.constant dense<0.000000e+00> : vector<8x32xf32>
    %279 = tpu.matmul %277, %266, %cst_120 {dimension_numbers = #tpu.dot_dimension_numbers<[0], [0], [1], [1], [0, 1, 1, 1], [], []>} : vector<8x8xf32>, vector<8x32xf32>, vector<8x32xf32> -> vector<8x32xf32>
    %c120_121 = arith.constant 120 : index
    %c0_122 = arith.constant 0 : index
    %280 = vector.load %arg4[%c120_121, %c0_122] : memref<256x32xf32, #tpu.memory_space<vmem>>, vector<8x32xf32>
    tpu.vector_store %arg4[%c120_121, %c0_122], %279 {strides = array<i32>} : memref<256x32xf32, #tpu.memory_space<vmem>>, vector<8x32xf32>,
    %281 = vector.extract_strided_slice %3 {offsets = [128, 0], sizes = [8, 32], strides = [1, 1]} : vector<256x32xf32> to vector<8x32xf32>
    %282 = vector.extract_strided_slice %6 {offsets = [128, 0], sizes = [8, 32], strides = [1, 1]} : vector<256x32xf32> to vector<8x32xf32>
    %283 = vector.extract_strided_slice %8 {offsets = [128, 0], sizes = [8, 32], strides = [1, 1]} : vector<256x32xf32> to vector<8x32xf32>
    %cst_123 = arith.constant dense<0.000000e+00> : vector<8x8xf32>
    %284 = tpu.matmul %282, %281, %cst_123 {dimension_numbers = #tpu.dot_dimension_numbers<[1], [1], [0], [0], [0, 0, 1, 0], [], []>} : vector<8x32xf32>, vector<8x32xf32>, vector<8x8xf32> -> vector<8x8xf32>
    %cst_124 = arith.constant dense<0xFF800000> : vector<8xf32>
    %285 = vector.multi_reduction <maximumf>, %284, %cst_124 [1] : vector<8x8xf32> to vector<8xf32>
    %286 = vector.shape_cast %285 : vector<8xf32> to vector<8x1xf32>
    %287 = vector.broadcast %286 : vector<8x1xf32> to vector<8x8xf32>
    %288 = arith.subf %284, %287 : vector<8x8xf32>
    %289 = math.exp %288 : vector<8x8xf32>
    %cst_125 = arith.constant dense<0.000000e+00> : vector<8xf32>
    %290 = vector.multi_reduction <add>, %289, %cst_125 [1] : vector<8x8xf32> to vector<8xf32>
    %291 = vector.shape_cast %290 : vector<8xf32> to vector<8x1xf32>
    %292 = tpu.reciprocal %291 : vector<8x1xf32> -> vector<8x1xf32>
    %293 = vector.broadcast %292 : vector<8x1xf32> to vector<8x8xf32>
    %294 = arith.mulf %289, %293 : vector<8x8xf32>
    %c128 = arith.constant 128 : index
    %c0_126 = arith.constant 0 : index
    %295 = vector.load %arg5[%c128, %c0_126] : memref<256x8xf32, #tpu.memory_space<vmem>>, vector<8x8xf32>
    tpu.vector_store %arg5[%c128, %c0_126], %294 {strides = array<i32>} : memref<256x8xf32, #tpu.memory_space<vmem>>, vector<8x8xf32>,
    %cst_127 = arith.constant dense<0.000000e+00> : vector<8x32xf32>
    %296 = tpu.matmul %294, %283, %cst_127 {dimension_numbers = #tpu.dot_dimension_numbers<[0], [0], [1], [1], [0, 1, 1, 1], [], []>} : vector<8x8xf32>, vector<8x32xf32>, vector<8x32xf32> -> vector<8x32xf32>
    %c128_128 = arith.constant 128 : index
    %c0_129 = arith.constant 0 : index
    %297 = vector.load %arg4[%c128_128, %c0_129] : memref<256x32xf32, #tpu.memory_space<vmem>>, vector<8x32xf32>
    tpu.vector_store %arg4[%c128_128, %c0_129], %296 {strides = array<i32>} : memref<256x32xf32, #tpu.memory_space<vmem>>, vector<8x32xf32>,
    %298 = vector.extract_strided_slice %3 {offsets = [136, 0], sizes = [8, 32], strides = [1, 1]} : vector<256x32xf32> to vector<8x32xf32>
    %299 = vector.extract_strided_slice %6 {offsets = [136, 0], sizes = [8, 32], strides = [1, 1]} : vector<256x32xf32> to vector<8x32xf32>
    %300 = vector.extract_strided_slice %8 {offsets = [136, 0], sizes = [8, 32], strides = [1, 1]} : vector<256x32xf32> to vector<8x32xf32>
    %cst_130 = arith.constant dense<0.000000e+00> : vector<8x8xf32>
    %301 = tpu.matmul %299, %298, %cst_130 {dimension_numbers = #tpu.dot_dimension_numbers<[1], [1], [0], [0], [0, 0, 1, 0], [], []>} : vector<8x32xf32>, vector<8x32xf32>, vector<8x8xf32> -> vector<8x8xf32>
    %cst_131 = arith.constant dense<0xFF800000> : vector<8xf32>
    %302 = vector.multi_reduction <maximumf>, %301, %cst_131 [1] : vector<8x8xf32> to vector<8xf32>
    %303 = vector.shape_cast %302 : vector<8xf32> to vector<8x1xf32>
    %304 = vector.broadcast %303 : vector<8x1xf32> to vector<8x8xf32>
    %305 = arith.subf %301, %304 : vector<8x8xf32>
    %306 = math.exp %305 : vector<8x8xf32>
    %cst_132 = arith.constant dense<0.000000e+00> : vector<8xf32>
    %307 = vector.multi_reduction <add>, %306, %cst_132 [1] : vector<8x8xf32> to vector<8xf32>
    %308 = vector.shape_cast %307 : vector<8xf32> to vector<8x1xf32>
    %309 = tpu.reciprocal %308 : vector<8x1xf32> -> vector<8x1xf32>
    %310 = vector.broadcast %309 : vector<8x1xf32> to vector<8x8xf32>
    %311 = arith.mulf %306, %310 : vector<8x8xf32>
    %c136 = arith.constant 136 : index
    %c0_133 = arith.constant 0 : index
    %312 = vector.load %arg5[%c136, %c0_133] : memref<256x8xf32, #tpu.memory_space<vmem>>, vector<8x8xf32>
    tpu.vector_store %arg5[%c136, %c0_133], %311 {strides = array<i32>} : memref<256x8xf32, #tpu.memory_space<vmem>>, vector<8x8xf32>,
    %cst_134 = arith.constant dense<0.000000e+00> : vector<8x32xf32>
    %313 = tpu.matmul %311, %300, %cst_134 {dimension_numbers = #tpu.dot_dimension_numbers<[0], [0], [1], [1], [0, 1, 1, 1], [], []>} : vector<8x8xf32>, vector<8x32xf32>, vector<8x32xf32> -> vector<8x32xf32>
    %c136_135 = arith.constant 136 : index
    %c0_136 = arith.constant 0 : index
    %314 = vector.load %arg4[%c136_135, %c0_136] : memref<256x32xf32, #tpu.memory_space<vmem>>, vector<8x32xf32>
    tpu.vector_store %arg4[%c136_135, %c0_136], %313 {strides = array<i32>} : memref<256x32xf32, #tpu.memory_space<vmem>>, vector<8x32xf32>,
    %315 = vector.extract_strided_slice %3 {offsets = [144, 0], sizes = [8, 32], strides = [1, 1]} : vector<256x32xf32> to vector<8x32xf32>
    %316 = vector.extract_strided_slice %6 {offsets = [144, 0], sizes = [8, 32], strides = [1, 1]} : vector<256x32xf32> to vector<8x32xf32>
    %317 = vector.extract_strided_slice %8 {offsets = [144, 0], sizes = [8, 32], strides = [1, 1]} : vector<256x32xf32> to vector<8x32xf32>
    %cst_137 = arith.constant dense<0.000000e+00> : vector<8x8xf32>
    %318 = tpu.matmul %316, %315, %cst_137 {dimension_numbers = #tpu.dot_dimension_numbers<[1], [1], [0], [0], [0, 0, 1, 0], [], []>} : vector<8x32xf32>, vector<8x32xf32>, vector<8x8xf32> -> vector<8x8xf32>
    %cst_138 = arith.constant dense<0xFF800000> : vector<8xf32>
    %319 = vector.multi_reduction <maximumf>, %318, %cst_138 [1] : vector<8x8xf32> to vector<8xf32>
    %320 = vector.shape_cast %319 : vector<8xf32> to vector<8x1xf32>
    %321 = vector.broadcast %320 : vector<8x1xf32> to vector<8x8xf32>
    %322 = arith.subf %318, %321 : vector<8x8xf32>
    %323 = math.exp %322 : vector<8x8xf32>
    %cst_139 = arith.constant dense<0.000000e+00> : vector<8xf32>
    %324 = vector.multi_reduction <add>, %323, %cst_139 [1] : vector<8x8xf32> to vector<8xf32>
    %325 = vector.shape_cast %324 : vector<8xf32> to vector<8x1xf32>
    %326 = tpu.reciprocal %325 : vector<8x1xf32> -> vector<8x1xf32>
    %327 = vector.broadcast %326 : vector<8x1xf32> to vector<8x8xf32>
    %328 = arith.mulf %323, %327 : vector<8x8xf32>
    %c144 = arith.constant 144 : index
    %c0_140 = arith.constant 0 : index
    %329 = vector.load %arg5[%c144, %c0_140] : memref<256x8xf32, #tpu.memory_space<vmem>>, vector<8x8xf32>
    tpu.vector_store %arg5[%c144, %c0_140], %328 {strides = array<i32>} : memref<256x8xf32, #tpu.memory_space<vmem>>, vector<8x8xf32>,
    %cst_141 = arith.constant dense<0.000000e+00> : vector<8x32xf32>
    %330 = tpu.matmul %328, %317, %cst_141 {dimension_numbers = #tpu.dot_dimension_numbers<[0], [0], [1], [1], [0, 1, 1, 1], [], []>} : vector<8x8xf32>, vector<8x32xf32>, vector<8x32xf32> -> vector<8x32xf32>
    %c144_142 = arith.constant 144 : index
    %c0_143 = arith.constant 0 : index
    %331 = vector.load %arg4[%c144_142, %c0_143] : memref<256x32xf32, #tpu.memory_space<vmem>>, vector<8x32xf32>
    tpu.vector_store %arg4[%c144_142, %c0_143], %330 {strides = array<i32>} : memref<256x32xf32, #tpu.memory_space<vmem>>, vector<8x32xf32>,
    %332 = vector.extract_strided_slice %3 {offsets = [152, 0], sizes = [8, 32], strides = [1, 1]} : vector<256x32xf32> to vector<8x32xf32>
    %333 = vector.extract_strided_slice %6 {offsets = [152, 0], sizes = [8, 32], strides = [1, 1]} : vector<256x32xf32> to vector<8x32xf32>
    %334 = vector.extract_strided_slice %8 {offsets = [152, 0], sizes = [8, 32], strides = [1, 1]} : vector<256x32xf32> to vector<8x32xf32>
    %cst_144 = arith.constant dense<0.000000e+00> : vector<8x8xf32>
    %335 = tpu.matmul %333, %332, %cst_144 {dimension_numbers = #tpu.dot_dimension_numbers<[1], [1], [0], [0], [0, 0, 1, 0], [], []>} : vector<8x32xf32>, vector<8x32xf32>, vector<8x8xf32> -> vector<8x8xf32>
    %cst_145 = arith.constant dense<0xFF800000> : vector<8xf32>
    %336 = vector.multi_reduction <maximumf>, %335, %cst_145 [1] : vector<8x8xf32> to vector<8xf32>
    %337 = vector.shape_cast %336 : vector<8xf32> to vector<8x1xf32>
    %338 = vector.broadcast %337 : vector<8x1xf32> to vector<8x8xf32>
    %339 = arith.subf %335, %338 : vector<8x8xf32>
    %340 = math.exp %339 : vector<8x8xf32>
    %cst_146 = arith.constant dense<0.000000e+00> : vector<8xf32>
    %341 = vector.multi_reduction <add>, %340, %cst_146 [1] : vector<8x8xf32> to vector<8xf32>
    %342 = vector.shape_cast %341 : vector<8xf32> to vector<8x1xf32>
    %343 = tpu.reciprocal %342 : vector<8x1xf32> -> vector<8x1xf32>
    %344 = vector.broadcast %343 : vector<8x1xf32> to vector<8x8xf32>
    %345 = arith.mulf %340, %344 : vector<8x8xf32>
    %c152 = arith.constant 152 : index
    %c0_147 = arith.constant 0 : index
    %346 = vector.load %arg5[%c152, %c0_147] : memref<256x8xf32, #tpu.memory_space<vmem>>, vector<8x8xf32>
    tpu.vector_store %arg5[%c152, %c0_147], %345 {strides = array<i32>} : memref<256x8xf32, #tpu.memory_space<vmem>>, vector<8x8xf32>,
    %cst_148 = arith.constant dense<0.000000e+00> : vector<8x32xf32>
    %347 = tpu.matmul %345, %334, %cst_148 {dimension_numbers = #tpu.dot_dimension_numbers<[0], [0], [1], [1], [0, 1, 1, 1], [], []>} : vector<8x8xf32>, vector<8x32xf32>, vector<8x32xf32> -> vector<8x32xf32>
    %c152_149 = arith.constant 152 : index
    %c0_150 = arith.constant 0 : index
    %348 = vector.load %arg4[%c152_149, %c0_150] : memref<256x32xf32, #tpu.memory_space<vmem>>, vector<8x32xf32>
    tpu.vector_store %arg4[%c152_149, %c0_150], %347 {strides = array<i32>} : memref<256x32xf32, #tpu.memory_space<vmem>>, vector<8x32xf32>,
    %349 = vector.extract_strided_slice %3 {offsets = [160, 0], sizes = [8, 32], strides = [1, 1]} : vector<256x32xf32> to vector<8x32xf32>
    %350 = vector.extract_strided_slice %6 {offsets = [160, 0], sizes = [8, 32], strides = [1, 1]} : vector<256x32xf32> to vector<8x32xf32>
    %351 = vector.extract_strided_slice %8 {offsets = [160, 0], sizes = [8, 32], strides = [1, 1]} : vector<256x32xf32> to vector<8x32xf32>
    %cst_151 = arith.constant dense<0.000000e+00> : vector<8x8xf32>
    %352 = tpu.matmul %350, %349, %cst_151 {dimension_numbers = #tpu.dot_dimension_numbers<[1], [1], [0], [0], [0, 0, 1, 0], [], []>} : vector<8x32xf32>, vector<8x32xf32>, vector<8x8xf32> -> vector<8x8xf32>
    %cst_152 = arith.constant dense<0xFF800000> : vector<8xf32>
    %353 = vector.multi_reduction <maximumf>, %352, %cst_152 [1] : vector<8x8xf32> to vector<8xf32>
    %354 = vector.shape_cast %353 : vector<8xf32> to vector<8x1xf32>
    %355 = vector.broadcast %354 : vector<8x1xf32> to vector<8x8xf32>
    %356 = arith.subf %352, %355 : vector<8x8xf32>
    %357 = math.exp %356 : vector<8x8xf32>
    %cst_153 = arith.constant dense<0.000000e+00> : vector<8xf32>
    %358 = vector.multi_reduction <add>, %357, %cst_153 [1] : vector<8x8xf32> to vector<8xf32>
    %359 = vector.shape_cast %358 : vector<8xf32> to vector<8x1xf32>
    %360 = tpu.reciprocal %359 : vector<8x1xf32> -> vector<8x1xf32>
    %361 = vector.broadcast %360 : vector<8x1xf32> to vector<8x8xf32>
    %362 = arith.mulf %357, %361 : vector<8x8xf32>
    %c160 = arith.constant 160 : index
    %c0_154 = arith.constant 0 : index
    %363 = vector.load %arg5[%c160, %c0_154] : memref<256x8xf32, #tpu.memory_space<vmem>>, vector<8x8xf32>
    tpu.vector_store %arg5[%c160, %c0_154], %362 {strides = array<i32>} : memref<256x8xf32, #tpu.memory_space<vmem>>, vector<8x8xf32>,
    %cst_155 = arith.constant dense<0.000000e+00> : vector<8x32xf32>
    %364 = tpu.matmul %362, %351, %cst_155 {dimension_numbers = #tpu.dot_dimension_numbers<[0], [0], [1], [1], [0, 1, 1, 1], [], []>} : vector<8x8xf32>, vector<8x32xf32>, vector<8x32xf32> -> vector<8x32xf32>
    %c160_156 = arith.constant 160 : index
    %c0_157 = arith.constant 0 : index
    %365 = vector.load %arg4[%c160_156, %c0_157] : memref<256x32xf32, #tpu.memory_space<vmem>>, vector<8x32xf32>
    tpu.vector_store %arg4[%c160_156, %c0_157], %364 {strides = array<i32>} : memref<256x32xf32, #tpu.memory_space<vmem>>, vector<8x32xf32>,
    %366 = vector.extract_strided_slice %3 {offsets = [168, 0], sizes = [8, 32], strides = [1, 1]} : vector<256x32xf32> to vector<8x32xf32>
    %367 = vector.extract_strided_slice %6 {offsets = [168, 0], sizes = [8, 32], strides = [1, 1]} : vector<256x32xf32> to vector<8x32xf32>
    %368 = vector.extract_strided_slice %8 {offsets = [168, 0], sizes = [8, 32], strides = [1, 1]} : vector<256x32xf32> to vector<8x32xf32>
    %cst_158 = arith.constant dense<0.000000e+00> : vector<8x8xf32>
    %369 = tpu.matmul %367, %366, %cst_158 {dimension_numbers = #tpu.dot_dimension_numbers<[1], [1], [0], [0], [0, 0, 1, 0], [], []>} : vector<8x32xf32>, vector<8x32xf32>, vector<8x8xf32> -> vector<8x8xf32>
    %cst_159 = arith.constant dense<0xFF800000> : vector<8xf32>
    %370 = vector.multi_reduction <maximumf>, %369, %cst_159 [1] : vector<8x8xf32> to vector<8xf32>
    %371 = vector.shape_cast %370 : vector<8xf32> to vector<8x1xf32>
    %372 = vector.broadcast %371 : vector<8x1xf32> to vector<8x8xf32>
    %373 = arith.subf %369, %372 : vector<8x8xf32>
    %374 = math.exp %373 : vector<8x8xf32>
    %cst_160 = arith.constant dense<0.000000e+00> : vector<8xf32>
    %375 = vector.multi_reduction <add>, %374, %cst_160 [1] : vector<8x8xf32> to vector<8xf32>
    %376 = vector.shape_cast %375 : vector<8xf32> to vector<8x1xf32>
    %377 = tpu.reciprocal %376 : vector<8x1xf32> -> vector<8x1xf32>
    %378 = vector.broadcast %377 : vector<8x1xf32> to vector<8x8xf32>
    %379 = arith.mulf %374, %378 : vector<8x8xf32>
    %c168 = arith.constant 168 : index
    %c0_161 = arith.constant 0 : index
    %380 = vector.load %arg5[%c168, %c0_161] : memref<256x8xf32, #tpu.memory_space<vmem>>, vector<8x8xf32>
    tpu.vector_store %arg5[%c168, %c0_161], %379 {strides = array<i32>} : memref<256x8xf32, #tpu.memory_space<vmem>>, vector<8x8xf32>,
    %cst_162 = arith.constant dense<0.000000e+00> : vector<8x32xf32>
    %381 = tpu.matmul %379, %368, %cst_162 {dimension_numbers = #tpu.dot_dimension_numbers<[0], [0], [1], [1], [0, 1, 1, 1], [], []>} : vector<8x8xf32>, vector<8x32xf32>, vector<8x32xf32> -> vector<8x32xf32>
    %c168_163 = arith.constant 168 : index
    %c0_164 = arith.constant 0 : index
    %382 = vector.load %arg4[%c168_163, %c0_164] : memref<256x32xf32, #tpu.memory_space<vmem>>, vector<8x32xf32>
    tpu.vector_store %arg4[%c168_163, %c0_164], %381 {strides = array<i32>} : memref<256x32xf32, #tpu.memory_space<vmem>>, vector<8x32xf32>,
    %383 = vector.extract_strided_slice %3 {offsets = [176, 0], sizes = [8, 32], strides = [1, 1]} : vector<256x32xf32> to vector<8x32xf32>
    %384 = vector.extract_strided_slice %6 {offsets = [176, 0], sizes = [8, 32], strides = [1, 1]} : vector<256x32xf32> to vector<8x32xf32>
    %385 = vector.extract_strided_slice %8 {offsets = [176, 0], sizes = [8, 32], strides = [1, 1]} : vector<256x32xf32> to vector<8x32xf32>
    %cst_165 = arith.constant dense<0.000000e+00> : vector<8x8xf32>
    %386 = tpu.matmul %384, %383, %cst_165 {dimension_numbers = #tpu.dot_dimension_numbers<[1], [1], [0], [0], [0, 0, 1, 0], [], []>} : vector<8x32xf32>, vector<8x32xf32>, vector<8x8xf32> -> vector<8x8xf32>
    %cst_166 = arith.constant dense<0xFF800000> : vector<8xf32>
    %387 = vector.multi_reduction <maximumf>, %386, %cst_166 [1] : vector<8x8xf32> to vector<8xf32>
    %388 = vector.shape_cast %387 : vector<8xf32> to vector<8x1xf32>
    %389 = vector.broadcast %388 : vector<8x1xf32> to vector<8x8xf32>
    %390 = arith.subf %386, %389 : vector<8x8xf32>
    %391 = math.exp %390 : vector<8x8xf32>
    %cst_167 = arith.constant dense<0.000000e+00> : vector<8xf32>
    %392 = vector.multi_reduction <add>, %391, %cst_167 [1] : vector<8x8xf32> to vector<8xf32>
    %393 = vector.shape_cast %392 : vector<8xf32> to vector<8x1xf32>
    %394 = tpu.reciprocal %393 : vector<8x1xf32> -> vector<8x1xf32>
    %395 = vector.broadcast %394 : vector<8x1xf32> to vector<8x8xf32>
    %396 = arith.mulf %391, %395 : vector<8x8xf32>
    %c176 = arith.constant 176 : index
    %c0_168 = arith.constant 0 : index
    %397 = vector.load %arg5[%c176, %c0_168] : memref<256x8xf32, #tpu.memory_space<vmem>>, vector<8x8xf32>
    tpu.vector_store %arg5[%c176, %c0_168], %396 {strides = array<i32>} : memref<256x8xf32, #tpu.memory_space<vmem>>, vector<8x8xf32>,
    %cst_169 = arith.constant dense<0.000000e+00> : vector<8x32xf32>
    %398 = tpu.matmul %396, %385, %cst_169 {dimension_numbers = #tpu.dot_dimension_numbers<[0], [0], [1], [1], [0, 1, 1, 1], [], []>} : vector<8x8xf32>, vector<8x32xf32>, vector<8x32xf32> -> vector<8x32xf32>
    %c176_170 = arith.constant 176 : index
    %c0_171 = arith.constant 0 : index
    %399 = vector.load %arg4[%c176_170, %c0_171] : memref<256x32xf32, #tpu.memory_space<vmem>>, vector<8x32xf32>
    tpu.vector_store %arg4[%c176_170, %c0_171], %398 {strides = array<i32>} : memref<256x32xf32, #tpu.memory_space<vmem>>, vector<8x32xf32>,
    %400 = vector.extract_strided_slice %3 {offsets = [184, 0], sizes = [8, 32], strides = [1, 1]} : vector<256x32xf32> to vector<8x32xf32>
    %401 = vector.extract_strided_slice %6 {offsets = [184, 0], sizes = [8, 32], strides = [1, 1]} : vector<256x32xf32> to vector<8x32xf32>
    %402 = vector.extract_strided_slice %8 {offsets = [184, 0], sizes = [8, 32], strides = [1, 1]} : vector<256x32xf32> to vector<8x32xf32>
    %cst_172 = arith.constant dense<0.000000e+00> : vector<8x8xf32>
    %403 = tpu.matmul %401, %400, %cst_172 {dimension_numbers = #tpu.dot_dimension_numbers<[1], [1], [0], [0], [0, 0, 1, 0], [], []>} : vector<8x32xf32>, vector<8x32xf32>, vector<8x8xf32> -> vector<8x8xf32>
    %cst_173 = arith.constant dense<0xFF800000> : vector<8xf32>
    %404 = vector.multi_reduction <maximumf>, %403, %cst_173 [1] : vector<8x8xf32> to vector<8xf32>
    %405 = vector.shape_cast %404 : vector<8xf32> to vector<8x1xf32>
    %406 = vector.broadcast %405 : vector<8x1xf32> to vector<8x8xf32>
    %407 = arith.subf %403, %406 : vector<8x8xf32>
    %408 = math.exp %407 : vector<8x8xf32>
    %cst_174 = arith.constant dense<0.000000e+00> : vector<8xf32>
    %409 = vector.multi_reduction <add>, %408, %cst_174 [1] : vector<8x8xf32> to vector<8xf32>
    %410 = vector.shape_cast %409 : vector<8xf32> to vector<8x1xf32>
    %411 = tpu.reciprocal %410 : vector<8x1xf32> -> vector<8x1xf32>
    %412 = vector.broadcast %411 : vector<8x1xf32> to vector<8x8xf32>
    %413 = arith.mulf %408, %412 : vector<8x8xf32>
    %c184 = arith.constant 184 : index
    %c0_175 = arith.constant 0 : index
    %414 = vector.load %arg5[%c184, %c0_175] : memref<256x8xf32, #tpu.memory_space<vmem>>, vector<8x8xf32>
    tpu.vector_store %arg5[%c184, %c0_175], %413 {strides = array<i32>} : memref<256x8xf32, #tpu.memory_space<vmem>>, vector<8x8xf32>,
    %cst_176 = arith.constant dense<0.000000e+00> : vector<8x32xf32>
    %415 = tpu.matmul %413, %402, %cst_176 {dimension_numbers = #tpu.dot_dimension_numbers<[0], [0], [1], [1], [0, 1, 1, 1], [], []>} : vector<8x8xf32>, vector<8x32xf32>, vector<8x32xf32> -> vector<8x32xf32>
    %c184_177 = arith.constant 184 : index
    %c0_178 = arith.constant 0 : index
    %416 = vector.load %arg4[%c184_177, %c0_178] : memref<256x32xf32, #tpu.memory_space<vmem>>, vector<8x32xf32>
    tpu.vector_store %arg4[%c184_177, %c0_178], %415 {strides = array<i32>} : memref<256x32xf32, #tpu.memory_space<vmem>>, vector<8x32xf32>,
    %417 = vector.extract_strided_slice %3 {offsets = [192, 0], sizes = [8, 32], strides = [1, 1]} : vector<256x32xf32> to vector<8x32xf32>
    %418 = vector.extract_strided_slice %6 {offsets = [192, 0], sizes = [8, 32], strides = [1, 1]} : vector<256x32xf32> to vector<8x32xf32>
    %419 = vector.extract_strided_slice %8 {offsets = [192, 0], sizes = [8, 32], strides = [1, 1]} : vector<256x32xf32> to vector<8x32xf32>
    %cst_179 = arith.constant dense<0.000000e+00> : vector<8x8xf32>
    %420 = tpu.matmul %418, %417, %cst_179 {dimension_numbers = #tpu.dot_dimension_numbers<[1], [1], [0], [0], [0, 0, 1, 0], [], []>} : vector<8x32xf32>, vector<8x32xf32>, vector<8x8xf32> -> vector<8x8xf32>
    %cst_180 = arith.constant dense<0xFF800000> : vector<8xf32>
    %421 = vector.multi_reduction <maximumf>, %420, %cst_180 [1] : vector<8x8xf32> to vector<8xf32>
    %422 = vector.shape_cast %421 : vector<8xf32> to vector<8x1xf32>
    %423 = vector.broadcast %422 : vector<8x1xf32> to vector<8x8xf32>
    %424 = arith.subf %420, %423 : vector<8x8xf32>
    %425 = math.exp %424 : vector<8x8xf32>
    %cst_181 = arith.constant dense<0.000000e+00> : vector<8xf32>
    %426 = vector.multi_reduction <add>, %425, %cst_181 [1] : vector<8x8xf32> to vector<8xf32>
    %427 = vector.shape_cast %426 : vector<8xf32> to vector<8x1xf32>
    %428 = tpu.reciprocal %427 : vector<8x1xf32> -> vector<8x1xf32>
    %429 = vector.broadcast %428 : vector<8x1xf32> to vector<8x8xf32>
    %430 = arith.mulf %425, %429 : vector<8x8xf32>
    %c192 = arith.constant 192 : index
    %c0_182 = arith.constant 0 : index
    %431 = vector.load %arg5[%c192, %c0_182] : memref<256x8xf32, #tpu.memory_space<vmem>>, vector<8x8xf32>
    tpu.vector_store %arg5[%c192, %c0_182], %430 {strides = array<i32>} : memref<256x8xf32, #tpu.memory_space<vmem>>, vector<8x8xf32>,
    %cst_183 = arith.constant dense<0.000000e+00> : vector<8x32xf32>
    %432 = tpu.matmul %430, %419, %cst_183 {dimension_numbers = #tpu.dot_dimension_numbers<[0], [0], [1], [1], [0, 1, 1, 1], [], []>} : vector<8x8xf32>, vector<8x32xf32>, vector<8x32xf32> -> vector<8x32xf32>
    %c192_184 = arith.constant 192 : index
    %c0_185 = arith.constant 0 : index
    %433 = vector.load %arg4[%c192_184, %c0_185] : memref<256x32xf32, #tpu.memory_space<vmem>>, vector<8x32xf32>
    tpu.vector_store %arg4[%c192_184, %c0_185], %432 {strides = array<i32>} : memref<256x32xf32, #tpu.memory_space<vmem>>, vector<8x32xf32>,
    %434 = vector.extract_strided_slice %3 {offsets = [200, 0], sizes = [8, 32], strides = [1, 1]} : vector<256x32xf32> to vector<8x32xf32>
    %435 = vector.extract_strided_slice %6 {offsets = [200, 0], sizes = [8, 32], strides = [1, 1]} : vector<256x32xf32> to vector<8x32xf32>
    %436 = vector.extract_strided_slice %8 {offsets = [200, 0], sizes = [8, 32], strides = [1, 1]} : vector<256x32xf32> to vector<8x32xf32>
    %cst_186 = arith.constant dense<0.000000e+00> : vector<8x8xf32>
    %437 = tpu.matmul %435, %434, %cst_186 {dimension_numbers = #tpu.dot_dimension_numbers<[1], [1], [0], [0], [0, 0, 1, 0], [], []>} : vector<8x32xf32>, vector<8x32xf32>, vector<8x8xf32> -> vector<8x8xf32>
    %cst_187 = arith.constant dense<0xFF800000> : vector<8xf32>
    %438 = vector.multi_reduction <maximumf>, %437, %cst_187 [1] : vector<8x8xf32> to vector<8xf32>
    %439 = vector.shape_cast %438 : vector<8xf32> to vector<8x1xf32>
    %440 = vector.broadcast %439 : vector<8x1xf32> to vector<8x8xf32>
    %441 = arith.subf %437, %440 : vector<8x8xf32>
    %442 = math.exp %441 : vector<8x8xf32>
    %cst_188 = arith.constant dense<0.000000e+00> : vector<8xf32>
    %443 = vector.multi_reduction <add>, %442, %cst_188 [1] : vector<8x8xf32> to vector<8xf32>
    %444 = vector.shape_cast %443 : vector<8xf32> to vector<8x1xf32>
    %445 = tpu.reciprocal %444 : vector<8x1xf32> -> vector<8x1xf32>
    %446 = vector.broadcast %445 : vector<8x1xf32> to vector<8x8xf32>
    %447 = arith.mulf %442, %446 : vector<8x8xf32>
    %c200 = arith.constant 200 : index
    %c0_189 = arith.constant 0 : index
    %448 = vector.load %arg5[%c200, %c0_189] : memref<256x8xf32, #tpu.memory_space<vmem>>, vector<8x8xf32>
    tpu.vector_store %arg5[%c200, %c0_189], %447 {strides = array<i32>} : memref<256x8xf32, #tpu.memory_space<vmem>>, vector<8x8xf32>,
    %cst_190 = arith.constant dense<0.000000e+00> : vector<8x32xf32>
    %449 = tpu.matmul %447, %436, %cst_190 {dimension_numbers = #tpu.dot_dimension_numbers<[0], [0], [1], [1], [0, 1, 1, 1], [], []>} : vector<8x8xf32>, vector<8x32xf32>, vector<8x32xf32> -> vector<8x32xf32>
    %c200_191 = arith.constant 200 : index
    %c0_192 = arith.constant 0 : index
    %450 = vector.load %arg4[%c200_191, %c0_192] : memref<256x32xf32, #tpu.memory_space<vmem>>, vector<8x32xf32>
    tpu.vector_store %arg4[%c200_191, %c0_192], %449 {strides = array<i32>} : memref<256x32xf32, #tpu.memory_space<vmem>>, vector<8x32xf32>,
    %451 = vector.extract_strided_slice %3 {offsets = [208, 0], sizes = [8, 32], strides = [1, 1]} : vector<256x32xf32> to vector<8x32xf32>
    %452 = vector.extract_strided_slice %6 {offsets = [208, 0], sizes = [8, 32], strides = [1, 1]} : vector<256x32xf32> to vector<8x32xf32>
    %453 = vector.extract_strided_slice %8 {offsets = [208, 0], sizes = [8, 32], strides = [1, 1]} : vector<256x32xf32> to vector<8x32xf32>
    %cst_193 = arith.constant dense<0.000000e+00> : vector<8x8xf32>
    %454 = tpu.matmul %452, %451, %cst_193 {dimension_numbers = #tpu.dot_dimension_numbers<[1], [1], [0], [0], [0, 0, 1, 0], [], []>} : vector<8x32xf32>, vector<8x32xf32>, vector<8x8xf32> -> vector<8x8xf32>
    %cst_194 = arith.constant dense<0xFF800000> : vector<8xf32>
    %455 = vector.multi_reduction <maximumf>, %454, %cst_194 [1] : vector<8x8xf32> to vector<8xf32>
    %456 = vector.shape_cast %455 : vector<8xf32> to vector<8x1xf32>
    %457 = vector.broadcast %456 : vector<8x1xf32> to vector<8x8xf32>
    %458 = arith.subf %454, %457 : vector<8x8xf32>
    %459 = math.exp %458 : vector<8x8xf32>
    %cst_195 = arith.constant dense<0.000000e+00> : vector<8xf32>
    %460 = vector.multi_reduction <add>, %459, %cst_195 [1] : vector<8x8xf32> to vector<8xf32>
    %461 = vector.shape_cast %460 : vector<8xf32> to vector<8x1xf32>
    %462 = tpu.reciprocal %461 : vector<8x1xf32> -> vector<8x1xf32>
    %463 = vector.broadcast %462 : vector<8x1xf32> to vector<8x8xf32>
    %464 = arith.mulf %459, %463 : vector<8x8xf32>
    %c208 = arith.constant 208 : index
    %c0_196 = arith.constant 0 : index
    %465 = vector.load %arg5[%c208, %c0_196] : memref<256x8xf32, #tpu.memory_space<vmem>>, vector<8x8xf32>
    tpu.vector_store %arg5[%c208, %c0_196], %464 {strides = array<i32>} : memref<256x8xf32, #tpu.memory_space<vmem>>, vector<8x8xf32>,
    %cst_197 = arith.constant dense<0.000000e+00> : vector<8x32xf32>
    %466 = tpu.matmul %464, %453, %cst_197 {dimension_numbers = #tpu.dot_dimension_numbers<[0], [0], [1], [1], [0, 1, 1, 1], [], []>} : vector<8x8xf32>, vector<8x32xf32>, vector<8x32xf32> -> vector<8x32xf32>
    %c208_198 = arith.constant 208 : index
    %c0_199 = arith.constant 0 : index
    %467 = vector.load %arg4[%c208_198, %c0_199] : memref<256x32xf32, #tpu.memory_space<vmem>>, vector<8x32xf32>
    tpu.vector_store %arg4[%c208_198, %c0_199], %466 {strides = array<i32>} : memref<256x32xf32, #tpu.memory_space<vmem>>, vector<8x32xf32>,
    %468 = vector.extract_strided_slice %3 {offsets = [216, 0], sizes = [8, 32], strides = [1, 1]} : vector<256x32xf32> to vector<8x32xf32>
    %469 = vector.extract_strided_slice %6 {offsets = [216, 0], sizes = [8, 32], strides = [1, 1]} : vector<256x32xf32> to vector<8x32xf32>
    %470 = vector.extract_strided_slice %8 {offsets = [216, 0], sizes = [8, 32], strides = [1, 1]} : vector<256x32xf32> to vector<8x32xf32>
    %cst_200 = arith.constant dense<0.000000e+00> : vector<8x8xf32>
    %471 = tpu.matmul %469, %468, %cst_200 {dimension_numbers = #tpu.dot_dimension_numbers<[1], [1], [0], [0], [0, 0, 1, 0], [], []>} : vector<8x32xf32>, vector<8x32xf32>, vector<8x8xf32> -> vector<8x8xf32>
    %cst_201 = arith.constant dense<0xFF800000> : vector<8xf32>
    %472 = vector.multi_reduction <maximumf>, %471, %cst_201 [1] : vector<8x8xf32> to vector<8xf32>
    %473 = vector.shape_cast %472 : vector<8xf32> to vector<8x1xf32>
    %474 = vector.broadcast %473 : vector<8x1xf32> to vector<8x8xf32>
    %475 = arith.subf %471, %474 : vector<8x8xf32>
    %476 = math.exp %475 : vector<8x8xf32>
    %cst_202 = arith.constant dense<0.000000e+00> : vector<8xf32>
    %477 = vector.multi_reduction <add>, %476, %cst_202 [1] : vector<8x8xf32> to vector<8xf32>
    %478 = vector.shape_cast %477 : vector<8xf32> to vector<8x1xf32>
    %479 = tpu.reciprocal %478 : vector<8x1xf32> -> vector<8x1xf32>
    %480 = vector.broadcast %479 : vector<8x1xf32> to vector<8x8xf32>
    %481 = arith.mulf %476, %480 : vector<8x8xf32>
    %c216 = arith.constant 216 : index
    %c0_203 = arith.constant 0 : index
    %482 = vector.load %arg5[%c216, %c0_203] : memref<256x8xf32, #tpu.memory_space<vmem>>, vector<8x8xf32>
    tpu.vector_store %arg5[%c216, %c0_203], %481 {strides = array<i32>} : memref<256x8xf32, #tpu.memory_space<vmem>>, vector<8x8xf32>,
    %cst_204 = arith.constant dense<0.000000e+00> : vector<8x32xf32>
    %483 = tpu.matmul %481, %470, %cst_204 {dimension_numbers = #tpu.dot_dimension_numbers<[0], [0], [1], [1], [0, 1, 1, 1], [], []>} : vector<8x8xf32>, vector<8x32xf32>, vector<8x32xf32> -> vector<8x32xf32>
    %c216_205 = arith.constant 216 : index
    %c0_206 = arith.constant 0 : index
    %484 = vector.load %arg4[%c216_205, %c0_206] : memref<256x32xf32, #tpu.memory_space<vmem>>, vector<8x32xf32>
    tpu.vector_store %arg4[%c216_205, %c0_206], %483 {strides = array<i32>} : memref<256x32xf32, #tpu.memory_space<vmem>>, vector<8x32xf32>,
    %485 = vector.extract_strided_slice %3 {offsets = [224, 0], sizes = [8, 32], strides = [1, 1]} : vector<256x32xf32> to vector<8x32xf32>
    %486 = vector.extract_strided_slice %6 {offsets = [224, 0], sizes = [8, 32], strides = [1, 1]} : vector<256x32xf32> to vector<8x32xf32>
    %487 = vector.extract_strided_slice %8 {offsets = [224, 0], sizes = [8, 32], strides = [1, 1]} : vector<256x32xf32> to vector<8x32xf32>
    %cst_207 = arith.constant dense<0.000000e+00> : vector<8x8xf32>
    %488 = tpu.matmul %486, %485, %cst_207 {dimension_numbers = #tpu.dot_dimension_numbers<[1], [1], [0], [0], [0, 0, 1, 0], [], []>} : vector<8x32xf32>, vector<8x32xf32>, vector<8x8xf32> -> vector<8x8xf32>
    %cst_208 = arith.constant dense<0xFF800000> : vector<8xf32>
    %489 = vector.multi_reduction <maximumf>, %488, %cst_208 [1] : vector<8x8xf32> to vector<8xf32>
    %490 = vector.shape_cast %489 : vector<8xf32> to vector<8x1xf32>
    %491 = vector.broadcast %490 : vector<8x1xf32> to vector<8x8xf32>
    %492 = arith.subf %488, %491 : vector<8x8xf32>
    %493 = math.exp %492 : vector<8x8xf32>
    %cst_209 = arith.constant dense<0.000000e+00> : vector<8xf32>
    %494 = vector.multi_reduction <add>, %493, %cst_209 [1] : vector<8x8xf32> to vector<8xf32>
    %495 = vector.shape_cast %494 : vector<8xf32> to vector<8x1xf32>
    %496 = tpu.reciprocal %495 : vector<8x1xf32> -> vector<8x1xf32>
    %497 = vector.broadcast %496 : vector<8x1xf32> to vector<8x8xf32>
    %498 = arith.mulf %493, %497 : vector<8x8xf32>
    %c224 = arith.constant 224 : index
    %c0_210 = arith.constant 0 : index
    %499 = vector.load %arg5[%c224, %c0_210] : memref<256x8xf32, #tpu.memory_space<vmem>>, vector<8x8xf32>
    tpu.vector_store %arg5[%c224, %c0_210], %498 {strides = array<i32>} : memref<256x8xf32, #tpu.memory_space<vmem>>, vector<8x8xf32>,
    %cst_211 = arith.constant dense<0.000000e+00> : vector<8x32xf32>
    %500 = tpu.matmul %498, %487, %cst_211 {dimension_numbers = #tpu.dot_dimension_numbers<[0], [0], [1], [1], [0, 1, 1, 1], [], []>} : vector<8x8xf32>, vector<8x32xf32>, vector<8x32xf32> -> vector<8x32xf32>
    %c224_212 = arith.constant 224 : index
    %c0_213 = arith.constant 0 : index
    %501 = vector.load %arg4[%c224_212, %c0_213] : memref<256x32xf32, #tpu.memory_space<vmem>>, vector<8x32xf32>
    tpu.vector_store %arg4[%c224_212, %c0_213], %500 {strides = array<i32>} : memref<256x32xf32, #tpu.memory_space<vmem>>, vector<8x32xf32>,
    %502 = vector.extract_strided_slice %3 {offsets = [232, 0], sizes = [8, 32], strides = [1, 1]} : vector<256x32xf32> to vector<8x32xf32>
    %503 = vector.extract_strided_slice %6 {offsets = [232, 0], sizes = [8, 32], strides = [1, 1]} : vector<256x32xf32> to vector<8x32xf32>
    %504 = vector.extract_strided_slice %8 {offsets = [232, 0], sizes = [8, 32], strides = [1, 1]} : vector<256x32xf32> to vector<8x32xf32>
    %cst_214 = arith.constant dense<0.000000e+00> : vector<8x8xf32>
    %505 = tpu.matmul %503, %502, %cst_214 {dimension_numbers = #tpu.dot_dimension_numbers<[1], [1], [0], [0], [0, 0, 1, 0], [], []>} : vector<8x32xf32>, vector<8x32xf32>, vector<8x8xf32> -> vector<8x8xf32>
    %cst_215 = arith.constant dense<0xFF800000> : vector<8xf32>
    %506 = vector.multi_reduction <maximumf>, %505, %cst_215 [1] : vector<8x8xf32> to vector<8xf32>
    %507 = vector.shape_cast %506 : vector<8xf32> to vector<8x1xf32>
    %508 = vector.broadcast %507 : vector<8x1xf32> to vector<8x8xf32>
    %509 = arith.subf %505, %508 : vector<8x8xf32>
    %510 = math.exp %509 : vector<8x8xf32>
    %cst_216 = arith.constant dense<0.000000e+00> : vector<8xf32>
    %511 = vector.multi_reduction <add>, %510, %cst_216 [1] : vector<8x8xf32> to vector<8xf32>
    %512 = vector.shape_cast %511 : vector<8xf32> to vector<8x1xf32>
    %513 = tpu.reciprocal %512 : vector<8x1xf32> -> vector<8x1xf32>
    %514 = vector.broadcast %513 : vector<8x1xf32> to vector<8x8xf32>
    %515 = arith.mulf %510, %514 : vector<8x8xf32>
    %c232 = arith.constant 232 : index
    %c0_217 = arith.constant 0 : index
    %516 = vector.load %arg5[%c232, %c0_217] : memref<256x8xf32, #tpu.memory_space<vmem>>, vector<8x8xf32>
    tpu.vector_store %arg5[%c232, %c0_217], %515 {strides = array<i32>} : memref<256x8xf32, #tpu.memory_space<vmem>>, vector<8x8xf32>,
    %cst_218 = arith.constant dense<0.000000e+00> : vector<8x32xf32>
    %517 = tpu.matmul %515, %504, %cst_218 {dimension_numbers = #tpu.dot_dimension_numbers<[0], [0], [1], [1], [0, 1, 1, 1], [], []>} : vector<8x8xf32>, vector<8x32xf32>, vector<8x32xf32> -> vector<8x32xf32>
    %c232_219 = arith.constant 232 : index
    %c0_220 = arith.constant 0 : index
    %518 = vector.load %arg4[%c232_219, %c0_220] : memref<256x32xf32, #tpu.memory_space<vmem>>, vector<8x32xf32>
    tpu.vector_store %arg4[%c232_219, %c0_220], %517 {strides = array<i32>} : memref<256x32xf32, #tpu.memory_space<vmem>>, vector<8x32xf32>,
    %519 = vector.extract_strided_slice %3 {offsets = [240, 0], sizes = [8, 32], strides = [1, 1]} : vector<256x32xf32> to vector<8x32xf32>
    %520 = vector.extract_strided_slice %6 {offsets = [240, 0], sizes = [8, 32], strides = [1, 1]} : vector<256x32xf32> to vector<8x32xf32>
    %521 = vector.extract_strided_slice %8 {offsets = [240, 0], sizes = [8, 32], strides = [1, 1]} : vector<256x32xf32> to vector<8x32xf32>
    %cst_221 = arith.constant dense<0.000000e+00> : vector<8x8xf32>
    %522 = tpu.matmul %520, %519, %cst_221 {dimension_numbers = #tpu.dot_dimension_numbers<[1], [1], [0], [0], [0, 0, 1, 0], [], []>} : vector<8x32xf32>, vector<8x32xf32>, vector<8x8xf32> -> vector<8x8xf32>
    %cst_222 = arith.constant dense<0xFF800000> : vector<8xf32>
    %523 = vector.multi_reduction <maximumf>, %522, %cst_222 [1] : vector<8x8xf32> to vector<8xf32>
    %524 = vector.shape_cast %523 : vector<8xf32> to vector<8x1xf32>
    %525 = vector.broadcast %524 : vector<8x1xf32> to vector<8x8xf32>
    %526 = arith.subf %522, %525 : vector<8x8xf32>
    %527 = math.exp %526 : vector<8x8xf32>
    %cst_223 = arith.constant dense<0.000000e+00> : vector<8xf32>
    %528 = vector.multi_reduction <add>, %527, %cst_223 [1] : vector<8x8xf32> to vector<8xf32>
    %529 = vector.shape_cast %528 : vector<8xf32> to vector<8x1xf32>
    %530 = tpu.reciprocal %529 : vector<8x1xf32> -> vector<8x1xf32>
    %531 = vector.broadcast %530 : vector<8x1xf32> to vector<8x8xf32>
    %532 = arith.mulf %527, %531 : vector<8x8xf32>
    %c240 = arith.constant 240 : index
    %c0_224 = arith.constant 0 : index
    %533 = vector.load %arg5[%c240, %c0_224] : memref<256x8xf32, #tpu.memory_space<vmem>>, vector<8x8xf32>
    tpu.vector_store %arg5[%c240, %c0_224], %532 {strides = array<i32>} : memref<256x8xf32, #tpu.memory_space<vmem>>, vector<8x8xf32>,
    %cst_225 = arith.constant dense<0.000000e+00> : vector<8x32xf32>
    %534 = tpu.matmul %532, %521, %cst_225 {dimension_numbers = #tpu.dot_dimension_numbers<[0], [0], [1], [1], [0, 1, 1, 1], [], []>} : vector<8x8xf32>, vector<8x32xf32>, vector<8x32xf32> -> vector<8x32xf32>
    %c240_226 = arith.constant 240 : index
    %c0_227 = arith.constant 0 : index
    %535 = vector.load %arg4[%c240_226, %c0_227] : memref<256x32xf32, #tpu.memory_space<vmem>>, vector<8x32xf32>
    tpu.vector_store %arg4[%c240_226, %c0_227], %534 {strides = array<i32>} : memref<256x32xf32, #tpu.memory_space<vmem>>, vector<8x32xf32>,
    %536 = vector.extract_strided_slice %3 {offsets = [248, 0], sizes = [8, 32], strides = [1, 1]} : vector<256x32xf32> to vector<8x32xf32>
    %537 = vector.extract_strided_slice %6 {offsets = [248, 0], sizes = [8, 32], strides = [1, 1]} : vector<256x32xf32> to vector<8x32xf32>
    %538 = vector.extract_strided_slice %8 {offsets = [248, 0], sizes = [8, 32], strides = [1, 1]} : vector<256x32xf32> to vector<8x32xf32>
    %cst_228 = arith.constant dense<0.000000e+00> : vector<8x8xf32>
    %539 = tpu.matmul %537, %536, %cst_228 {dimension_numbers = #tpu.dot_dimension_numbers<[1], [1], [0], [0], [0, 0, 1, 0], [], []>} : vector<8x32xf32>, vector<8x32xf32>, vector<8x8xf32> -> vector<8x8xf32>
    %cst_229 = arith.constant dense<0xFF800000> : vector<8xf32>
    %540 = vector.multi_reduction <maximumf>, %539, %cst_229 [1] : vector<8x8xf32> to vector<8xf32>
    %541 = vector.shape_cast %540 : vector<8xf32> to vector<8x1xf32>
    %542 = vector.broadcast %541 : vector<8x1xf32> to vector<8x8xf32>
    %543 = arith.subf %539, %542 : vector<8x8xf32>
    %544 = math.exp %543 : vector<8x8xf32>
    %cst_230 = arith.constant dense<0.000000e+00> : vector<8xf32>
    %545 = vector.multi_reduction <add>, %544, %cst_230 [1] : vector<8x8xf32> to vector<8xf32>
    %546 = vector.shape_cast %545 : vector<8xf32> to vector<8x1xf32>
    %547 = tpu.reciprocal %546 : vector<8x1xf32> -> vector<8x1xf32>
    %548 = vector.broadcast %547 : vector<8x1xf32> to vector<8x8xf32>
    %549 = arith.mulf %544, %548 : vector<8x8xf32>
    %c248 = arith.constant 248 : index
    %c0_231 = arith.constant 0 : index
    %550 = vector.load %arg5[%c248, %c0_231] : memref<256x8xf32, #tpu.memory_space<vmem>>, vector<8x8xf32>
    tpu.vector_store %arg5[%c248, %c0_231], %549 {strides = array<i32>} : memref<256x8xf32, #tpu.memory_space<vmem>>, vector<8x8xf32>,
    %cst_232 = arith.constant dense<0.000000e+00> : vector<8x32xf32>
    %551 = tpu.matmul %549, %538, %cst_232 {dimension_numbers = #tpu.dot_dimension_numbers<[0], [0], [1], [1], [0, 1, 1, 1], [], []>} : vector<8x8xf32>, vector<8x32xf32>, vector<8x32xf32> -> vector<8x32xf32>
    %c248_233 = arith.constant 248 : index
    %c0_234 = arith.constant 0 : index
    %552 = vector.load %arg4[%c248_233, %c0_234] : memref<256x32xf32, #tpu.memory_space<vmem>>, vector<8x32xf32>
    tpu.vector_store %arg4[%c248_233, %c0_234], %551 {strides = array<i32>} : memref<256x32xf32, #tpu.memory_space<vmem>>, vector<8x32xf32>,
    return
  }
  func.func @transform_0(%arg0: i32) -> (i32, i32) {
    %c0_i32 = arith.constant 0 : i32
    %c0_i32_0 = arith.constant 0 : i32
    return %arg0, %c0_i32 : i32, i32
  }
  func.func @transform_1(%arg0: i32) -> (i32, i32, i32) {
    %c0_i32 = arith.constant 0 : i32
    %c0_i32_0 = arith.constant 0 : i32
    %c0_i32_1 = arith.constant 0 : i32
    %c0_i32_2 = arith.constant 0 : i32
    return %c0_i32, %c0_i32_0, %c0_i32_1 : i32, i32, i32
  }
  func.func @transform_2(%arg0: i32) -> (i32, i32) {
    %c0_i32 = arith.constant 0 : i32
    %c0_i32_0 = arith.constant 0 : i32
    %c0_i32_1 = arith.constant 0 : i32
    return %c0_i32, %c0_i32_0 : i32, i32
  }
  func.func @transform_3(%arg0: i32) -> (i32, i32) {
    %c0_i32 = arith.constant 0 : i32
    %c0_i32_0 = arith.constant 0 : i32
    return %arg0, %c0_i32 : i32, i32
  }
  func.func @transform_4(%arg0: i32) -> (i32, i32) {
    %c0_i32 = arith.constant 0 : i32
    %c0_i32_0 = arith.constant 0 : i32
    return %arg0, %c0_i32 : i32, i32
  }
}

</mosaic_0001>

<bundles_post_ra>
// kernel: tpu_custom_call.1
= control target key start
LH: loop header
LB: loop body
LE: loop exit
PB: predicated region body
PF: predicated region fallthrough
CT: control target
= control target key end

     0   :  { %s8437_s15 = smov 0   ;;  %s9556_s0 = inlined_call_operand.vmem [shape: f32[512,32], index: 0, kind: input, shape index: {}]   ;;  %s9557_s1 = inlined_call_operand.vmem [shape: f32[2,32,32], index: 1, kind: input, shape index: {}]   ;;  %s9558_s2 = inlined_call_operand.vmem [shape: f32[32,32], index: 2, kind: input, shape index: {}]   ;;  %s9559_s3 = inlined_call_operand.vmem [shape: f32[512,32], index: 3, kind: output, shape index: {0}]   ;;  %s9560_s4 = inlined_call_operand.vmem [shape: f32[512,8], index: 4, kind: output, shape index: {1}]  }
   0x1 LB: > { %s7331_s16 = sadd.s32 4294967295, %s8408_s15   ;;  %p7335_p0 = scmp.ge.s32.totalorder %s8408_s15, 1  ;;  %s8408_s15 = sphi %s8437_s15, %s15_s15  }
   0x2   : > { %p166_p1 = scmp.lt.s32.totalorder %s8408_s15, 3 }
   0x4   : > { %p167_p2 = pnand %p7335_p0, %p166_p1 }
   0x6   : > { %170 = sbr.rel (%p167_p2) target bundleno = 6559 (0x199f), region = 32 }
   0xb   : > { %v250_v0 = vld [vmem:[%s9557_s1 + $0x18] sm:$0xff]  ;;  %v249_v1 = vld [vmem:[%s9557_s1 + $0x10] sm:$0xff]  ;;  %s7336_s23 = sshll.u32 %s7331_s16, 5  ;;  %v248_v4 = vld [vmem:[%s9557_s1 + $0x8] sm:$0xff]  ;;  %vm251_vm0 = vcmask 261120   ;;  %v9561_v40 = vmov 0.0  }
   0xc   : > { %v7377_v2 = vld [vmem:[%s9557_s1 + $0x38] sm:$0xff]  ;;  %7776 = vmatprep.subr.mxu0 %v250_v0  ;;  %v7376_v3 = vld [vmem:[%s9557_s1 + $0x30] sm:$0xff]  ;;  %p198_p3 = scmp.lt.s32.totalorder %s7336_s23, 63  ;;  %v7375_v5 = vld [vmem:[%s9557_s1 + $0x28] sm:$0xff]  ;;  %vm8411_vm1 = vmmov 0   ;;  %vm1108_vm2 = vcmask 64512  }
   0xd   : > { %7832 = vmatprep.subr.mxu1 %v7377_v2  ;;  %7777 = vmatpush3.msra.mxu0 %v250_v0  ;;  %v247_v6 = vld [vmem:[%s9557_s1] sm:$0xff]  ;;  %v806_v41 = vld [vmem:[%s9558_s2 + $0x18] sm:$0xff]  ;;  %v805_v42 = vld [vmem:[%s9558_s2 + $0x10] sm:$0xff] }
   0xe   : > { %7833 = vmatpush3.msra.mxu1 %v7377_v2  ;;  %7778 = vmatprep.subr.mxu0 %v249_v1  ;;  %s9597_s23 = smov (!%p198_p3, %s7336_s23), 63  ;;  %v7374_v7 = vld [vmem:[%s9557_s1 + $0x20] sm:$0xff]  ;;  %v804_v43 = vld [vmem:[%s9558_s2 + $0x8] sm:$0xff] }
   0xf   : > { %7834 = vmatprep.subr.mxu1 %v7376_v3  ;;  %7779 = vmatpush3.msra.mxu0 %v249_v1  ;;  %s8469_s8 = sshll.u32 %s9597_s23, 3  ;;  %v803_v44 = vld [vmem:[%s9558_s2] sm:$0xff] }
  0x10   : > { %7835 = vmatpush3.msra.mxu1 %v7376_v3  ;;  %7780 = vmatprep.subr.mxu0 %v248_v4  ;;  %s8475_s11 = scalar_lea.vmem %s9556_s0, %s8469_s8  ;;  %s9025_s23 = scalar_lea.vmem %s9560_s4, %s8469_s8 }
  0x11   : > { %7836 = vmatprep.subr.mxu1 %v7375_v5  ;;  %7781 = vmatpush3.msra.mxu0 %v248_v4  ;;  %v8478_v8 = vld [vmem:[%s8475_s11] sm:$0xff]  ;;  %v8481_v9 = vld [vmem:[%s8475_s11 + $0x8] sm:$0xff]  ;;  %v8484_v10 = vld [vmem:[%s8475_s11 + $0x10] sm:$0xff]  ;;  %s9045_s26 = scalar_lea.vmem %s9559_s3, %s8469_s8 }
  0x12   : > { %7837 = vmatpush3.msra.mxu1 %v7375_v5  ;;  %7782 = vmatprep.subr.mxu0 %v247_v6  ;;  %v8493_v11 = vld [vmem:[%s8475_s11 + $0x18] sm:$0xff]  ;;  %v8500_v12 = vld [vmem:[%s8475_s11 + $0x20] sm:$0xff]  ;;  %v8507_v13 = vld [vmem:[%s8475_s11 + $0x28] sm:$0xff] }
  0x13   : > { %7838 = vmatprep.subr.mxu1 %v7374_v7  ;;  %7783 = vmatpush3.msra.mxu0 %v247_v6  ;;  %v8514_v14 = vld [vmem:[%s8475_s11 + $0x30] sm:$0xff]  ;;  %v8521_v15 = vld [vmem:[%s8475_s11 + $0x38] sm:$0xff]  ;;  %v8528_v16 = vld [vmem:[%s8475_s11 + $0x40] sm:$0xff] }
  0x14   : > { %7784 = vmatprep.mubr.msk.f32.mxu0 %vm251_vm0, %v8478_v8  ;;  %7839 = vmatpush3.msra.mxu1 %v7374_v7  ;;  %v8535_v17 = vld [vmem:[%s8475_s11 + $0x48] sm:$0xff]  ;;  %v8542_v18 = vld [vmem:[%s8475_s11 + $0x50] sm:$0xff]  ;;  %v8549_v19 = vld [vmem:[%s8475_s11 + $0x58] sm:$0xff] }
  0x15   : > { %7785 = vmatmul.mubr.msk.f32.vlgmr.msra.gmra.mxu0 %vm251_vm0, %v8481_v9  ;;  %7840 = vmatprep.mubr.msk.f32.mxu1 %vm251_vm0, %v8478_v8  ;;  %v8556_v20 = vld [vmem:[%s8475_s11 + $0x60] sm:$0xff]  ;;  %v8563_v21 = vld [vmem:[%s8475_s11 + $0x68] sm:$0xff]  ;;  %v8570_v22 = vld [vmem:[%s8475_s11 + $0x70] sm:$0xff] }
  0x16   : > { %7787 = vmatprep.mubr.msk.f32.mxu0 %vm251_vm0, %v8484_v10  ;;  %7841 = vmatmul.mubr.msk.f32.vlgmr.msra.gmra.mxu1 %vm251_vm0, %v8481_v9  ;;  %v8577_v23 = vld [vmem:[%s8475_s11 + $0x78] sm:$0xff]  ;;  %v8584_v24 = vld [vmem:[%s8475_s11 + $0x80] sm:$0xff]  ;;  %v8591_v25 = vld [vmem:[%s8475_s11 + $0x88] sm:$0xff] }
  0x17   : > { %7843 = vmatprep.mubr.msk.f32.mxu1 %vm251_vm0, %v8484_v10  ;;  %v8598_v26 = vld [vmem:[%s8475_s11 + $0x90] sm:$0xff]  ;;  %v8605_v27 = vld [vmem:[%s8475_s11 + $0x98] sm:$0xff]  ;;  %v8612_v28 = vld [vmem:[%s8475_s11 + $0xa0] sm:$0xff]  ;;  %7944 = vmatprep.subr.mxu1 %v9561_v40 }
  0x18   : > { %v8619_v29 = vld [vmem:[%s8475_s11 + $0xa8] sm:$0xff]  ;;  %v8626_v30 = vld [vmem:[%s8475_s11 + $0xb0] sm:$0xff]  ;;  %v8633_v31 = vld [vmem:[%s8475_s11 + $0xb8] sm:$0xff]  ;;  %7888 = vmatprep.subr.mxu0 %v806_v41 }
  0x19   : > { %7788 = vmatmul.mubr.msk.f32.gmra.mxu0 %vm251_vm0, %v8493_v11  ;;  %v8640_v32 = vld [vmem:[%s8475_s11 + $0xc0] sm:$0xff]  ;;  %v8647_v33 = vld [vmem:[%s8475_s11 + $0xc8] sm:$0xff]  ;;  %v8654_v34 = vld [vmem:[%s8475_s11 + $0xd0] sm:$0xff] }
  0x1a   : > { %7790 = vmatprep.mubr.msk.f32.mxu0 %vm251_vm0, %v8500_v12  ;;  %7844 = vmatmul.mubr.msk.f32.gmra.mxu1 %vm251_vm0, %v8493_v11  ;;  %v242_v35 = vld [vmem:[%s8475_s11 + $0xd8] sm:$0xff]  ;;  %v243_v36 = vld [vmem:[%s8475_s11 + $0xe0] sm:$0xff]  ;;  %v244_v37 = vld [vmem:[%s8475_s11 + $0xe8] sm:$0xff] }
  0x1b   : > { %7846 = vmatprep.mubr.msk.f32.mxu1 %vm251_vm0, %v8500_v12  ;;  %v245_v38 = vld [vmem:[%s8475_s11 + $0xf0] sm:$0xff]  ;;  %v246_v39 = vld [vmem:[%s8475_s11 + $0xf8] sm:$0xff]  ;;  %7889 = vmatpush3.msra.mxu0 %v806_v41 }
  0x1c   : > { %7890 = vmatprep.subr.mxu0 %v805_v42 }
  0x1d   : > { %7791 = vmatmul.mubr.msk.f32.gmra.mxu0 %vm251_vm0, %v8507_v13 }
  0x1e   : > { %7793 = vmatprep.mubr.msk.f32.mxu0 %vm251_vm0, %v8514_v14  ;;  %7847 = vmatmul.mubr.msk.f32.gmra.mxu1 %vm251_vm0, %v8507_v13 }
  0x1f   : > { %7849 = vmatprep.mubr.msk.f32.mxu1 %vm251_vm0, %v8514_v14  ;;  %7891 = vmatpush3.msra.mxu0 %v805_v42 }
  0x20   : > { %7892 = vmatprep.subr.mxu0 %v804_v43 }
  0x21   : > { %7794 = vmatmul.mubr.msk.f32.gmra.mxu0 %vm251_vm0, %v8521_v15 }
  0x22   : > { %7796 = vmatprep.mubr.msk.f32.mxu0 %vm251_vm0, %v8528_v16  ;;  %7850 = vmatmul.mubr.msk.f32.gmra.mxu1 %vm251_vm0, %v8521_v15 }
  0x23   : > { %7852 = vmatprep.mubr.msk.f32.mxu1 %vm251_vm0, %v8528_v16  ;;  %7893 = vmatpush3.msra.mxu0 %v804_v43 }
  0x24   : > { %7894 = vmatprep.subr.mxu0 %v803_v44 }
  0x25   : > { %7797 = vmatmul.mubr.msk.f32.gmra.mxu0 %vm251_vm0, %v8535_v17 }
  0x26   : > { %7799 = vmatprep.mubr.msk.f32.mxu0 %vm251_vm0, %v8542_v18  ;;  %7853 = vmatmul.mubr.msk.f32.gmra.mxu1 %vm251_vm0, %v8535_v17 }
  0x27   : > { %7855 = vmatprep.mubr.msk.f32.mxu1 %vm251_vm0, %v8542_v18  ;;  %7895 = vmatpush3.msra.mxu0 %v803_v44 }
  0x28   : > { %8024 = vmatprep.subr.mxu0 %v9561_v40 }
  0x29   : > { %7800 = vmatmul.mubr.msk.f32.gmra.mxu0 %vm251_vm0, %v8549_v19 }
  0x2a   : > { %7802 = vmatprep.mubr.msk.f32.mxu0 %vm251_vm0, %v8556_v20  ;;  %7856 = vmatmul.mubr.msk.f32.gmra.mxu1 %vm251_vm0, %v8549_v19 }
  0x2b   : > { %7858 = vmatprep.mubr.msk.f32.mxu1 %vm251_vm0, %v8556_v20 }
  0x2d   : > { %7803 = vmatmul.mubr.msk.f32.gmra.mxu0 %vm251_vm0, %v8563_v21 }
  0x2e   : > { %7805 = vmatprep.mubr.msk.f32.mxu0 %vm251_vm0, %v8570_v22  ;;  %7859 = vmatmul.mubr.msk.f32.gmra.mxu1 %vm251_vm0, %v8563_v21 }
  0x2f   : > { %7861 = vmatprep.mubr.msk.f32.mxu1 %vm251_vm0, %v8570_v22 }
  0x31   : > { %7806 = vmatmul.mubr.msk.f32.gmra.mxu0 %vm251_vm0, %v8577_v23 }
  0x32   : > { %7808 = vmatprep.mubr.msk.f32.mxu0 %vm251_vm0, %v8584_v24  ;;  %7862 = vmatmul.mubr.msk.f32.gmra.mxu1 %vm251_vm0, %v8577_v23 }
  0x33   : > { %7864 = vmatprep.mubr.msk.f32.mxu1 %vm251_vm0, %v8584_v24 }
  0x35   : > { %7809 = vmatmul.mubr.msk.f32.gmra.mxu0 %vm251_vm0, %v8591_v25 }
  0x36   : > { %7811 = vmatprep.mubr.msk.f32.mxu0 %vm251_vm0, %v8598_v26  ;;  %7865 = vmatmul.mubr.msk.f32.gmra.mxu1 %vm251_vm0, %v8591_v25 }
  0x37   : > { %7867 = vmatprep.mubr.msk.f32.mxu1 %vm251_vm0, %v8598_v26 }
  0x39   : > { %7812 = vmatmul.mubr.msk.f32.gmra.mxu0 %vm251_vm0, %v8605_v27 }
  0x3a   : > { %7814 = vmatprep.mubr.msk.f32.mxu0 %vm251_vm0, %v8612_v28  ;;  %7868 = vmatmul.mubr.msk.f32.gmra.mxu1 %vm251_vm0, %v8605_v27 }
  0x3b   : > { %7870 = vmatprep.mubr.msk.f32.mxu1 %vm251_vm0, %v8612_v28 }
  0x3d   : > { %7815 = vmatmul.mubr.msk.f32.gmra.mxu0 %vm251_vm0, %v8619_v29 }
  0x3e   : > { %7817 = vmatprep.mubr.msk.f32.mxu0 %vm251_vm0, %v8626_v30  ;;  %7871 = vmatmul.mubr.msk.f32.gmra.mxu1 %vm251_vm0, %v8619_v29 }
  0x3f   : > { %7873 = vmatprep.mubr.msk.f32.mxu1 %vm251_vm0, %v8626_v30 }
  0x41   : > { %7818 = vmatmul.mubr.msk.f32.gmra.mxu0 %vm251_vm0, %v8633_v31 }
  0x42   : > { %7820 = vmatprep.mubr.msk.f32.mxu0 %vm251_vm0, %v8640_v32  ;;  %7874 = vmatmul.mubr.msk.f32.gmra.mxu1 %vm251_vm0, %v8633_v31 }
  0x43   : > { %7876 = vmatprep.mubr.msk.f32.mxu1 %vm251_vm0, %v8640_v32 }
  0x45   : > { %7821 = vmatmul.mubr.msk.f32.gmra.mxu0 %vm251_vm0, %v8647_v33 }
  0x46   : > { %7823 = vmatprep.mubr.msk.f32.mxu0 %vm251_vm0, %v8654_v34  ;;  %7877 = vmatmul.mubr.msk.f32.gmra.mxu1 %vm251_vm0, %v8647_v33 }
  0x47   : > { %7879 = vmatprep.mubr.msk.f32.mxu1 %vm251_vm0, %v8654_v34 }
  0x49   : > { %7824 = vmatmul.mubr.msk.f32.gmra.mxu0 %vm251_vm0, %v242_v35 }
  0x4a   : > { %7826 = vmatprep.mubr.msk.f32.mxu0 %vm251_vm0, %v243_v36  ;;  %7880 = vmatmul.mubr.msk.f32.gmra.mxu1 %vm251_vm0, %v242_v35 }
  0x4b   : > { %7882 = vmatprep.mubr.msk.f32.mxu1 %vm251_vm0, %v243_v36 }
  0x4d   : > { %7827 = vmatmul.mubr.msk.f32.gmra.mxu0 %vm251_vm0, %v244_v37 }
  0x4e   : > { %7829 = vmatprep.mubr.msk.f32.mxu0 %vm251_vm0, %v245_v38  ;;  %7883 = vmatmul.mubr.msk.f32.gmra.mxu1 %vm251_vm0, %v244_v37 }
  0x4f   : > { %7885 = vmatprep.mubr.msk.f32.mxu1 %vm251_vm0, %v245_v38 }
  0x51   : > { %7830 = vmatmul.mubr.msk.f32.gmra.mxu0 %vm251_vm0, %v246_v39 }
  0x52   : > { %7896 = vmatprep.mubr.msk.f32.mxu0 %vm251_vm0, %v8478_v8  ;;  %7886 = vmatmul.mubr.msk.f32.gmra.mxu1 %vm251_vm0, %v246_v39 }
  0x53   : > { %7946 = vmatprep.mubr.msk.f32.mxu1 %vm8411_vm1, %v9561_v40 }
  0x55   : > { %7897 = vmatmul.mubr.msk.f32.vlgmr.msra.gmra.mxu0 %vm251_vm0, %v8481_v9 }
  0x56   : > { %7899 = vmatprep.mubr.msk.f32.mxu0 %vm251_vm0, %v8484_v10 }
  0x59   : > { %7900 = vmatmul.mubr.msk.f32.gmra.mxu0 %vm251_vm0, %v8493_v11 }
  0x5a   : > { %7902 = vmatprep.mubr.msk.f32.mxu0 %vm251_vm0, %v8500_v12 }
  0x5d   : > { %7903 = vmatmul.mubr.msk.f32.gmra.mxu0 %vm251_vm0, %v8507_v13 }
  0x5e   : > { %7905 = vmatprep.mubr.msk.f32.mxu0 %vm251_vm0, %v8514_v14 }
  0x61   : > { %7906 = vmatmul.mubr.msk.f32.gmra.mxu0 %vm251_vm0, %v8521_v15 }
  0x62   : > { %7908 = vmatprep.mubr.msk.f32.mxu0 %vm251_vm0, %v8528_v16 }
  0x65   : > { %7909 = vmatmul.mubr.msk.f32.gmra.mxu0 %vm251_vm0, %v8535_v17 }
  0x66   : > { %7911 = vmatprep.mubr.msk.f32.mxu0 %vm251_vm0, %v8542_v18 }
  0x69   : > { %7912 = vmatmul.mubr.msk.f32.gmra.mxu0 %vm251_vm0, %v8549_v19 }
  0x6a   : > { %7914 = vmatprep.mubr.msk.f32.mxu0 %vm251_vm0, %v8556_v20 }
  0x6d   : > { %7915 = vmatmul.mubr.msk.f32.gmra.mxu0 %vm251_vm0, %v8563_v21 }
  0x6e   : > { %7917 = vmatprep.mubr.msk.f32.mxu0 %vm251_vm0, %v8570_v22 }
  0x71   : > { %7918 = vmatmul.mubr.msk.f32.gmra.mxu0 %vm251_vm0, %v8577_v23 }
  0x72   : > { %7920 = vmatprep.mubr.msk.f32.mxu0 %vm251_vm0, %v8584_v24 }
  0x75   : > { %7921 = vmatmul.mubr.msk.f32.gmra.mxu0 %vm251_vm0, %v8591_v25 }
  0x76   : > { %7923 = vmatprep.mubr.msk.f32.mxu0 %vm251_vm0, %v8598_v26 }
  0x79   : > { %7924 = vmatmul.mubr.msk.f32.gmra.mxu0 %vm251_vm0, %v8605_v27 }
  0x7a   : > { %7926 = vmatprep.mubr.msk.f32.mxu0 %vm251_vm0, %v8612_v28 }
  0x7d   : > { %7927 = vmatmul.mubr.msk.f32.gmra.mxu0 %vm251_vm0, %v8619_v29 }
  0x7e   : > { %7929 = vmatprep.mubr.msk.f32.mxu0 %vm251_vm0, %v8626_v30 }
  0x81   : > { %7930 = vmatmul.mubr.msk.f32.gmra.mxu0 %vm251_vm0, %v8633_v31 }
  0x82   : > { %7932 = vmatprep.mubr.msk.f32.mxu0 %vm251_vm0, %v8640_v32 }
  0x85   : > { %7933 = vmatmul.mubr.msk.f32.gmra.mxu0 %vm251_vm0, %v8647_v33 }
  0x86   : > { %7935 = vmatprep.mubr.msk.f32.mxu0 %vm251_vm0, %v8654_v34 }
  0x89   : > { %7936 = vmatmul.mubr.msk.f32.gmra.mxu0 %vm251_vm0, %v242_v35 }
  0x8a   : > { %7938 = vmatprep.mubr.msk.f32.mxu0 %vm251_vm0, %v243_v36 }
  0x8d   : > { %7939 = vmatmul.mubr.msk.f32.gmra.mxu0 %vm251_vm0, %v244_v37 }
  0x8e   : > { %7941 = vmatprep.mubr.msk.f32.mxu0 %vm251_vm0, %v245_v38 }
  0x91   : > { %7942 = vmatmul.mubr.msk.f32.gmra.mxu0 %vm251_vm0, %v246_v39 }
  0x92   : > { %8026 = vmatprep.mubr.msk.f32.mxu0 %vm8411_vm1, %v9561_v40 }
  0xd5   : > { %v8758_v45 = vpop.f32.mrf.mxu0 }
  0xd6   : > { %v8760_v47 = vpop.f32.mrf.mxu1 }
  0xd7   : > { %v414_v46 = vpop.f32.mrf.mxu0 }
  0xd8   : > { %7945 = vmatpush3.xpose.msk.msra.mxu1 %vm251_vm0, %v414_v46  ;;  %v644_v48 = vpop.f32.mrf.mxu1 }
  0xd9   : > { %v8763_v49 = vpop.f32.mrf.mxu0  ;;  %7949 = vmatprep.subr.mxu1 %v9561_v40 }
  0xda   : > { %v8767_v50 = vpop.f32.mrf.mxu1 }
  0xdb   : > { %7947 = vmatmul.mubr.msk.f32.vlgmr.msra.gmra.mxu1 %vm251_vm0, %v644_v48  ;;  %v8769_v51 = vpop.f32.mrf.mxu0 }
  0xdc   : > { %7951 = vmatprep.mubr.msk.f32.mxu1 %vm8411_vm1, %v9561_v40  ;;  %v8773_v52 = vpop.f32.mrf.mxu1 }
  0xdd   : > { %v8775_v53 = vpop.f32.mrf.mxu0 }
  0xde   : > { %v8777_v54 = vpop.f32.mrf.mxu1 }
  0xdf   : > { %v8779_v55 = vpop.f32.mrf.mxu0 }
  0xe0   : > { %v8781_v56 = vpop.f32.mrf.mxu1 }
  0xe1   : > { %v8783_v57 = vpop.f32.mrf.mxu0 }
  0xe2   : > { %v8785_v58 = vpop.f32.mrf.mxu1 }
  0xe3   : > { %v8787_v59 = vpop.f32.mrf.mxu0 }
  0xe4   : > { %v8789_v60 = vpop.f32.mrf.mxu1 }
  0xe5   : > { %v7798_v61 = vpop.f32.mrf.mxu0 }
  0xe6   : > { %v7854_v62 = vpop.f32.mrf.mxu1 }
  0xe7   : > { %v454_v63 = vpop.f32.mrf.mxu0 }
  0xe8   : > { %8025 = vmatpush3.xpose.msk.msra.mxu0 %vm251_vm0, %v454_v63  ;;  %v684_v0 = vpop.f32.mrf.mxu1 }
  0xe9   : > { %8034 = vmatprep.subr.mxu0 %v9561_v40  ;;  %v7801_v1 = vpop.f32.mrf.mxu0 }
  0xea   : > { %v7857_v3 = vpop.f32.mrf.mxu1 }
  0xeb   : > { %8027 = vmatmul.mubr.msk.f32.vlgmr.msra.gmra.mxu0 %vm251_vm0, %v684_v0  ;;  %v464_v2 = vpop.f32.mrf.mxu0 }
  0xec   : > { %8035 = vmatpush3.xpose.msk.msra.mxu0 %vm251_vm0, %v7798_v61  ;;  %8036 = vmatprep.mubr.msk.f32.mxu0 %vm8411_vm1, %v9561_v40  ;;  %v694_v6 = vpop.f32.mrf.mxu1 }
  0xed   : > { %8044 = vmatprep.subr.mxu0 %v9561_v40  ;;  %v7804_v4 = vpop.f32.mrf.mxu0 }
  0xee   : > { %v7860_v9 = vpop.f32.mrf.mxu1 }
  0xef   : > { %8037 = vmatmul.mubr.msk.f32.vlgmr.msra.gmra.mxu0 %vm251_vm0, %v7854_v62  ;;  %v474_v5 = vpop.f32.mrf.mxu0 }
  0xf0   : > { %8045 = vmatpush3.xpose.msk.msra.mxu0 %vm251_vm0, %v464_v2  ;;  %8046 = vmatprep.mubr.msk.f32.mxu0 %vm8411_vm1, %v9561_v40  ;;  %v704_v11 = vpop.f32.mrf.mxu1 }
  0xf1   : > { %8054 = vmatprep.subr.mxu0 %v9561_v40  ;;  %v7807_v7 = vpop.f32.mrf.mxu0 }
  0xf2   : > { %v7863_v14 = vpop.f32.mrf.mxu1 }
  0xf3   : > { %8047 = vmatmul.mubr.msk.f32.vlgmr.msra.gmra.mxu0 %vm251_vm0, %v694_v6  ;;  %v484_v8 = vpop.f32.mrf.mxu0 }
  0xf4   : > { %8055 = vmatpush3.xpose.msk.msra.mxu0 %vm251_vm0, %v7801_v1  ;;  %8056 = vmatprep.mubr.msk.f32.mxu0 %vm8411_vm1, %v9561_v40  ;;  %v714_v16 = vpop.f32.mrf.mxu1 }
  0xf5   : > { %8064 = vmatprep.subr.mxu0 %v9561_v40  ;;  %v7810_v10 = vpop.f32.mrf.mxu0 }
  0xf6   : > { %v7866_v18 = vpop.f32.mrf.mxu1 }
  0xf7   : > { %8057 = vmatmul.mubr.msk.f32.vlgmr.msra.gmra.mxu0 %vm251_vm0, %v7857_v3  ;;  %v494_v12 = vpop.f32.mrf.mxu0 }
  0xf8   : > { %8065 = vmatpush3.xpose.msk.msra.mxu0 %vm251_vm0, %v474_v5  ;;  %8066 = vmatprep.mubr.msk.f32.mxu0 %vm8411_vm1, %v9561_v40  ;;  %v724_v21 = vpop.f32.mrf.mxu1 }
  0xf9   : > { %8074 = vmatprep.subr.mxu0 %v9561_v40  ;;  %v7813_v13 = vpop.f32.mrf.mxu0 }
  0xfa   : > { %v7869_v23 = vpop.f32.mrf.mxu1 }
  0xfb   : > { %8067 = vmatmul.mubr.msk.f32.vlgmr.msra.gmra.mxu0 %vm251_vm0, %v704_v11  ;;  %v504_v15 = vpop.f32.mrf.mxu0 }
  0xfc   : > { %8075 = vmatpush3.xpose.msk.msra.mxu0 %vm251_vm0, %v7804_v4  ;;  %8076 = vmatprep.mubr.msk.f32.mxu0 %vm8411_vm1, %v9561_v40  ;;  %v734_v25 = vpop.f32.mrf.mxu1 }
  0xfd   : > { %8084 = vmatprep.subr.mxu0 %v9561_v40  ;;  %v7816_v17 = vpop.f32.mrf.mxu0 }
  0xfe   : > { %v7872_v28 = vpop.f32.mrf.mxu1 }
  0xff   : > { %8077 = vmatmul.mubr.msk.f32.vlgmr.msra.gmra.mxu0 %vm251_vm0, %v7860_v9  ;;  %v514_v19 = vpop.f32.mrf.mxu0 }
 0x100   : > { %8085 = vmatpush3.xpose.msk.msra.mxu0 %vm251_vm0, %v484_v8  ;;  %8086 = vmatprep.mubr.msk.f32.mxu0 %vm8411_vm1, %v9561_v40  ;;  %v744_v30 = vpop.f32.mrf.mxu1 }
 0x101   : > { %8094 = vmatprep.subr.mxu0 %v9561_v40  ;;  %v7819_v20 = vpop.f32.mrf.mxu0 }
 0x102   : > { %v7875_v32 = vpop.f32.mrf.mxu1 }
 0x103   : > { %8087 = vmatmul.mubr.msk.f32.vlgmr.msra.gmra.mxu0 %vm251_vm0, %v714_v16  ;;  %v524_v22 = vpop.f32.mrf.mxu0 }
 0x104   : > { %8095 = vmatpush3.xpose.msk.msra.mxu0 %vm251_vm0, %v7807_v7  ;;  %8096 = vmatprep.mubr.msk.f32.mxu0 %vm8411_vm1, %v9561_v40  ;;  %v754_v35 = vpop.f32.mrf.mxu1 }
 0x105   : > { %8104 = vmatprep.subr.mxu0 %v9561_v40  ;;  %v7822_v24 = vpop.f32.mrf.mxu0 }
 0x106   : > { %v7878_v37 = vpop.f32.mrf.mxu1 }
 0x107   : > { %8097 = vmatmul.mubr.msk.f32.vlgmr.msra.gmra.mxu0 %vm251_vm0, %v7863_v14  ;;  %v534_v26 = vpop.f32.mrf.mxu0 }
 0x108   : > { %8105 = vmatpush3.xpose.msk.msra.mxu0 %vm251_vm0, %v494_v12  ;;  %8106 = vmatprep.mubr.msk.f32.mxu0 %vm8411_vm1, %v9561_v40  ;;  %v764_v41 = vpop.f32.mrf.mxu1 }
 0x109   : > { %8114 = vmatprep.subr.mxu0 %v9561_v40  ;;  %v7825_v27 = vpop.f32.mrf.mxu0 }
 0x10a   : > { %v7881_v42 = vpop.f32.mrf.mxu1 }
 0x10b   : > { %8107 = vmatmul.mubr.msk.f32.vlgmr.msra.gmra.mxu0 %vm251_vm0, %v724_v21  ;;  %v544_v29 = vpop.f32.mrf.mxu0 }
 0x10c   : > { %8115 = vmatpush3.xpose.msk.msra.mxu0 %vm251_vm0, %v7810_v10  ;;  %8116 = vmatprep.mubr.msk.f32.mxu0 %vm8411_vm1, %v9561_v40  ;;  %v774_v43 = vpop.f32.mrf.mxu1 }
 0x10d   : > { %8124 = vmatprep.subr.mxu0 %v9561_v40  ;;  %v7828_v31 = vpop.f32.mrf.mxu0 }
 0x10e   : > { %v7884_v46 = vpop.f32.mrf.mxu1 }
 0x10f   : > { %8117 = vmatmul.mubr.msk.f32.vlgmr.msra.gmra.mxu0 %vm251_vm0, %v7866_v18  ;;  %v554_v33 = vpop.f32.mrf.mxu0 }
 0x110   : > { %8125 = vmatpush3.xpose.msk.msra.mxu0 %vm251_vm0, %v504_v15  ;;  %8126 = vmatprep.mubr.msk.f32.mxu0 %vm8411_vm1, %v9561_v40  ;;  %v784_v61 = vpop.f32.mrf.mxu1 }
 0x111   : > { %8134 = vmatprep.subr.mxu0 %v9561_v40  ;;  %v7831_v34 = vpop.f32.mrf.mxu0 }
 0x112   : > { %v7887_v63 = vpop.f32.mrf.mxu1 }
 0x113   : > { %8127 = vmatmul.mubr.msk.f32.vlgmr.msra.gmra.mxu0 %vm251_vm0, %v734_v25  ;;  %v564_v36 = vpop.f32.mrf.mxu0 }
 0x114   : > { %8135 = vmatpush3.xpose.msk.msra.mxu0 %vm251_vm0, %v7813_v13  ;;  %8136 = vmatprep.mubr.msk.f32.mxu0 %vm8411_vm1, %v9561_v40  ;;  %v794_v1 = vpop.f32.mrf.mxu1 }
 0x115   : > { %8144 = vmatprep.subr.mxu0 %v9561_v40  ;;  %v8867_v38 = vpop.f32.mrf.mxu0 }
 0x117   : > { %8137 = vmatmul.mubr.msk.f32.vlgmr.msra.gmra.mxu0 %vm251_vm0, %v7869_v23  ;;  %v873_v39 = vpop.f32.mrf.mxu0 }
 0x118   : > { %8145 = vmatpush3.xpose.msk.msra.mxu0 %vm251_vm0, %v514_v19  ;;  %8146 = vmatprep.mubr.msk.f32.mxu0 %vm8411_vm1, %v9561_v40 }
 0x119   : > { %8154 = vmatprep.subr.mxu0 %v9561_v40  ;;  %7950 = vmatpush3.msra.mxu1 %v873_v39  ;;  %v8887_v44 = vpop.f32.mrf.mxu0 }
 0x11a   : > { %7954 = vmatprep.subr.mxu1 %v9561_v40 }
 0x11b   : > { %8147 = vmatmul.mubr.msk.f32.vlgmr.msra.gmra.mxu0 %vm251_vm0, %v744_v30  ;;  %v8894_v48 = vpop.f32.mrf.mxu0 }
 0x11c   : > { %8155 = vmatpush3.xpose.msk.msra.mxu0 %vm251_vm0, %v7816_v17  ;;  %8156 = vmatprep.mubr.msk.f32.mxu0 %vm8411_vm1, %v9561_v40 }
 0x11d   : > { %8164 = vmatprep.subr.mxu0 %v9561_v40  ;;  %v8901_v62 = vpop.f32.mrf.mxu0 }
 0x11f   : > { %8157 = vmatmul.mubr.msk.f32.vlgmr.msra.gmra.mxu0 %vm251_vm0, %v7872_v28  ;;  %v8908_v0 = vpop.f32.mrf.mxu0 }
 0x120   : > { %8165 = vmatpush3.xpose.msk.msra.mxu0 %vm251_vm0, %v524_v22  ;;  %8166 = vmatprep.mubr.msk.f32.mxu0 %vm8411_vm1, %v9561_v40 }
 0x121   : > { %8174 = vmatprep.subr.mxu0 %v9561_v40  ;;  %v8915_v2 = vpop.f32.mrf.mxu0 }
 0x123   : > { %8167 = vmatmul.mubr.msk.f32.vlgmr.msra.gmra.mxu0 %vm251_vm0, %v754_v35  ;;  %v8921_v3 = vpop.f32.mrf.mxu0 }
 0x124   : > { %8175 = vmatpush3.xpose.msk.msra.mxu0 %vm251_vm0, %v7819_v20  ;;  %8176 = vmatprep.mubr.msk.f32.mxu0 %vm8411_vm1, %v9561_v40 }
 0x125   : > { %8184 = vmatprep.subr.mxu0 %v9561_v40  ;;  %v8923_v4 = vpop.f32.mrf.mxu0 }
 0x127   : > { %8177 = vmatmul.mubr.msk.f32.vlgmr.msra.gmra.mxu0 %vm251_vm0, %v7875_v32  ;;  %v8925_v5 = vpop.f32.mrf.mxu0 }
 0x128   : > { %8185 = vmatpush3.xpose.msk.msra.mxu0 %vm251_vm0, %v534_v26  ;;  %8186 = vmatprep.mubr.msk.f32.mxu0 %vm8411_vm1, %v9561_v40 }
 0x129   : > { %8194 = vmatprep.subr.mxu0 %v9561_v40  ;;  %v8927_v6 = vpop.f32.mrf.mxu0 }
 0x12b   : > { %8187 = vmatmul.mubr.msk.f32.vlgmr.msra.gmra.mxu0 %vm251_vm0, %v764_v41  ;;  %v8929_v7 = vpop.f32.mrf.mxu0 }
 0x12c   : > { %8195 = vmatpush3.xpose.msk.msra.mxu0 %vm251_vm0, %v7822_v24  ;;  %8196 = vmatprep.mubr.msk.f32.mxu0 %vm8411_vm1, %v9561_v40 }
 0x12d   : > { %8204 = vmatprep.subr.mxu0 %v9561_v40  ;;  %v8931_v8 = vpop.f32.mrf.mxu0 }
 0x12f   : > { %8197 = vmatmul.mubr.msk.f32.vlgmr.msra.gmra.mxu0 %vm251_vm0, %v7878_v37  ;;  %v8933_v9 = vpop.f32.mrf.mxu0 }
 0x130   : > { %8205 = vmatpush3.xpose.msk.msra.mxu0 %vm251_vm0, %v544_v29  ;;  %8206 = vmatprep.mubr.msk.f32.mxu0 %vm8411_vm1, %v9561_v40 }
 0x131   : > { %8214 = vmatprep.subr.mxu0 %v9561_v40  ;;  %v8935_v10 = vpop.f32.mrf.mxu0 }
 0x133   : > { %8207 = vmatmul.mubr.msk.f32.vlgmr.msra.gmra.mxu0 %vm251_vm0, %v774_v43  ;;  %v8937_v11 = vpop.f32.mrf.mxu0 }
 0x134   : > { %8215 = vmatpush3.xpose.msk.msra.mxu0 %vm251_vm0, %v7825_v27  ;;  %8216 = vmatprep.mubr.msk.f32.mxu0 %vm8411_vm1, %v9561_v40 }
 0x135   : > { %8224 = vmatprep.subr.mxu0 %v9561_v40  ;;  %v8939_v12 = vpop.f32.mrf.mxu0 }
 0x136   : > { %9563 = vst [vmem:[#allocation2_spill] sm:$0xff] %v8939_v12 }
 0x137   : > { %8217 = vmatmul.mubr.msk.f32.vlgmr.msra.gmra.mxu0 %vm251_vm0, %v7881_v42  ;;  %v8941_v13 = vpop.f32.mrf.mxu0 }
 0x138   : > { %8225 = vmatpush3.xpose.msk.msra.mxu0 %vm251_vm0, %v554_v33  ;;  %8226 = vmatprep.mubr.msk.f32.mxu0 %vm8411_vm1, %v9561_v40  ;;  %9564 = vst [vmem:[#allocation3_spill] sm:$0xff] %v8941_v13 }
 0x139   : > { %8234 = vmatprep.subr.mxu0 %v9561_v40  ;;  %v8943_v14 = vpop.f32.mrf.mxu0 }
 0x13a   : > { %9565 = vst [vmem:[#allocation4_spill] sm:$0xff] %v8943_v14 }
 0x13b   : > { %8227 = vmatmul.mubr.msk.f32.vlgmr.msra.gmra.mxu0 %vm251_vm0, %v784_v61  ;;  %v8945_v15 = vpop.f32.mrf.mxu0 }
 0x13c   : > { %8235 = vmatpush3.xpose.msk.msra.mxu0 %vm251_vm0, %v7828_v31  ;;  %8236 = vmatprep.mubr.msk.f32.mxu0 %vm8411_vm1, %v9561_v40  ;;  %9566 = vst [vmem:[#allocation5_spill] sm:$0xff] %v8945_v15 }
 0x13d   : > { %8244 = vmatprep.subr.mxu0 %v9561_v40  ;;  %v8947_v16 = vpop.f32.mrf.mxu0 }
 0x13e   : > { %9567 = vst [vmem:[#allocation6_spill] sm:$0xff] %v8947_v16 }
 0x13f   : > { %8237 = vmatmul.mubr.msk.f32.vlgmr.msra.gmra.mxu0 %vm251_vm0, %v7884_v46  ;;  %v8949_v17 = vpop.f32.mrf.mxu0 }
 0x140   : > { %8245 = vmatpush3.xpose.msk.msra.mxu0 %vm251_vm0, %v564_v36  ;;  %8246 = vmatprep.mubr.msk.f32.mxu0 %vm8411_vm1, %v9561_v40  ;;  %9568 = vst [vmem:[#allocation7_spill] sm:$0xff] %v8949_v17 }
 0x141   : > { %8254 = vmatprep.subr.mxu0 %v9561_v40  ;;  %v8951_v18 = vpop.f32.mrf.mxu0 }
 0x142   : > { %9569 = vst [vmem:[#allocation8_spill] sm:$0xff] %v8951_v18 }
 0x143   : > { %8247 = vmatmul.mubr.msk.f32.vlgmr.msra.gmra.mxu0 %vm251_vm0, %v794_v1  ;;  %v8953_v19 = vpop.f32.mrf.mxu0 }
 0x144   : > { %8255 = vmatpush3.xpose.msk.msra.mxu0 %vm251_vm0, %v7831_v34  ;;  %8256 = vmatprep.mubr.msk.f32.mxu0 %vm8411_vm1, %v9561_v40  ;;  %9570 = vst [vmem:[#allocation9_spill] sm:$0xff] %v8953_v19 }
 0x145   : > { %v8955_v20 = vpop.f32.mrf.mxu0 }
 0x146   : > { %9571 = vst [vmem:[#allocation10_spill] sm:$0xff] %v8955_v20 }
 0x147   : > { %8257 = vmatmul.mubr.msk.f32.vlgmr.msra.gmra.mxu0 %vm251_vm0, %v7887_v63  ;;  %v8957_v21 = vpop.f32.mrf.mxu0 }
 0x148   : > { %9572 = vst [vmem:[#allocation11_spill] sm:$0xff] %v8957_v21 }
 0x149   : > { %v8959_v22 = vpop.f32.mrf.mxu0 }
 0x14a   : > { %9573 = vst [vmem:[#allocation12_spill] sm:$0xff] %v8959_v22 }
 0x14b   : > { %v8961_v23 = vpop.f32.mrf.mxu0 }
 0x14c   : > { %9574 = vst [vmem:[#allocation13_spill] sm:$0xff] %v8961_v23 }
 0x14d   : > { %v8963_v25 = vpop.f32.mrf.mxu0 }
 0x14e   : > { %9575 = vst [vmem:[#allocation14_spill] sm:$0xff] %v8963_v25 }
 0x14f   : > { %v8966_v28 = vpop.f32.mrf.mxu0 }
 0x150   : > { %9576 = vst [vmem:[#allocation15_spill] sm:$0xff] %v8966_v28 }
 0x151   : > { %v8968_v29 = vpop.f32.mrf.mxu0 }
 0x152   : > { %9577 = vst [vmem:[#allocation16_spill] sm:$0xff] %v8968_v29 }
 0x153   : > { %v8970_v30 = vpop.f32.mrf.mxu0 }
 0x154   : > { %9578 = vst [vmem:[#allocation17_spill] sm:$0xff] %v8970_v30 }
 0x19b   : > { %v1104_v24 = vpop.f32.mrf.mxu1 }
 0x19c   : > { %v1109_v26 = vsel %vm1108_vm2, %v1104_v24, -inf }
 0x19d   : > { %1110 = vmax.xlane.f32.xlu0 %v1109_v26  ;;  %v7948_v27 = vpop.f32.mrf.mxu1 }
 0x1ab   : > { %v8972_v31 = vpop.f32.mrf.mxu0 }
 0x1ad   : > { %v8028_v32 = vpop.f32.mrf.mxu0 }
 0x1af   : > { %v8974_v33 = vpop.f32.mrf.mxu0 }
 0x1b1   : > { %v8038_v34 = vpop.f32.mrf.mxu0 }
 0x1b3   : > { %v8976_v35 = vpop.f32.mrf.mxu0 }
 0x1b5   : > { %v8048_v36 = vpop.f32.mrf.mxu0 }
 0x1b7   : > { %v8978_v37 = vpop.f32.mrf.mxu0 }
 0x1b9   : > { %v8058_v39 = vpop.f32.mrf.mxu0 }
 0x1bb   : > { %v8980_v41 = vpop.f32.mrf.mxu0 }
 0x1bd   : > { %v8068_v42 = vpop.f32.mrf.mxu0 }
 0x1bf   : > { %v8982_v43 = vpop.f32.mrf.mxu0 }
 0x1c1   : > { %v8078_v46 = vpop.f32.mrf.mxu0 }
 0x1c3   : > { %v8984_v61 = vpop.f32.mrf.mxu0 }
 0x1c5   : > { %v8088_v63 = vpop.f32.mrf.mxu0 }
 0x1c7   : > { %v8986_v1 = vpop.f32.mrf.mxu0 }
 0x1c9   : > { %v8098_v26 = vpop.f32.mrf.mxu0 }
 0x1cb   : > { %v8988_v27 = vpop.f32.mrf.mxu0 }
 0x1cd   : > { %v8108_v32 = vpop.f32.mrf.mxu0 }
 0x1cf   : > { %v8990_v34 = vpop.f32.mrf.mxu0 }
 0x1d1   : > { %v8118_v36 = vpop.f32.mrf.mxu0 }
 0x1d3   : > { %v8992_v40 = vpop.f32.mrf.mxu0 }
 0x1d5   : > { %v8128_v39 = vpop.f32.mrf.mxu0 }
 0x1d7   : > { %v8994_v29 = vpop.f32.mrf.mxu0 }
 0x1d9   : > { %v8138_v42 = vpop.f32.mrf.mxu0 }
 0x1db   : > { %v8996_v30 = vpop.f32.mrf.mxu0 }
 0x1dd   : > { %v8148_v46 = vpop.f32.mrf.mxu0 }
 0x1df   : > { %v8998_v25 = vpop.f32.mrf.mxu0 }
 0x1e1   : > { %v8158_v63 = vpop.f32.mrf.mxu0 }
 0x1e3   : > { %v9000_v28 = vpop.f32.mrf.mxu0 }
 0x1e5   : > { %v8168_v26 = vpop.f32.mrf.mxu0 }
 0x1e7   : > { %v9002_v22 = vpop.f32.mrf.mxu0 }
 0x1e9   : > { %v8178_v32 = vpop.f32.mrf.mxu0 }
 0x1eb   : > { %v9004_v23 = vpop.f32.mrf.mxu0 }
 0x1ed   : > { %v8188_v36 = vpop.f32.mrf.mxu0 }
 0x1ef   : > { %v9006_v20 = vpop.f32.mrf.mxu0 }
 0x1f1   : > { %v8198_v39 = vpop.f32.mrf.mxu0 }
 0x1f3   : > { %v9008_v21 = vpop.f32.mrf.mxu0 }
 0x1f5   : > { %v8208_v42 = vpop.f32.mrf.mxu0 }
 0x1f7   : > { %v9010_v18 = vpop.f32.mrf.mxu0 }
 0x1f9   : > { %v8218_v46 = vpop.f32.mrf.mxu0 }
 0x1fb   : > { %v9012_v19 = vpop.f32.mrf.mxu0 }
 0x1fd   : > { %v8228_v63 = vpop.f32.mrf.mxu0 }
 0x1ff   : > { %v9014_v16 = vpop.f32.mrf.mxu0 }
 0x201   : > { %v8238_v26 = vpop.f32.mrf.mxu0 }
 0x203   : > { %v9016_v32 = vpop.f32.mrf.mxu0 }
 0x205   : > { %v8248_v17 = vpop.f32.mrf.mxu0 }
 0x207   : > { %v9018_v36 = vpop.f32.mrf.mxu0 }
 0x209   : > { %v8258_v14 = vpop.f32.mrf.mxu0 }
 0x226   : > { %v1111_v39 = vpop.xlane.xlu0 %1110 }
 0x227   : > { %v1112_v15 = vsub.f32 %v1104_v24, %v1111_v39 }
 0x229   : > { %v1113_v12 = vmul.f32 1.442695, %v1112_v15 }
 0x22b   : > { %8274 = vpow2.f32 %v1113_v12  ;;  %v9579_v12 = vmov 0.0  }
 0x238   : > { %v8275_v42 = vpop.eup %8274 }
 0x239   : > { %v1115_v46 = vsel %vm1108_vm2, %v8275_v42, 0.0 }
 0x23a   : > { %1116 = vadd.xlane.f32.xlu0 %v1115_v46 }
 0x2c3   : > { %v1117_v13 = vpop.xlane.xlu0 %1116 }
 0x2c4   : > { %8276 = vrcp.f32 %v1117_v13 }
 0x2d1   : > { %v8277_v63 = vpop.eup %8276 }
 0x2d2   : > { %v1119_v17 = vmul.f32 %v8277_v63, %v8275_v42 }
 0x2d4   : > { %1121 = vxpose.xlu1.b32.start.end [1/1] (short) (narrow) %v1119_v17, 8  ;;  %1120 = vst.msk [vmem:[%s9025_s23] sm:$0xff] %vm1108_vm2, %v1119_v17 }
 0x350   : > { %v1137_v14 = vpop.trf.xlu1 }
 0x351   : > { %7952 = vmatmul.mubr.msk.f32.vlgmr.msra.gmra.mxu1 %vm1108_vm2, %v1137_v14 }
 0x352   : > { %7955 = vmatpush3.xpose.msk.msra.mxu1 %vm251_vm0, %v8758_v45  ;;  %7956 = vmatprep.mubr.msk.f32.mxu1 %vm8411_vm1, %v9579_v12 }
 0x353   : > { %7959 = vmatprep.subr.mxu1 %v9579_v12 }
 0x355   : > { %7957 = vmatmul.mubr.msk.f32.vlgmr.msra.gmra.mxu1 %vm251_vm0, %v8760_v47 }
 0x356   : > { %7960 = vmatpush3.msra.mxu1 %v8867_v38  ;;  %7961 = vmatprep.mubr.msk.f32.mxu1 %vm8411_vm1, %v9579_v12 }
 0x357   : > { %7964 = vmatprep.subr.mxu1 %v9579_v12 }
 0x411   : > { %v1222_v45 = vpop.f32.mrf.mxu1 }
 0x412   : > { %1226 = vst.msk [vmem:[%s9045_s26] sm:$0xff] %vm251_vm0, %v1222_v45 }
 0x413   : > { %v7953_v13 = vpop.f32.mrf.mxu1 }
 0x415   : > { %v1299_v15 = vpop.f32.mrf.mxu1 }
 0x416   : > { %v1303_v47 = vsel %vm1108_vm2, %v1299_v15, -inf }
 0x417   : > { %1304 = vmax.xlane.f32.xlu1 %v1303_v47  ;;  %v7958_v38 = vpop.f32.mrf.mxu1 }
 0x4a0   : > { %v1305_v24 = vpop.xlane.xlu1 %1304 }
 0x4a1   : > { %v1306_v26 = vsub.f32 %v1299_v15, %v1305_v24 }
 0x4a3   : > { %v1307_v39 = vmul.f32 1.442695, %v1306_v26 }
 0x4a5   : > { %8278 = vpow2.f32 %v1307_v39 }
 0x4b2   : > { %v8279_v42 = vpop.eup %8278 }
 0x4b3   : > { %v1309_v46 = vsel %vm1108_vm2, %v8279_v42, 0.0 }
 0x4b4   : > { %1310 = vadd.xlane.f32.xlu0 %v1309_v46 }
 0x53d   : > { %v1311_v63 = vpop.xlane.xlu0 %1310 }
 0x53e   : > { %8280 = vrcp.f32 %v1311_v63 }
 0x54b   : > { %v8281_v17 = vpop.eup %8280 }
 0x54c   : > { %v1313_v14 = vmul.f32 %v8281_v17, %v8279_v42 }
 0x54e   : > { %1315 = vxpose.xlu0.b32.start.end [1/1] (short) (narrow) %v1313_v14, 8  ;;  %1314 = vst.msk [vmem:[%s9025_s23 + $0x8] sm:$0xff] %vm1108_vm2, %v1313_v14 }
 0x5ca   : > { %v1331_v45 = vpop.trf.xlu0 }
 0x5cb   : > { %7962 = vmatmul.mubr.msk.f32.vlgmr.msra.gmra.mxu1 %vm1108_vm2, %v1331_v45 }
 0x5cc   : > { %7965 = vmatpush3.xpose.msk.msra.mxu1 %vm251_vm0, %v8769_v51  ;;  %7966 = vmatprep.mubr.msk.f32.mxu1 %vm8411_vm1, %v9579_v12 }
 0x5cd   : > { %7969 = vmatprep.subr.mxu1 %v9579_v12 }
 0x5cf   : > { %7967 = vmatmul.mubr.msk.f32.vlgmr.msra.gmra.mxu1 %vm251_vm0, %v8773_v52 }
 0x5d0   : > { %7970 = vmatpush3.msra.mxu1 %v8894_v48  ;;  %7971 = vmatprep.mubr.msk.f32.mxu1 %vm8411_vm1, %v9579_v12 }
 0x5d1   : > { %7974 = vmatprep.subr.mxu1 %v9579_v12 }
 0x68b   : > { %v1416_v13 = vpop.f32.mrf.mxu1 }
 0x68c   : > { %1420 = vst.msk [vmem:[%s9045_s26 + $0x8] sm:$0xff] %vm251_vm0, %v1416_v13 }
 0x68d   : > { %v7963_v15 = vpop.f32.mrf.mxu1 }
 0x68f   : > { %v1493_v51 = vpop.f32.mrf.mxu1 }
 0x690   : > { %v1497_v47 = vsel %vm1108_vm2, %v1493_v51, -inf }
 0x691   : > { %1498 = vmax.xlane.f32.xlu1 %v1497_v47  ;;  %v7968_v38 = vpop.f32.mrf.mxu1 }
 0x71a   : > { %v1499_v24 = vpop.xlane.xlu1 %1498 }
 0x71b   : > { %v1500_v26 = vsub.f32 %v1493_v51, %v1499_v24 }
 0x71d   : > { %v1501_v52 = vmul.f32 1.442695, %v1500_v26 }
 0x71f   : > { %8282 = vpow2.f32 %v1501_v52 }
 0x72c   : > { %v8283_v48 = vpop.eup %8282 }
 0x72d   : > { %v1503_v39 = vsel %vm1108_vm2, %v8283_v48, 0.0 }
 0x72e   : > { %1504 = vadd.xlane.f32.xlu1 %v1503_v39 }
 0x7b7   : > { %v1505_v42 = vpop.xlane.xlu1 %1504 }
 0x7b8   : > { %8284 = vrcp.f32 %v1505_v42 }
 0x7c5   : > { %v8285_v46 = vpop.eup %8284 }
 0x7c6   : > { %v1507_v63 = vmul.f32 %v8285_v46, %v8283_v48 }
 0x7c8   : > { %1509 = vxpose.xlu1.b32.start.end [1/1] (short) (narrow) %v1507_v63, 8  ;;  %1508 = vst.msk [vmem:[%s9025_s23 + $0x10] sm:$0xff] %vm1108_vm2, %v1507_v63 }
 0x844   : > { %v1525_v17 = vpop.trf.xlu1 }
 0x845   : > { %7972 = vmatmul.mubr.msk.f32.vlgmr.msra.gmra.mxu1 %vm1108_vm2, %v1525_v17 }
 0x846   : > { %7975 = vmatpush3.xpose.msk.msra.mxu1 %vm251_vm0, %v8763_v49  ;;  %7976 = vmatprep.mubr.msk.f32.mxu1 %vm8411_vm1, %v9579_v12 }
 0x847   : > { %7979 = vmatprep.subr.mxu1 %v9579_v12 }
 0x849   : > { %7977 = vmatmul.mubr.msk.f32.vlgmr.msra.gmra.mxu1 %vm251_vm0, %v8767_v50 }
 0x84a   : > { %7980 = vmatpush3.msra.mxu1 %v8887_v44  ;;  %7981 = vmatprep.mubr.msk.f32.mxu1 %vm8411_vm1, %v9579_v12 }
 0x84b   : > { %7984 = vmatprep.subr.mxu1 %v9579_v12 }
 0x905   : > { %v1610_v14 = vpop.f32.mrf.mxu1 }
 0x906   : > { %1614 = vst.msk [vmem:[%s9045_s26 + $0x10] sm:$0xff] %vm251_vm0, %v1610_v14 }
 0x907   : > { %v7973_v45 = vpop.f32.mrf.mxu1 }
 0x909   : > { %v1687_v49 = vpop.f32.mrf.mxu1 }
 0x90a   : > { %v1691_v13 = vsel %vm1108_vm2, %v1687_v49, -inf }
 0x90b   : > { %1692 = vmax.xlane.f32.xlu0 %v1691_v13  ;;  %v7978_v15 = vpop.f32.mrf.mxu1 }
 0x994   : > { %v1693_v51 = vpop.xlane.xlu0 %1692 }
 0x995   : > { %v1694_v47 = vsub.f32 %v1687_v49, %v1693_v51 }
 0x997   : > { %v1695_v50 = vmul.f32 1.442695, %v1694_v47 }
 0x999   : > { %8286 = vpow2.f32 %v1695_v50 }
 0x9a6   : > { %v8287_v44 = vpop.eup %8286 }
 0x9a7   : > { %v1697_v38 = vsel %vm1108_vm2, %v8287_v44, 0.0 }
 0x9a8   : > { %1698 = vadd.xlane.f32.xlu0 %v1697_v38 }
 0xa31   : > { %v1699_v24 = vpop.xlane.xlu0 %1698 }
 0xa32   : > { %8288 = vrcp.f32 %v1699_v24 }
 0xa3f   : > { %v8289_v26 = vpop.eup %8288 }
 0xa40   : > { %v1701_v52 = vmul.f32 %v8289_v26, %v8287_v44 }
 0xa42   : > { %1703 = vxpose.xlu1.b32.start.end [1/1] (short) (narrow) %v1701_v52, 8  ;;  %1702 = vst.msk [vmem:[%s9025_s23 + $0x18] sm:$0xff] %vm1108_vm2, %v1701_v52 }
 0xabe   : > { %v1719_v48 = vpop.trf.xlu1 }
 0xabf   : > { %7982 = vmatmul.mubr.msk.f32.vlgmr.msra.gmra.mxu1 %vm1108_vm2, %v1719_v48 }
 0xac0   : > { %7985 = vmatpush3.xpose.msk.msra.mxu1 %vm251_vm0, %v8779_v55  ;;  %7986 = vmatprep.mubr.msk.f32.mxu1 %vm8411_vm1, %v9579_v12 }
 0xac1   : > { %7989 = vmatprep.subr.mxu1 %v9579_v12 }
 0xac3   : > { %7987 = vmatmul.mubr.msk.f32.vlgmr.msra.gmra.mxu1 %vm251_vm0, %v8781_v56 }
 0xac4   : > { %7990 = vmatpush3.msra.mxu1 %v8908_v0  ;;  %7991 = vmatprep.mubr.msk.f32.mxu1 %vm8411_vm1, %v9579_v12 }
 0xac5   : > { %7994 = vmatprep.subr.mxu1 %v9579_v12 }
 0xb7f   : > { %v1804_v39 = vpop.f32.mrf.mxu1 }
 0xb80   : > { %1808 = vst.msk [vmem:[%s9045_s26 + $0x18] sm:$0xff] %vm251_vm0, %v1804_v39 }
 0xb81   : > { %v7983_v42 = vpop.f32.mrf.mxu1 }
 0xb83   : > { %v1881_v55 = vpop.f32.mrf.mxu1 }
 0xb84   : > { %v1885_v46 = vsel %vm1108_vm2, %v1881_v55, -inf }
 0xb85   : > { %1886 = vmax.xlane.f32.xlu0 %v1885_v46  ;;  %v7988_v63 = vpop.f32.mrf.mxu1 }
 0xc0e   : > { %v1887_v17 = vpop.xlane.xlu0 %1886 }
 0xc0f   : > { %v1888_v14 = vsub.f32 %v1881_v55, %v1887_v17  ;;  %v2855_v55 = vsel %vm1108_vm2, %v8974_v33, -inf }
 0xc11   : > { %v1889_v56 = vmul.f32 1.442695, %v1888_v14 }
 0xc13   : > { %8290 = vpow2.f32 %v1889_v56 }
 0xc20   : > { %v8291_v0 = vpop.eup %8290 }
 0xc21   : > { %v1891_v45 = vsel %vm1108_vm2, %v8291_v0, 0.0 }
 0xc22   : > { %1892 = vadd.xlane.f32.xlu1 %v1891_v45 }
 0xcab   : > { %v1893_v49 = vpop.xlane.xlu1 %1892 }
 0xcac   : > { %8292 = vrcp.f32 %v1893_v49 }
 0xcb9   : > { %v8293_v13 = vpop.eup %8292 }
 0xcba   : > { %v1895_v15 = vmul.f32 %v8293_v13, %v8291_v0  ;;  %v3243_v0 = vsel %vm1108_vm2, %v8978_v37, -inf }
 0xcbc   : > { %1897 = vxpose.xlu0.b32.start.end [1/1] (short) (narrow) %v1895_v15, 8  ;;  %1896 = vst.msk [vmem:[%s9025_s23 + $0x20] sm:$0xff] %vm1108_vm2, %v1895_v15 }
 0xd38   : > { %v1913_v51 = vpop.trf.xlu0 }
 0xd39   : > { %7992 = vmatmul.mubr.msk.f32.vlgmr.msra.gmra.mxu1 %vm1108_vm2, %v1913_v51 }
 0xd3a   : > { %7995 = vmatpush3.xpose.msk.msra.mxu1 %vm251_vm0, %v8775_v53  ;;  %7996 = vmatprep.mubr.msk.f32.mxu1 %vm8411_vm1, %v9579_v12 }
 0xd3b   : > { %7999 = vmatprep.subr.mxu1 %v9579_v12 }
 0xd3d   : > { %7997 = vmatmul.mubr.msk.f32.vlgmr.msra.gmra.mxu1 %vm251_vm0, %v8777_v54 }
 0xd3e   : > { %8000 = vmatpush3.msra.mxu1 %v8901_v62  ;;  %8001 = vmatprep.mubr.msk.f32.mxu1 %vm8411_vm1, %v9579_v12 }
 0xd3f   : > { %8004 = vmatprep.subr.mxu1 %v9579_v12 }
 0xdf9   : > { %v1998_v47 = vpop.f32.mrf.mxu1 }
 0xdfa   : > { %2002 = vst.msk [vmem:[%s9045_s26 + $0x20] sm:$0xff] %vm251_vm0, %v1998_v47 }
 0xdfb   : > { %v7993_v50 = vpop.f32.mrf.mxu1 }
 0xdfd   : > { %v2075_v53 = vpop.f32.mrf.mxu1 }
 0xdfe   : > { %v2079_v44 = vsel %vm1108_vm2, %v2075_v53, -inf }
 0xdff   : > { %2080 = vmax.xlane.f32.xlu1 %v2079_v44  ;;  %v7998_v38 = vpop.f32.mrf.mxu1 }
 0xe88   : > { %v2081_v24 = vpop.xlane.xlu1 %2080 }
 0xe89   : > { %v2082_v26 = vsub.f32 %v2075_v53, %v2081_v24  ;;  %v3631_v24 = vsel %vm1108_vm2, %v8982_v43, -inf }
 0xe8b   : > { %v2083_v54 = vmul.f32 1.442695, %v2082_v26 }
 0xe8d   : > { %8294 = vpow2.f32 %v2083_v54 }
 0xe9a   : > { %v8295_v62 = vpop.eup %8294 }
 0xe9b   : > { %v2085_v52 = vsel %vm1108_vm2, %v8295_v62, 0.0 }
 0xe9c   : > { %2086 = vadd.xlane.f32.xlu1 %v2085_v52 }
 0xf25   : > { %v2087_v48 = vpop.xlane.xlu1 %2086 }
 0xf26   : > { %8296 = vrcp.f32 %v2087_v48 }
 0xf33   : > { %v8297_v39 = vpop.eup %8296 }
 0xf34   : > { %v2089_v42 = vmul.f32 %v8297_v39, %v8295_v62 }
 0xf36   : > { %2091 = vxpose.xlu1.b32.start.end [1/1] (short) (narrow) %v2089_v42, 8  ;;  %2090 = vst.msk [vmem:[%s9025_s23 + $0x28] sm:$0xff] %vm1108_vm2, %v2089_v42 }
 0xf5d   : > { %2856 = vmax.xlane.f32.xlu1 %v2855_v55 }
 0xfb2   : > { %v2107_v46 = vpop.trf.xlu1 }
 0xfb3   : > { %8002 = vmatmul.mubr.msk.f32.vlgmr.msra.gmra.mxu1 %vm1108_vm2, %v2107_v46 }
 0xfb4   : > { %8005 = vmatpush3.xpose.msk.msra.mxu1 %vm251_vm0, %v8787_v59  ;;  %8006 = vmatprep.mubr.msk.f32.mxu1 %vm8411_vm1, %v9579_v12 }
 0xfb5   : > { %8009 = vmatprep.subr.mxu1 %v9579_v12 }
 0xfb7   : > { %8007 = vmatmul.mubr.msk.f32.vlgmr.msra.gmra.mxu1 %vm251_vm0, %v8789_v60 }
 0xfb8   : > { %8010 = vmatpush3.msra.mxu1 %v8921_v3  ;;  %8011 = vmatprep.mubr.msk.f32.mxu1 %vm8411_vm1, %v9579_v12 }
 0xfb9   : > { %8014 = vmatprep.subr.mxu1 %v9579_v12 }
 0xfe6   : > { %v2857_v63 = vpop.xlane.xlu1 %2856 }
 0xfe7   : > { %v2858_v17 = vsub.f32 %v8974_v33, %v2857_v63 }
 0xfe9   : > { %v2859_v59 = vmul.f32 1.442695, %v2858_v17 }
 0xfeb   : > { %8298 = vpow2.f32 %v2859_v59 }
 0xff8   : > { %v8299_v14 = vpop.eup %8298 }
 0xff9   : > { %v2861_v56 = vsel %vm1108_vm2, %v8299_v14, 0.0 }
 0xffa   : > { %2862 = vadd.xlane.f32.xlu1 %v2861_v56 }
 0xffe   : > { %3244 = vmax.xlane.f32.xlu1 %v3243_v0 }
0x1073   : > { %v2192_v60 = vpop.f32.mrf.mxu1 }
0x1074   : > { %2196 = vst.msk [vmem:[%s9045_s26 + $0x28] sm:$0xff] %vm251_vm0, %v2192_v60 }
0x1075   : > { %v8003_v3 = vpop.f32.mrf.mxu1 }
0x1077   : > { %v2269_v45 = vpop.f32.mrf.mxu1 }
0x1078   : > { %v2273_v49 = vsel %vm1108_vm2, %v2269_v45, -inf }
0x1079   : > { %2274 = vmax.xlane.f32.xlu0 %v2273_v49  ;;  %v8008_v33 = vpop.f32.mrf.mxu1 }
0x1083   : > { %v2863_v13 = vpop.xlane.xlu1 %2862 }
0x1084   : > { %8300 = vrcp.f32 %v2863_v13 }
0x1087   : > { %v3245_v15 = vpop.xlane.xlu1 %3244 }
0x1088   : > { %v3246_v51 = vsub.f32 %v8978_v37, %v3245_v15 }
0x108a   : > { %v3247_v47 = vmul.f32 1.442695, %v3246_v51  ;;  %v2661_v51 = vsel %vm1108_vm2, %v8972_v31, -inf }
0x108c   : > { %8302 = vpow2.f32 %v3247_v47 }
0x1091   : > { %v8301_v50 = vpop.eup %8300 }
0x1092   : > { %v9147_v53 = vmul.f32 %v8301_v50, %v8299_v14  ;;  %v4019_v14 = vsel %vm1108_vm2, %v8986_v1, -inf  ;;  %v4407_v50 = vsel %vm1108_vm2, %v8990_v34, -inf }
0x1094   : > { %2866 = vst.msk [vmem:[%s9025_s23 + $0x48] sm:$0xff] %vm1108_vm2, %v9147_v53 }
0x1099   : > { %v8303_v44 = vpop.eup %8302 }
0x109a   : > { %v3249_v38 = vsel %vm1108_vm2, %v8303_v44, 0.0 }
0x109b   : > { %3250 = vadd.xlane.f32.xlu1 %v3249_v38 }
0x109f   : > { %3632 = vmax.xlane.f32.xlu1 %v3631_v24 }
0x1102   : > { %v2275_v26 = vpop.xlane.xlu0 %2274 }
0x1103   : > { %v2276_v54 = vsub.f32 %v2269_v45, %v2275_v26 }
0x1105   : > { %v2277_v37 = vmul.f32 1.442695, %v2276_v54 }
0x1107   : > { %8304 = vpow2.f32 %v2277_v37 }
0x1114   : > { %v8305_v62 = vpop.eup %8304 }
0x1115   : > { %v2279_v52 = vsel %vm1108_vm2, %v8305_v62, 0.0 }
0x1116   : > { %2280 = vadd.xlane.f32.xlu0 %v2279_v52 }
0x1124   : > { %v3251_v48 = vpop.xlane.xlu1 %3250 }
0x1125   : > { %8306 = vrcp.f32 %v3251_v48 }
0x1128   : > { %v3633_v39 = vpop.xlane.xlu1 %3632 }
0x1129   : > { %v3634_v42 = vsub.f32 %v8982_v43, %v3633_v39 }
0x112b   : > { %v3635_v55 = vmul.f32 1.442695, %v3634_v42 }
0x112d   : > { %8308 = vpow2.f32 %v3635_v55 }
0x1132   : > { %v8307_v46 = vpop.eup %8306 }
0x1133   : > { %v3253_v63 = vmul.f32 %v8307_v46, %v8303_v44 }
0x1135   : > { %3254 = vst.msk [vmem:[%s9025_s23 + $0x58] sm:$0xff] %vm1108_vm2, %v3253_v63 }
0x113a   : > { %v8309_v17 = vpop.eup %8308 }
0x113b   : > { %v3637_v59 = vsel %vm1108_vm2, %v8309_v17, 0.0 }
0x113c   : > { %3638 = vadd.xlane.f32.xlu1 %v3637_v59 }
0x1140   : > { %4020 = vmax.xlane.f32.xlu1 %v4019_v14 }
0x119f   : > { %v2281_v56 = vpop.xlane.xlu0 %2280 }
0x11a0   : > { %8310 = vrcp.f32 %v2281_v56 }
0x11ad   : > { %v8311_v0 = vpop.eup %8310 }
0x11ae   : > { %v2283_v43 = vmul.f32 %v8311_v0, %v8305_v62 }
0x11b0   : > { %2285 = vxpose.xlu0.b32.start.end [1/1] (short) (narrow) %v2283_v43, 8  ;;  %2284 = vst.msk [vmem:[%s9025_s23 + $0x30] sm:$0xff] %vm1108_vm2, %v2283_v43 }
0x11c5   : > { %v3639_v60 = vpop.xlane.xlu1 %3638 }
0x11c6   : > { %8312 = vrcp.f32 %v3639_v60 }
0x11c9   : > { %v4021_v3 = vpop.xlane.xlu1 %4020 }
0x11ca   : > { %v4022_v45 = vsub.f32 %v8986_v1, %v4021_v3 }
0x11cc   : > { %v4023_v49 = vmul.f32 1.442695, %v4022_v45 }
0x11ce   : > { %8314 = vpow2.f32 %v4023_v49  ;;  %v4795_v49 = vsel %vm1108_vm2, %v8994_v29, -inf }
0x11d3   : > { %v8313_v33 = vpop.eup %8312 }
0x11d4   : > { %v3641_v13 = vmul.f32 %v8313_v33, %v8309_v17 }
0x11d6   : > { %3642 = vst.msk [vmem:[%s9025_s23 + $0x68] sm:$0xff] %vm1108_vm2, %v3641_v13 }
0x11db   : > { %v8315_v15 = vpop.eup %8314 }
0x11dc   : > { %v4025_v47 = vsel %vm1108_vm2, %v8315_v15, 0.0 }
0x11dd   : > { %2662 = vmax.xlane.f32.xlu0 %v2661_v51  ;;  %4026 = vadd.xlane.f32.xlu1 %v4025_v47 }
0x11e1   : > { %4408 = vmax.xlane.f32.xlu1 %v4407_v50 }
0x122c   : > { %v2301_v44 = vpop.trf.xlu0 }
0x122d   : > { %8012 = vmatmul.mubr.msk.f32.vlgmr.msra.gmra.mxu1 %vm1108_vm2, %v2301_v44 }
0x122e   : > { %8015 = vmatpush3.xpose.msk.msra.mxu1 %vm251_vm0, %v8783_v57  ;;  %8016 = vmatprep.mubr.msk.f32.mxu1 %vm8411_vm1, %v9579_v12 }
0x122f   : > { %8019 = vmatprep.subr.mxu1 %v9579_v12 }
0x1231   : > { %8017 = vmatmul.mubr.msk.f32.vlgmr.msra.gmra.mxu1 %vm251_vm0, %v8785_v58 }
0x1232   : > { %8020 = vmatpush3.msra.mxu1 %v8915_v2  ;;  %8021 = vmatprep.mubr.msk.f32.mxu1 %vm8411_vm1, %v9579_v12 }
0x1233   : > { %8029 = vmatprep.subr.mxu1 %v9579_v12 }
0x1266   : > { %v2663_v1 = vpop.xlane.xlu0 %2662  ;;  %v4027_v38 = vpop.xlane.xlu1 %4026 }
0x1267   : > { %v2664_v57 = vsub.f32 %v8972_v31, %v2663_v1  ;;  %8316 = vrcp.f32 %v4027_v38  ;;  %v3049_v31 = vsel %vm1108_vm2, %v8976_v35, -inf }
0x1269   : > { %v2665_v24 = vmul.f32 1.442695, %v2664_v57 }
0x126a   : > { %v4409_v26 = vpop.xlane.xlu1 %4408 }
0x126b   : > { %8318 = vpow2.f32 %v2665_v24  ;;  %v4410_v54 = vsub.f32 %v8990_v34, %v4409_v26 }
0x126d   : > { %v4411_v37 = vmul.f32 1.442695, %v4410_v54 }
0x126f   : > { %8320 = vpow2.f32 %v4411_v37 }
0x1274   : > { %v8317_v58 = vpop.eup %8316 }
0x1275   : > { %v4029_v2 = vmul.f32 %v8317_v58, %v8315_v15 }
0x1277   : > { %4030 = vst.msk [vmem:[%s9025_s23 + $0x78] sm:$0xff] %vm1108_vm2, %v4029_v2 }
0x1278   : > { %v8319_v62 = vpop.eup %8318 }
0x1279   : > { %v2667_v52 = vsel %vm1108_vm2, %v8319_v62, 0.0 }
0x127a   : > { %2668 = vadd.xlane.f32.xlu0 %v2667_v52 }
0x127c   : > { %v8321_v48 = vpop.eup %8320 }
0x127d   : > { %v4413_v39 = vsel %vm1108_vm2, %v8321_v48, 0.0 }
0x127e   : > { %3050 = vmax.xlane.f32.xlu0 %v3049_v31  ;;  %4414 = vadd.xlane.f32.xlu1 %v4413_v39 }
0x12b1   : > { %2867 = vxpose.xlu1.b32.start.end [1/1] (short) (narrow) %v9147_v53, 8 }
0x12b5   : > { %3255 = vxpose.xlu1.b32.start.end [1/1] (short) (narrow) %v3253_v63, 8 }
0x12b9   : > { %3643 = vxpose.xlu1.b32.start.end [1/1] (short) (narrow) %v3641_v13, 8 }
0x12bd   : > { %4031 = vxpose.xlu1.b32.start.end [1/1] (short) (narrow) %v4029_v2, 8 }
0x12ed   : > { %v2386_v34 = vpop.f32.mrf.mxu1 }
0x12ee   : > { %2390 = vst.msk [vmem:[%s9045_s26 + $0x30] sm:$0xff] %vm251_vm0, %v2386_v34 }
0x12ef   : > { %v8013_v42 = vpop.f32.mrf.mxu1 }
0x12f1   : > { %v9195_v55 = vpop.f32.mrf.mxu1 }
0x12f3   : > { %v8018_v46 = vpop.f32.mrf.mxu1 }
0x1303   : > { %v2669_v17 = vpop.xlane.xlu0 %2668 }
0x1304   : > { %8322 = vrcp.f32 %v2669_v17 }
0x1307   : > { %v3051_v59 = vpop.xlane.xlu0 %3050  ;;  %v4415_v14 = vpop.xlane.xlu1 %4414 }
0x1308   : > { %v3052_v56 = vsub.f32 %v8976_v35, %v3051_v59  ;;  %8324 = vrcp.f32 %v4415_v14  ;;  %v3437_v35 = vsel %vm1108_vm2, %v8980_v41, -inf  ;;  %v4213_v14 = vsel %vm1108_vm2, %v8988_v27, -inf }
0x130a   : > { %v3053_v53 = vmul.f32 1.442695, %v3052_v56 }
0x130c   : > { %8326 = vpow2.f32 %v3053_v53 }
0x1311   : > { %v8323_v63 = vpop.eup %8322 }
0x1312   : > { %v9198_v0 = vmul.f32 %v8323_v63, %v8319_v62  ;;  %v5183_v63 = vsel %vm1108_vm2, %v8998_v25, -inf }
0x1314   : > { %2672 = vst.msk [vmem:[%s9025_s23 + $0x40] sm:$0xff] %vm1108_vm2, %v9198_v0 }
0x1315   : > { %v8325_v43 = vpop.eup %8324 }
0x1316   : > { %v4417_v60 = vmul.f32 %v8325_v43, %v8321_v48  ;;  %v2467_v48 = vsel %vm1108_vm2, %v9195_v55, -inf }
0x1318   : > { %4419 = vxpose.xlu1.b32.start.end [1/1] (short) (narrow) %v4417_v60, 8  ;;  %4418 = vst.msk [vmem:[%s9025_s23 + $0x88] sm:$0xff] %vm1108_vm2, %v4417_v60 }
0x1319   : > { %v8327_v3 = vpop.eup %8326 }
0x131a   : > { %v3055_v45 = vsel %vm1108_vm2, %v8327_v3, 0.0 }
0x131b   : > { %3056 = vadd.xlane.f32.xlu0 %v3055_v45 }
0x131f   : > { %3438 = vmax.xlane.f32.xlu0 %v3437_v35 }
0x132d   : > { %v9211_v51 = vpop.trf.xlu1 }
0x1331   : > { %v9213_v50 = vpop.trf.xlu1 }
0x1335   : > { %v9220_v38 = vpop.trf.xlu1 }
0x1339   : > { %v9223_v26 = vpop.trf.xlu1 }
0x133f   : > { %4796 = vmax.xlane.f32.xlu1 %v4795_v49 }
0x1394   : > { %v9227_v54 = vpop.trf.xlu1 }
0x13a4   : > { %v3057_v33 = vpop.xlane.xlu0 %3056 }
0x13a5   : > { %8328 = vrcp.f32 %v3057_v33 }
0x13a8   : > { %v3439_v13 = vpop.xlane.xlu0 %3438 }
0x13a9   : > { %v3440_v15 = vsub.f32 %v8980_v41, %v3439_v13  ;;  %v3825_v41 = vsel %vm1108_vm2, %v8984_v61, -inf }
0x13ab   : > { %v3441_v47 = vmul.f32 1.442695, %v3440_v15  ;;  %v4601_v15 = vsel %vm1108_vm2, %v8992_v40, -inf }
0x13ad   : > { %8330 = vpow2.f32 %v3441_v47 }
0x13b2   : > { %v8329_v44 = vpop.eup %8328 }
0x13b3   : > { %v9215_v1 = vmul.f32 %v8329_v44, %v8327_v3 }
0x13b5   : > { %3060 = vst.msk [vmem:[%s9025_s23 + $0x50] sm:$0xff] %vm1108_vm2, %v9215_v1 }
0x13ba   : > { %v8331_v57 = vpop.eup %8330 }
0x13bb   : > { %v3443_v24 = vsel %vm1108_vm2, %v8331_v57, 0.0 }
0x13bc   : > { %3444 = vadd.xlane.f32.xlu0 %v3443_v24 }
0x13c0   : > { %3826 = vmax.xlane.f32.xlu0 %v3825_v41 }
0x13c8   : > { %v4797_v37 = vpop.xlane.xlu1 %4796 }
0x13c9   : > { %v4798_v58 = vsub.f32 %v8994_v29, %v4797_v37 }
0x13cb   : > { %v4799_v2 = vmul.f32 1.442695, %v4798_v58  ;;  %v5571_v58 = vsel %vm1108_vm2, %v9002_v22, -inf }
0x13cd   : > { %8332 = vpow2.f32 %v4799_v2  ;;  %v5765_v2 = vsel %vm1108_vm2, %v9004_v23, -inf }
0x13da   : > { %v8333_v62 = vpop.eup %8332 }
0x13db   : > { %v4801_v52 = vsel %vm1108_vm2, %v8333_v62, 0.0 }
0x13dc   : > { %4802 = vadd.xlane.f32.xlu1 %v4801_v52  ;;  %v6541_v52 = vsel %vm1108_vm2, %v9012_v19, -inf }
0x13e0   : > { %2468 = vmax.xlane.f32.xlu1 %v2467_v48  ;;  %v6735_v48 = vsel %vm1108_vm2, %v9014_v16, -inf }
0x1445   : > { %v3445_v31 = vpop.xlane.xlu0 %3444 }
0x1446   : > { %8334 = vrcp.f32 %v3445_v31  ;;  %v6929_v31 = vsel %vm1108_vm2, %v9016_v32, -inf }
0x1449   : > { %v3827_v39 = vpop.xlane.xlu0 %3826 }
0x144a   : > { %v3828_v34 = vsub.f32 %v8984_v61, %v3827_v39  ;;  %v7123_v39 = vsel %vm1108_vm2, %v9018_v36, -inf }
0x144c   : > { %v3829_v42 = vmul.f32 1.442695, %v3828_v34 }
0x144e   : > { %8336 = vpow2.f32 %v3829_v42 }
0x1453   : > { %v8335_v29 = vpop.eup %8334 }
0x1454   : > { %v9234_v46 = vmul.f32 %v8335_v29, %v8331_v57 }
0x1456   : > { %3448 = vst.msk [vmem:[%s9025_s23 + $0x60] sm:$0xff] %vm1108_vm2, %v9234_v46 }
0x145b   : > { %v8337_v17 = vpop.eup %8336 }
0x145c   : > { %v3831_v59 = vsel %vm1108_vm2, %v8337_v17, 0.0 }
0x145d   : > { %3832 = vadd.xlane.f32.xlu0 %v3831_v59 }
0x1461   : > { %4214 = vmax.xlane.f32.xlu0 %v4213_v14 }
0x1465   : > { %v4803_v56 = vpop.xlane.xlu1 %4802 }
0x1466   : > { %8338 = vrcp.f32 %v4803_v56 }
0x1469   : > { %v9255_v47 = vpop.xlane.xlu1 %2468 }
0x1473   : > { %v8339_v61 = vpop.eup %8338 }
0x1474   : > { %v4805_v53 = vmul.f32 %v8339_v61, %v8333_v62  ;;  %v5959_v62 = vsel %vm1108_vm2, %v9006_v20, -inf }
0x1476   : > { %4807 = vxpose.xlu1.b32.start.end [1/1] (short) (narrow) %v4805_v53, 8  ;;  %4806 = vst.msk [vmem:[%s9025_s23 + $0x98] sm:$0xff] %vm1108_vm2, %v4805_v53  ;;  %v4989_v53 = vsel %vm1108_vm2, %v8996_v30, -inf }
0x149d   : > { %5184 = vmax.xlane.f32.xlu1 %v5183_v63 }
0x14e6   : > { %v3833_v43 = vpop.xlane.xlu0 %3832 }
0x14e7   : > { %8340 = vrcp.f32 %v3833_v43 }
0x14ea   : > { %v4215_v60 = vpop.xlane.xlu0 %4214 }
0x14eb   : > { %v4216_v3 = vsub.f32 %v8988_v27, %v4215_v60 }
0x14ed   : > { %v4217_v45 = vmul.f32 1.442695, %v4216_v3 }
0x14ef   : > { %8342 = vpow2.f32 %v4217_v45 }
0x14f2   : > { %v9257_v44 = vpop.trf.xlu1 }
0x14f4   : > { %v8341_v35 = vpop.eup %8340 }
0x14f5   : > { %v9247_v49 = vmul.f32 %v8341_v35, %v8337_v17 }
0x14f7   : > { %3836 = vst.msk [vmem:[%s9025_s23 + $0x70] sm:$0xff] %vm1108_vm2, %v9247_v49 }
0x14fc   : > { %v8343_v33 = vpop.eup %8342 }
0x14fd   : > { %v4219_v13 = vsel %vm1108_vm2, %v8343_v33, 0.0 }
0x14fe   : > { %4220 = vadd.xlane.f32.xlu0 %v4219_v13 }
0x1502   : > { %4602 = vmax.xlane.f32.xlu0 %v4601_v15 }
0x1526   : > { %v5185_v27 = vpop.xlane.xlu1 %5184 }
0x1527   : > { %v5186_v57 = vsub.f32 %v8998_v25, %v5185_v27  ;;  %v6347_v25 = vsel %vm1108_vm2, %v9010_v18, -inf }
0x1529   : > { %v5187_v24 = vmul.f32 1.442695, %v5186_v57 }
0x152b   : > { %8344 = vpow2.f32 %v5187_v24 }
0x1538   : > { %v8345_v41 = vpop.eup %8344 }
0x1539   : > { %v5189_v37 = vsel %vm1108_vm2, %v8345_v41, 0.0 }
0x153a   : > { %5190 = vadd.xlane.f32.xlu1 %v5189_v37 }
0x153e   : > { %5572 = vmax.xlane.f32.xlu1 %v5571_v58 }
0x1542   : > { %5766 = vmax.xlane.f32.xlu1 %v5765_v2 }
0x1546   : > { %5960 = vmax.xlane.f32.xlu1 %v5959_v62 }
0x154a   : > { %6348 = vmax.xlane.f32.xlu1 %v6347_v25 }
0x154e   : > { %6542 = vmax.xlane.f32.xlu1 %v6541_v52 }
0x1552   : > { %6736 = vmax.xlane.f32.xlu1 %v6735_v48 }
0x1556   : > { %6930 = vmax.xlane.f32.xlu1 %v6929_v31 }
0x155a   : > { %7124 = vmax.xlane.f32.xlu1 %v7123_v39 }
0x1587   : > { %v4221_v34 = vpop.xlane.xlu0 %4220 }
0x1588   : > { %8346 = vrcp.f32 %v4221_v34 }
0x158b   : > { %v4603_v42 = vpop.xlane.xlu0 %4602 }
0x158c   : > { %v4604_v29 = vsub.f32 %v8992_v40, %v4603_v42 }
0x158e   : > { %v4605_v17 = vmul.f32 1.442695, %v4604_v29 }
0x1590   : > { %8348 = vpow2.f32 %v4605_v17 }
0x1595   : > { %v8347_v59 = vpop.eup %8346 }
0x1596   : > { %v9278_v14 = vmul.f32 %v8347_v59, %v8343_v33 }
0x1598   : > { %4224 = vst.msk [vmem:[%s9025_s23 + $0x80] sm:$0xff] %vm1108_vm2, %v9278_v14 }
0x159d   : > { %v9283_v56 = vpop.eup %8348 }
0x159e   : > { %v4607_v61 = vsel %vm1108_vm2, %v9283_v56, 0.0 }
0x159f   : > { %4608 = vadd.xlane.f32.xlu0 %v4607_v61 }
0x15a3   : > { %4990 = vmax.xlane.f32.xlu0 %v4989_v53 }
0x15c3   : > { %v5191_v40 = vpop.xlane.xlu1 %5190 }
0x15c4   : > { %8350 = vrcp.f32 %v5191_v40 }
0x15c7   : > { %v5573_v63 = vpop.xlane.xlu1 %5572 }
0x15c8   : > { %v5574_v43 = vsub.f32 %v9002_v22, %v5573_v63 }
0x15ca   : > { %v5575_v60 = vmul.f32 1.442695, %v5574_v43 }
0x15cb   : > { %v9290_v3 = vpop.xlane.xlu1 %5766 }
0x15cc   : > { %8352 = vpow2.f32 %v5575_v60 }
0x15cf   : > { %v5961_v45 = vpop.xlane.xlu1 %5960 }
0x15d0   : > { %v5962_v35 = vsub.f32 %v9006_v20, %v5961_v45 }
0x15d1   : > { %v8351_v33 = vpop.eup %8350 }
0x15d2   : > { %v5963_v13 = vmul.f32 1.442695, %v5962_v35  ;;  %v5193_v15 = vmul.f32 %v8351_v33, %v8345_v41  ;;  %v2470_v41 = vsub.f32 %v9195_v55, %v9255_v47 }
0x15d3   : > { %v6349_v27 = vpop.xlane.xlu1 %6348 }
0x15d4   : > { %8354 = vpow2.f32 %v5963_v13  ;;  %v6350_v57 = vsub.f32 %v9010_v18, %v6349_v27  ;;  %5194 = vst.msk [vmem:[%s9025_s23 + $0xa8] sm:$0xff] %vm1108_vm2, %v5193_v15  ;;  %v2471_v39 = vmul.f32 1.442695, %v2470_v41 }
0x15d6   : > { %v6351_v24 = vmul.f32 1.442695, %v6350_v57 }
0x15d7   : > { %v6543_v37 = vpop.xlane.xlu1 %6542 }
0x15d8   : > { %8356 = vpow2.f32 %v6351_v24  ;;  %v6544_v22 = vsub.f32 %v9012_v19, %v6543_v37 }
0x15d9   : > { %v8353_v58 = vpop.eup %8352 }
0x15da   : > { %v6545_v2 = vmul.f32 1.442695, %v6544_v22  ;;  %v5577_v62 = vsel %vm1108_vm2, %v8353_v58, 0.0 }
0x15db   : > { %v6737_v25 = vpop.xlane.xlu1 %6736  ;;  %5578 = vadd.xlane.f32.xlu1 %v5577_v62 }
0x15dc   : > { %8358 = vpow2.f32 %v6545_v2  ;;  %v6738_v20 = vsub.f32 %v9014_v16, %v6737_v25 }
0x15de   : > { %v6739_v18 = vmul.f32 1.442695, %v6738_v20 }
0x15df   : > { %v6931_v52 = vpop.xlane.xlu1 %6930 }
0x15e0   : > { %8360 = vpow2.f32 %v6739_v18  ;;  %v6932_v48 = vsub.f32 %v9016_v32, %v6931_v52 }
0x15e1   : > { %v8355_v31 = vpop.eup %8354 }
0x15e2   : > { %v6933_v19 = vmul.f32 1.442695, %v6932_v48  ;;  %v5965_v34 = vsel %vm1108_vm2, %v8355_v31, 0.0 }
0x15e3   : > { %5966 = vadd.xlane.f32.xlu1 %v5965_v34  ;;  %v7125_v27 = vpop.xlane.xlu1 %7124 }
0x15e4   : > { %8362 = vpow2.f32 %v6933_v19 }
0x15e5   : > { %v8357_v42 = vpop.eup %8356  ;;  %8364 = vpow2.f32 %v2471_v39 }
0x15e6   : > { %v6353_v29 = vsel %vm1108_vm2, %v8357_v42, 0.0 }
0x15e7   : > { %6354 = vadd.xlane.f32.xlu1 %v6353_v29 }
0x15e9   : > { %v8359_v16 = vpop.eup %8358 }
0x15ea   : > { %v6547_v55 = vsel %vm1108_vm2, %v8359_v16, 0.0 }
0x15eb   : > { %6548 = vadd.xlane.f32.xlu1 %v6547_v55  ;;  %v7126_v55 = vsub.f32 %v9018_v36, %v7125_v27 }
0x15ed   : > { %v8361_v47 = vpop.eup %8360 }
0x15ee   : > { %v6741_v17 = vsel %vm1108_vm2, %v8361_v47, 0.0 }
0x15ef   : > { %6742 = vadd.xlane.f32.xlu1 %v6741_v17 }
0x15f1   : > { %v8363_v32 = vpop.eup %8362 }
0x15f2   : > { %v6935_v59 = vsel %vm1108_vm2, %v8363_v32, 0.0  ;;  %v8365_v61 = vpop.eup %8364 }
0x15f3   : > { %6936 = vadd.xlane.f32.xlu1 %v6935_v59  ;;  %v2473_v53 = vsel %vm1108_vm2, %v8365_v61, 0.0 }
0x15f7   : > { %2474 = vadd.xlane.f32.xlu1 %v2473_v53 }
0x1628   : > { %v4609_v40 = vpop.xlane.xlu0 %4608 }
0x1629   : > { %8366 = vrcp.f32 %v4609_v40 }
0x162a   : > { %5195 = vxpose.xlu1.b32.start.end [1/1] (short) (narrow) %v5193_v15, 8  ;;  %v5377_v15 = vsel %vm1108_vm2, %v9000_v28, -inf }
0x162c   : > { %v4991_v63 = vpop.xlane.xlu0 %4990 }
0x162d   : > { %v4992_v43 = vsub.f32 %v8996_v30, %v4991_v63 }
0x162f   : > { %v4993_v60 = vmul.f32 1.442695, %v4992_v43 }
0x1631   : > { %8368 = vpow2.f32 %v4993_v60 }
0x1636   : > { %v8367_v45 = vpop.eup %8366 }
0x1637   : > { %v9310_v35 = vmul.f32 %v8367_v45, %v9283_v56 }
0x1639   : > { %4612 = vst.msk [vmem:[%s9025_s23 + $0x90] sm:$0xff] %vm1108_vm2, %v9310_v35 }
0x163e   : > { %v8369_v33 = vpop.eup %8368 }
0x163f   : > { %v4995_v13 = vsel %vm1108_vm2, %v8369_v33, 0.0 }
0x1640   : > { %4996 = vadd.xlane.f32.xlu0 %v4995_v13  ;;  %v6153_v13 = vsel %vm1108_vm2, %v9008_v21, -inf }
0x1644   : > { %5378 = vmax.xlane.f32.xlu0 %v5377_v15 }
0x1664   : > { %v5579_v30 = vpop.xlane.xlu1 %5578 }
0x1665   : > { %8370 = vrcp.f32 %v5579_v30 }
0x166c   : > { %v5967_v57 = vpop.xlane.xlu1 %5966 }
0x166d   : > { %8372 = vrcp.f32 %v5967_v57 }
0x1670   : > { %v6355_v56 = vpop.xlane.xlu1 %6354 }
0x1671   : > { %8374 = vrcp.f32 %v6355_v56 }
0x1672   : > { %v8371_v24 = vpop.eup %8370 }
0x1673   : > { %v5581_v37 = vmul.f32 %v8371_v24, %v8353_v58 }
0x1674   : > { %v6549_v22 = vpop.xlane.xlu1 %6548 }
0x1675   : > { %8376 = vrcp.f32 %v6549_v22  ;;  %5583 = vxpose.xlu1.b32.start.end [1/1] (short) (narrow) %v5581_v37, 8  ;;  %5582 = vst.msk [vmem:[%s9025_s23 + $0xb8] sm:$0xff] %vm1108_vm2, %v5581_v37  ;;  %v9585_v22 = vld [vmem:[#allocation6_spill] sm:$0xff] }
0x1678   : > { %v6743_v2 = vpop.xlane.xlu1 %6742 }
0x1679   : > { %8378 = vrcp.f32 %v6743_v2 }
0x167a   : > { %v8373_v62 = vpop.eup %8372 }
0x167b   : > { %v5969_v25 = vmul.f32 %v8373_v62, %v8355_v31 }
0x167c   : > { %v6937_v20 = vpop.xlane.xlu1 %6936 }
0x167d   : > { %8380 = vrcp.f32 %v6937_v20  ;;  %5970 = vst.msk [vmem:[%s9025_s23 + $0xc8] sm:$0xff] %vm1108_vm2, %v5969_v25  ;;  %v9587_v20 = vld [vmem:[#allocation8_spill] sm:$0xff] }
0x167e   : > { %v8375_v41 = vpop.eup %8374 }
0x167f   : > { %v9322_v18 = vmul.f32 %v8375_v41, %v8357_v42  ;;  %v9588_v41 = vld [vmem:[#allocation11_spill] sm:$0xff] }
0x1680   : > { %v2475_v58 = vpop.xlane.xlu1 %2474 }
0x1681   : > { %8382 = vrcp.f32 %v2475_v58  ;;  %6358 = vst.msk [vmem:[%s9025_s23 + $0xd8] sm:$0xff] %vm1108_vm2, %v9322_v18 }
0x1682   : > { %v8377_v52 = vpop.eup %8376 }
0x1683   : > { %v6551_v48 = vmul.f32 %v8377_v52, %v8359_v16  ;;  %v7127_v16 = vmul.f32 1.442695, %v7126_v55  ;;  %v9589_v52 = vld [vmem:[#allocation10_spill] sm:$0xff] }
0x1685   : > { %6552 = vst.msk [vmem:[%s9025_s23 + $0xe0] sm:$0xff] %vm1108_vm2, %v6551_v48  ;;  %8384 = vpow2.f32 %v7127_v16 }
0x1686   : > { %v8379_v39 = vpop.eup %8378 }
0x1687   : > { %v9329_v31 = vmul.f32 %v8379_v39, %v8361_v47  ;;  %v9590_v39 = vld [vmem:[#allocation13_spill] sm:$0xff] }
0x1689   : > { %6746 = vst.msk [vmem:[%s9025_s23 + $0xe8] sm:$0xff] %vm1108_vm2, %v9329_v31 }
0x168a   : > { %v8381_v19 = vpop.eup %8380 }
0x168b   : > { %v6939_v34 = vmul.f32 %v8381_v19, %v8363_v32 }
0x168d   : > { %6940 = vst.msk [vmem:[%s9025_s23 + $0xf0] sm:$0xff] %vm1108_vm2, %v6939_v34 }
0x168e   : > { %v8383_v42 = vpop.eup %8382 }
0x168f   : > { %v2477_v29 = vmul.f32 %v8383_v42, %v8365_v61  ;;  %v5768_v61 = vsub.f32 %v9004_v23, %v9290_v3 }
0x1691   : > { %2479 = vxpose.xlu1.b32.start.end [1/1] (short) (narrow) %v2477_v29, 8  ;;  %2478 = vst.msk [vmem:[%s9025_s23 + $0x38] sm:$0xff] %vm1108_vm2, %v2477_v29  ;;  %v5769_v63 = vmul.f32 1.442695, %v5768_v61 }
0x1692   : > { %v8385_v17 = vpop.eup %8384 }
0x1693   : > { %v7129_v47 = vsel %vm1108_vm2, %v8385_v17, 0.0 }
0x16a6   : > { %v9349_v23 = vpop.trf.xlu1 }
0x16b8   : > { %7130 = vadd.xlane.f32.xlu1 %v7129_v47 }
0x16c9   : > { %v4997_v59 = vpop.xlane.xlu0 %4996 }
0x16ca   : > { %8386 = vrcp.f32 %v4997_v59 }
0x16cd   : > { %v5379_v53 = vpop.xlane.xlu0 %5378 }
0x16ce   : > { %v5380_v32 = vsub.f32 %v9000_v28, %v5379_v53 }
0x16d0   : > { %v5381_v40 = vmul.f32 1.442695, %v5380_v32 }
0x16d2   : > { %8388 = vpow2.f32 %v5381_v40 }
0x16d3   : > { %8390 = vpow2.f32 %v5769_v63 }
0x16d7   : > { %v8387_v43 = vpop.eup %8386 }
0x16d8   : > { %v4999_v36 = vmul.f32 %v8387_v43, %v8369_v33 }
0x16da   : > { %5000 = vst.msk [vmem:[%s9025_s23 + $0xa0] sm:$0xff] %vm1108_vm2, %v4999_v36 }
0x16df   : > { %v8389_v60 = vpop.eup %8388 }
0x16e0   : > { %v5383_v45 = vsel %vm1108_vm2, %v8389_v60, 0.0  ;;  %v8391_v15 = vpop.eup %8390 }
0x16e1   : > { %5384 = vadd.xlane.f32.xlu0 %v5383_v45  ;;  %v5771_v28 = vsel %vm1108_vm2, %v8391_v15, 0.0 }
0x16e5   : > { %6154 = vmax.xlane.f32.xlu0 %v6153_v13 }
0x16e9   : > { %5772 = vadd.xlane.f32.xlu0 %v5771_v28 }
0x16eb   : > { %5971 = vxpose.xlu1.b32.start.end [1/1] (short) (narrow) %v5969_v25, 8 }
0x16ef   : > { %6553 = vxpose.xlu1.b32.start.end [1/1] (short) (narrow) %v6551_v48, 8 }
0x16f1   : > { %v9351_v3 = vpop.trf.xlu1 }
0x16f3   : > { %6941 = vxpose.xlu1.b32.start.end [1/1] (short) (narrow) %v6939_v34, 8 }
0x170d   : > { %v2495_v33 = vpop.trf.xlu1 }
0x170e   : > { %8022 = vmatmul.mubr.msk.f32.vlgmr.msra.gmra.mxu1 %vm1108_vm2, %v2495_v33 }
0x170f   : > { %8030 = vmatpush3.msra.mxu1 %v8925_v5  ;;  %8031 = vmatprep.mubr.msk.f32.mxu1 %vm8411_vm1, %v9579_v12 }
0x1710   : > { %8039 = vmatprep.subr.mxu1 %v9579_v12 }
0x1716   : > { %2673 = vxpose.xlu0.b32.start.end [1/1] (short) (narrow) %v9198_v0, 8 }
0x171a   : > { %3061 = vxpose.xlu0.b32.start.end [1/1] (short) (narrow) %v9215_v1, 8 }
0x171e   : > { %3449 = vxpose.xlu0.b32.start.end [1/1] (short) (narrow) %v9234_v46, 8 }
0x1722   : > { %3837 = vxpose.xlu0.b32.start.end [1/1] (short) (narrow) %v9247_v49, 8 }
0x1726   : > { %4225 = vxpose.xlu0.b32.start.end [1/1] (short) (narrow) %v9278_v14, 8 }
0x172a   : > { %4613 = vxpose.xlu0.b32.start.end [1/1] (short) (narrow) %v9310_v35, 8 }
0x172e   : > { %5001 = vxpose.xlu0.b32.start.end [1/1] (short) (narrow) %v4999_v36, 8 }
0x1741   : > { %v7131_v5 = vpop.xlane.xlu1 %7130 }
0x1742   : > { %8392 = vrcp.f32 %v7131_v5 }
0x174f   : > { %v8393_v27 = vpop.eup %8392 }
0x1750   : > { %v9364_v30 = vmul.f32 %v8393_v27, %v8385_v17 }
0x1752   : > { %7134 = vst.msk [vmem:[%s9025_s23 + $0xf8] sm:$0xff] %vm1108_vm2, %v9364_v30 }
0x1767   : > { %v5987_v48 = vpop.trf.xlu1 }
0x176a   : > { %v5385_v0 = vpop.xlane.xlu0 %5384 }
0x176b   : > { %8394 = vrcp.f32 %v5385_v0 }
0x176e   : > { %v6155_v1 = vpop.xlane.xlu0 %6154 }
0x176f   : > { %v6156_v24 = vsub.f32 %v9008_v21, %v6155_v1 }
0x1772   : > { %v5773_v46 = vpop.xlane.xlu0 %5772 }
0x1773   : > { %8396 = vrcp.f32 %v5773_v46 }
0x1778   : > { %v8395_v49 = vpop.eup %8394 }
0x1779   : > { %v5387_v57 = vmul.f32 %v8395_v49, %v8389_v60 }
0x177b   : > { %5388 = vst.msk [vmem:[%s9025_s23 + $0xb0] sm:$0xff] %vm1108_vm2, %v5387_v57  ;;  %5389 = vxpose.xlu0.b32.start.end [1/1] (short) (narrow) %v5387_v57, 8 }
0x1780   : > { %v8397_v14 = vpop.eup %8396 }
0x1781   : > { %v5775_v35 = vmul.f32 %v8397_v14, %v8391_v15 }
0x1783   : > { %5777 = vxpose.xlu0.b32.start.end [1/1] (short) (narrow) %v5775_v35, 8  ;;  %5776 = vst.msk [vmem:[%s9025_s23 + $0xc0] sm:$0xff] %vm1108_vm2, %v5775_v35 }
0x1792   : > { %v2689_v56 = vpop.trf.xlu0 }
0x1793   : > { %8032 = vmatmul.mubr.msk.f32.vlgmr.msra.gmra.mxu1 %vm1108_vm2, %v2689_v56 }
0x1794   : > { %8040 = vmatpush3.msra.mxu1 %v8923_v4  ;;  %8041 = vmatprep.mubr.msk.f32.mxu1 %vm8411_vm1, %v9579_v12  ;;  %v6157_v4 = vmul.f32 1.442695, %v6156_v24 }
0x1795   : > { %8049 = vmatprep.subr.mxu1 %v9579_v12 }
0x1796   : > { %v3077_v37 = vpop.trf.xlu0  ;;  %8398 = vpow2.f32 %v6157_v4 }
0x1797   : > { %8042 = vmatmul.mubr.msk.f32.vlgmr.msra.gmra.mxu1 %vm1108_vm2, %v9211_v51  ;;  %v9582_v51 = vld [vmem:[#allocation5_spill] sm:$0xff] }
0x1798   : > { %8050 = vmatpush3.msra.mxu1 %v8929_v7  ;;  %8051 = vmatprep.mubr.msk.f32.mxu1 %vm8411_vm1, %v9579_v12 }
0x1799   : > { %8059 = vmatprep.subr.mxu1 %v9579_v12 }
0x179a   : > { %v3465_v7 = vpop.trf.xlu0 }
0x179b   : > { %8052 = vmatmul.mubr.msk.f32.vlgmr.msra.gmra.mxu1 %vm1108_vm2, %v3077_v37 }
0x179c   : > { %8060 = vmatpush3.msra.mxu1 %v8927_v6  ;;  %8061 = vmatprep.mubr.msk.f32.mxu1 %vm8411_vm1, %v9579_v12 }
0x179d   : > { %8069 = vmatprep.subr.mxu1 %v9579_v12 }
0x179e   : > { %v3853_v6 = vpop.trf.xlu0 }
0x179f   : > { %8062 = vmatmul.mubr.msk.f32.vlgmr.msra.gmra.mxu1 %vm1108_vm2, %v9213_v50 }
0x17a0   : > { %8070 = vmatpush3.msra.mxu1 %v8933_v9  ;;  %8071 = vmatprep.mubr.msk.f32.mxu1 %vm8411_vm1, %v9579_v12  ;;  %v9580_v9 = vld [vmem:[#allocation3_spill] sm:$0xff] }
0x17a1   : > { %8079 = vmatprep.subr.mxu1 %v9579_v12 }
0x17a2   : > { %v4241_v21 = vpop.trf.xlu0 }
0x17a3   : > { %8072 = vmatmul.mubr.msk.f32.vlgmr.msra.gmra.mxu1 %vm1108_vm2, %v3465_v7  ;;  %v9591_v7 = vld [vmem:[#allocation12_spill] sm:$0xff] }
0x17a4   : > { %8080 = vmatpush3.msra.mxu1 %v8931_v8  ;;  %8081 = vmatprep.mubr.msk.f32.mxu1 %vm8411_vm1, %v9579_v12  ;;  %v8399_v8 = vpop.eup %8398 }
0x17a5   : > { %8089 = vmatprep.subr.mxu1 %v9579_v12 }
0x17a6   : > { %v4629_v50 = vpop.trf.xlu0 }
0x17a7   : > { %8082 = vmatmul.mubr.msk.f32.vlgmr.msra.gmra.mxu1 %vm1108_vm2, %v9220_v38  ;;  %v9583_v38 = vld [vmem:[#allocation4_spill] sm:$0xff] }
0x17a8   : > { %8090 = vmatpush3.msra.mxu1 %v8937_v11  ;;  %8091 = vmatprep.mubr.msk.f32.mxu1 %vm8411_vm1, %v9579_v12  ;;  %v6159_v11 = vsel %vm1108_vm2, %v8399_v8, 0.0 }
0x17a9   : > { %8099 = vmatprep.subr.mxu1 %v9579_v12 }
0x17ab   : > { %8092 = vmatmul.mubr.msk.f32.vlgmr.msra.gmra.mxu1 %vm1108_vm2, %v3853_v6 }
0x17ac   : > { %8100 = vmatpush3.msra.mxu1 %v8935_v10  ;;  %8101 = vmatprep.mubr.msk.f32.mxu1 %vm8411_vm1, %v9579_v12  ;;  %v9581_v10 = vld [vmem:[#allocation2_spill] sm:$0xff] }
0x17ad   : > { %8109 = vmatprep.subr.mxu1 %v9579_v12 }
0x17af   : > { %8102 = vmatmul.mubr.msk.f32.vlgmr.msra.gmra.mxu1 %vm1108_vm2, %v9223_v26  ;;  %v9584_v26 = vld [vmem:[#allocation7_spill] sm:$0xff] }
0x17b0   : > { %8110 = vmatpush3.msra.mxu1 %v9580_v9  ;;  %8111 = vmatprep.mubr.msk.f32.mxu1 %vm8411_vm1, %v9579_v12  ;;  %v6569_v9 = vpop.trf.xlu1 }
0x17b1   : > { %6160 = vadd.xlane.f32.xlu0 %v6159_v11  ;;  %8119 = vmatprep.subr.mxu1 %v9579_v12  ;;  %v9593_v11 = vld [vmem:[#allocation14_spill] sm:$0xff] }
0x17b3   : > { %8112 = vmatmul.mubr.msk.f32.vlgmr.msra.gmra.mxu1 %vm1108_vm2, %v4241_v21 }
0x17b4   : > { %8120 = vmatpush3.msra.mxu1 %v9581_v10  ;;  %8121 = vmatprep.mubr.msk.f32.mxu1 %vm8411_vm1, %v9579_v12  ;;  %v9594_v10 = vld [vmem:[#allocation17_spill] sm:$0xff] }
0x17b5   : > { %8129 = vmatprep.subr.mxu1 %v9579_v12 }
0x17b7   : > { %8122 = vmatmul.mubr.msk.f32.vlgmr.msra.gmra.mxu1 %vm1108_vm2, %v9227_v54  ;;  %v5017_v54 = vpop.trf.xlu0 }
0x17b8   : > { %8130 = vmatpush3.msra.mxu1 %v9582_v51  ;;  %8131 = vmatprep.mubr.msk.f32.mxu1 %vm8411_vm1, %v9579_v12  ;;  %v6957_v51 = vpop.trf.xlu1 }
0x17b9   : > { %8139 = vmatprep.subr.mxu1 %v9579_v12 }
0x17bb   : > { %8132 = vmatmul.mubr.msk.f32.vlgmr.msra.gmra.mxu1 %vm1108_vm2, %v4629_v50  ;;  %v9595_v50 = vld [vmem:[#allocation16_spill] sm:$0xff] }
0x17bc   : > { %8140 = vmatpush3.msra.mxu1 %v9583_v38  ;;  %8141 = vmatprep.mubr.msk.f32.mxu1 %vm8411_vm1, %v9579_v12 }
0x17bd   : > { %8149 = vmatprep.subr.mxu1 %v9579_v12 }
0x17bf   : > { %8142 = vmatmul.mubr.msk.f32.vlgmr.msra.gmra.mxu1 %vm1108_vm2, %v9257_v44  ;;  %v9586_v44 = vld [vmem:[#allocation9_spill] sm:$0xff] }
0x17c0   : > { %8150 = vmatpush3.msra.mxu1 %v9584_v26  ;;  %8151 = vmatprep.mubr.msk.f32.mxu1 %vm8411_vm1, %v9579_v12 }
0x17c1   : > { %8159 = vmatprep.subr.mxu1 %v9579_v12 }
0x17c3   : > { %8152 = vmatmul.mubr.msk.f32.vlgmr.msra.gmra.mxu1 %vm1108_vm2, %v5017_v54 }
0x17c4   : > { %8160 = vmatpush3.msra.mxu1 %v9585_v22  ;;  %8161 = vmatprep.mubr.msk.f32.mxu1 %vm8411_vm1, %v9579_v12 }
0x17c5   : > { %8169 = vmatprep.subr.mxu1 %v9579_v12 }
0x17c7   : > { %8162 = vmatmul.mubr.msk.f32.vlgmr.msra.gmra.mxu1 %vm1108_vm2, %v9349_v23 }
0x17c8   : > { %8170 = vmatpush3.msra.mxu1 %v9586_v44  ;;  %8171 = vmatprep.mubr.msk.f32.mxu1 %vm8411_vm1, %v9579_v12 }
0x17c9   : > { %8179 = vmatprep.subr.mxu1 %v9579_v12 }
0x17ce   : > { %v2580_v2 = vpop.f32.mrf.mxu1 }
0x17cf   : > { %2584 = vst.msk [vmem:[%s9045_s26 + $0x38] sm:$0xff] %vm251_vm0, %v2580_v2 }
0x17d0   : > { %v8023_v62 = vpop.f32.mrf.mxu1 }
0x17f7   : > { %v5405_v25 = vpop.trf.xlu0 }
0x17f8   : > { %8172 = vmatmul.mubr.msk.f32.vlgmr.msra.gmra.mxu1 %vm1108_vm2, %v5405_v25 }
0x17f9   : > { %8180 = vmatpush3.msra.mxu1 %v9587_v20  ;;  %8181 = vmatprep.mubr.msk.f32.mxu1 %vm8411_vm1, %v9579_v12 }
0x17fa   : > { %8189 = vmatprep.subr.mxu1 %v9579_v12 }
0x17fc   : > { %8182 = vmatmul.mubr.msk.f32.vlgmr.msra.gmra.mxu1 %vm1108_vm2, %v9351_v3 }
0x17fd   : > { %8190 = vmatpush3.msra.mxu1 %v9588_v41  ;;  %8191 = vmatprep.mubr.msk.f32.mxu1 %vm8411_vm1, %v9579_v12 }
0x17fe   : > { %8199 = vmatprep.subr.mxu1 %v9579_v12 }
0x17ff   : > { %v5793_v58 = vpop.trf.xlu0 }
0x1800   : > { %8192 = vmatmul.mubr.msk.f32.vlgmr.msra.gmra.mxu1 %vm1108_vm2, %v5793_v58 }
0x1801   : > { %8200 = vmatpush3.msra.mxu1 %v9589_v52  ;;  %8201 = vmatprep.mubr.msk.f32.mxu1 %vm8411_vm1, %v9579_v12 }
0x1802   : > { %8209 = vmatprep.subr.mxu1 %v9579_v12 }
0x1804   : > { %8202 = vmatmul.mubr.msk.f32.vlgmr.msra.gmra.mxu1 %vm1108_vm2, %v5987_v48 }
0x1805   : > { %8210 = vmatpush3.msra.mxu1 %v9590_v39  ;;  %8211 = vmatprep.mubr.msk.f32.mxu1 %vm8411_vm1, %v9579_v12 }
0x1806   : > { %8219 = vmatprep.subr.mxu1 %v9579_v12 }
0x183a   : > { %v6161_v19 = vpop.xlane.xlu0 %6160 }
0x183b   : > { %8400 = vrcp.f32 %v6161_v19 }
0x1848   : > { %v8401_v34 = vpop.eup %8400 }
0x1849   : > { %v6163_v42 = vmul.f32 %v8401_v34, %v8399_v8  ;;  %v9592_v8 = vld [vmem:[#allocation15_spill] sm:$0xff] }
0x184b   : > { %6165 = vxpose.xlu0.b32.start.end [1/1] (short) (narrow) %v6163_v42, 8  ;;  %6164 = vst.msk [vmem:[%s9025_s23 + $0xd0] sm:$0xff] %vm1108_vm2, %v6163_v42 }
0x184f   : > { %6359 = vxpose.xlu0.b32.start.end [1/1] (short) (narrow) %v9322_v18, 8 }
0x1853   : > { %6747 = vxpose.xlu0.b32.start.end [1/1] (short) (narrow) %v9329_v31, 8  ;;  %v2774_v29 = vpop.f32.mrf.mxu1 }
0x1854   : > { %2778 = vst.msk [vmem:[%s9045_s26 + $0x40] sm:$0xff] %vm251_vm0, %v2774_v29 }
0x1855   : > { %v8033_v55 = vpop.f32.mrf.mxu1 }
0x1857   : > { %7135 = vxpose.xlu0.b32.start.end [1/1] (short) (narrow) %v9364_v30, 8  ;;  %v2968_v16 = vpop.f32.mrf.mxu1 }
0x1858   : > { %2972 = vst.msk [vmem:[%s9045_s26 + $0x48] sm:$0xff] %vm251_vm0, %v2968_v16 }
0x1859   : > { %v8043_v17 = vpop.f32.mrf.mxu1 }
0x185b   : > { %v3162_v47 = vpop.f32.mrf.mxu1 }
0x185c   : > { %3166 = vst.msk [vmem:[%s9045_s26 + $0x50] sm:$0xff] %vm251_vm0, %v3162_v47 }
0x185d   : > { %v8053_v18 = vpop.f32.mrf.mxu1 }
0x185f   : > { %v3356_v59 = vpop.f32.mrf.mxu1 }
0x1860   : > { %3360 = vst.msk [vmem:[%s9045_s26 + $0x58] sm:$0xff] %vm251_vm0, %v3356_v59 }
0x1861   : > { %v8063_v31 = vpop.f32.mrf.mxu1 }
0x1863   : > { %v3550_v53 = vpop.f32.mrf.mxu1 }
0x1864   : > { %3554 = vst.msk [vmem:[%s9045_s26 + $0x60] sm:$0xff] %vm251_vm0, %v3550_v53 }
0x1865   : > { %v8073_v32 = vpop.f32.mrf.mxu1 }
0x1867   : > { %v3744_v61 = vpop.f32.mrf.mxu1 }
0x1868   : > { %3748 = vst.msk [vmem:[%s9045_s26 + $0x68] sm:$0xff] %vm251_vm0, %v3744_v61 }
0x1869   : > { %v8083_v40 = vpop.f32.mrf.mxu1 }
0x186b   : > { %v3938_v63 = vpop.f32.mrf.mxu1 }
0x186c   : > { %3942 = vst.msk [vmem:[%s9045_s26 + $0x70] sm:$0xff] %vm251_vm0, %v3938_v63 }
0x186d   : > { %v8093_v43 = vpop.f32.mrf.mxu1 }
0x186f   : > { %v4132_v36 = vpop.f32.mrf.mxu1 }
0x1870   : > { %4136 = vst.msk [vmem:[%s9045_s26 + $0x78] sm:$0xff] %vm251_vm0, %v4132_v36 }
0x1871   : > { %v8103_v60 = vpop.f32.mrf.mxu1 }
0x1873   : > { %v4326_v45 = vpop.f32.mrf.mxu1 }
0x1874   : > { %4330 = vst.msk [vmem:[%s9045_s26 + $0x80] sm:$0xff] %vm251_vm0, %v4326_v45 }
0x1875   : > { %v8113_v13 = vpop.f32.mrf.mxu1 }
0x1877   : > { %v4520_v15 = vpop.f32.mrf.mxu1 }
0x1878   : > { %4524 = vst.msk [vmem:[%s9045_s26 + $0x88] sm:$0xff] %vm251_vm0, %v4520_v15 }
0x1879   : > { %v8123_v28 = vpop.f32.mrf.mxu1 }
0x187b   : > { %v4714_v23 = vpop.f32.mrf.mxu1 }
0x187c   : > { %4718 = vst.msk [vmem:[%s9045_s26 + $0x90] sm:$0xff] %vm251_vm0, %v4714_v23 }
0x187d   : > { %v8133_v3 = vpop.f32.mrf.mxu1 }
0x187f   : > { %v4908_v33 = vpop.f32.mrf.mxu1 }
0x1880   : > { %4912 = vst.msk [vmem:[%s9045_s26 + $0x98] sm:$0xff] %vm251_vm0, %v4908_v33 }
0x1881   : > { %v8143_v5 = vpop.f32.mrf.mxu1 }
0x1883   : > { %v5102_v27 = vpop.f32.mrf.mxu1 }
0x1884   : > { %5106 = vst.msk [vmem:[%s9045_s26 + $0xa0] sm:$0xff] %vm251_vm0, %v5102_v27 }
0x1885   : > { %v8153_v30 = vpop.f32.mrf.mxu1 }
0x1887   : > { %v5296_v0 = vpop.f32.mrf.mxu1 }
0x1888   : > { %5300 = vst.msk [vmem:[%s9045_s26 + $0xa8] sm:$0xff] %vm251_vm0, %v5296_v0 }
0x1889   : > { %v8163_v1 = vpop.f32.mrf.mxu1 }
0x18b8   : > { %v5490_v46 = vpop.f32.mrf.mxu1 }
0x18b9   : > { %5494 = vst.msk [vmem:[%s9045_s26 + $0xb0] sm:$0xff] %vm251_vm0, %v5490_v46 }
0x18ba   : > { %v8173_v49 = vpop.f32.mrf.mxu1 }
0x18bc   : > { %v5684_v57 = vpop.f32.mrf.mxu1 }
0x18bd   : > { %5688 = vst.msk [vmem:[%s9045_s26 + $0xb8] sm:$0xff] %vm251_vm0, %v5684_v57 }
0x18be   : > { %v8183_v14 = vpop.f32.mrf.mxu1 }
0x18c0   : > { %v5878_v35 = vpop.f32.mrf.mxu1 }
0x18c1   : > { %5882 = vst.msk [vmem:[%s9045_s26 + $0xc0] sm:$0xff] %vm251_vm0, %v5878_v35 }
0x18c2   : > { %v8193_v56 = vpop.f32.mrf.mxu1 }
0x18c4   : > { %v6072_v24 = vpop.f32.mrf.mxu1 }
0x18c5   : > { %6076 = vst.msk [vmem:[%s9045_s26 + $0xc8] sm:$0xff] %vm251_vm0, %v6072_v24 }
0x18c6   : > { %v8203_v4 = vpop.f32.mrf.mxu1 }
0x18c7   : > { %v6181_v37 = vpop.trf.xlu0 }
0x18c8   : > { %8212 = vmatmul.mubr.msk.f32.vlgmr.msra.gmra.mxu1 %vm1108_vm2, %v6181_v37 }
0x18c9   : > { %8220 = vmatpush3.msra.mxu1 %v9591_v7  ;;  %8221 = vmatprep.mubr.msk.f32.mxu1 %vm8411_vm1, %v9579_v12 }
0x18ca   : > { %8229 = vmatprep.subr.mxu1 %v9579_v12 }
0x18cb   : > { %v6375_v6 = vpop.trf.xlu0 }
0x18cc   : > { %8222 = vmatmul.mubr.msk.f32.vlgmr.msra.gmra.mxu1 %vm1108_vm2, %v6375_v6 }
0x18cd   : > { %8230 = vmatpush3.msra.mxu1 %v9592_v8  ;;  %8231 = vmatprep.mubr.msk.f32.mxu1 %vm8411_vm1, %v9579_v12 }
0x18ce   : > { %8239 = vmatprep.subr.mxu1 %v9579_v12 }
0x18cf   : > { %v6763_v21 = vpop.trf.xlu0 }
0x18d0   : > { %8232 = vmatmul.mubr.msk.f32.vlgmr.msra.gmra.mxu1 %vm1108_vm2, %v6569_v9 }
0x18d1   : > { %8240 = vmatpush3.msra.mxu1 %v9593_v11  ;;  %8241 = vmatprep.mubr.msk.f32.mxu1 %vm8411_vm1, %v9579_v12 }
0x18d2   : > { %8249 = vmatprep.subr.mxu1 %v9579_v12 }
0x18d3   : > { %v7151_v38 = vpop.trf.xlu0 }
0x18d4   : > { %8242 = vmatmul.mubr.msk.f32.vlgmr.msra.gmra.mxu1 %vm1108_vm2, %v6763_v21 }
0x18d5   : > { %8250 = vmatpush3.msra.mxu1 %v9594_v10  ;;  %8251 = vmatprep.mubr.msk.f32.mxu1 %vm8411_vm1, %v9579_v12 }
0x18d6   : > { %8259 = vmatprep.subr.mxu1 %v9579_v12 }
0x18d8   : > { %8252 = vmatmul.mubr.msk.f32.vlgmr.msra.gmra.mxu1 %vm1108_vm2, %v6957_v51 }
0x18d9   : > { %8260 = vmatpush3.msra.mxu1 %v9595_v50  ;;  %8261 = vmatprep.mubr.msk.f32.mxu1 %vm8411_vm1, %v9579_v12 }
0x18dc   : > { %8262 = vmatmul.mubr.msk.f32.vlgmr.msra.gmra.mxu1 %vm1108_vm2, %v7151_v38 }
0x1988   : > { %v6266_v26 = vpop.f32.mrf.mxu1 }
0x1989   : > { %6270 = vst.msk [vmem:[%s9045_s26 + $0xd0] sm:$0xff] %vm251_vm0, %v6266_v26 }
0x198a   : > { %v8213_v54 = vpop.f32.mrf.mxu1 }
0x198c   : > { %v6460_v22 = vpop.f32.mrf.mxu1 }
0x198d   : > { %6464 = vst.msk [vmem:[%s9045_s26 + $0xd8] sm:$0xff] %vm251_vm0, %v6460_v22 }
0x198e   : > { %v8223_v44 = vpop.f32.mrf.mxu1 }
0x1990   : > { %v6654_v2 = vpop.f32.mrf.mxu1 }
0x1991   : > { %6658 = vst.msk [vmem:[%s9045_s26 + $0xe0] sm:$0xff] %vm251_vm0, %v6654_v2 }
0x1992   : > { %v8233_v62 = vpop.f32.mrf.mxu1 }
0x1994   : > { %v6848_v25 = vpop.f32.mrf.mxu1 }
0x1995   : > { %6852 = vst.msk [vmem:[%s9045_s26 + $0xe8] sm:$0xff] %vm251_vm0, %v6848_v25 }
0x1996   : > { %v8243_v20 = vpop.f32.mrf.mxu1 }
0x1998   : > { %v7042_v12 = vpop.f32.mrf.mxu1 }
0x1999   : > { %7046 = vst.msk [vmem:[%s9045_s26 + $0xf0] sm:$0xff] %vm251_vm0, %v7042_v12 }
0x199a   : > { %v8253_v41 = vpop.f32.mrf.mxu1 }
0x199c   : > { %v7236_v58 = vpop.f32.mrf.mxu1 }
0x199d   : > { %7240 = vst.msk [vmem:[%s9045_s26 + $0xf8] sm:$0xff] %vm251_vm0, %v7236_v58 }
0x199e   : > { %v8263_v52 = vpop.f32.mrf.mxu1 }
0x199f PF: > { %s15_s15 = sadd.s32 1, %s8408_s15  }
0x19a0   : > { %p12_p4 = scmp.ge.s32.totalorder %s15_s15, 4  }
0x19a2   :  { %14 = sbr.rel (!%p12_p4) target bundleno = 1 (0x1), region = 75 }

</bundles_post_ra>
